<compile_context>
chip_gen: v7x
topology: tpu7x:2x2x1
jax: 0.10.0
libtpu: 0.0.40
codegen_flags: <defaults>
</compile_context>

<pallas_src>
import jax
import jax.numpy as jnp
from jax import lax
from jax.experimental import pallas as pl
from jax.experimental.pallas import tpu as pltpu


C_MID = 512      # combined channels after the fused 1x1 convs
C_OUT = 768      # output channels of the 3x3 conv
TN = 256         # output-channel tile (768 = 3 * 256)


# ---------------------------------------------------------------------------
# Fused kernel.
#   grid = (N, C_OUT // TN)  -- n outer ("parallel"), channel tile j inner ("arbitrary")
#
# CORRECTNESS NOTE: stage 1 fills `shifted_ref` at j == 0 and stage 2 re-reads it for
# every j of the same image.  This requires n-major / j-minor iteration with j kept
# "arbitrary" (sequential, un-sharded).  Do not reorder or core-shard j without also
# recomputing stage 1 per core / tile.
# ---------------------------------------------------------------------------
def fused_ffm_kernel(x_ref, w1_ref, b1_ref, w3_ref, b3_ref, out_ref, shifted_ref):
    H, W, TNl = out_ref.shape[1], out_ref.shape[2], out_ref.shape[3]
    Cin = x_ref.shape[3]
    Cm = shifted_ref.shape[3]              # 512 combined channels
    j = pl.program_id(1)

    # ---- stage 1 (once per image): fused 1x1 convs -> dx-pre-shifted padded scratch ----
    @pl.when(j == 0)
    def _():
        x = x_ref[0].reshape(H * W, Cin)                     # already bf16 (cast in wrapper)
        res = jnp.dot(x, w1_ref[...], preferred_element_type=jnp.float32) + b1_ref[...]
        res = res.reshape(H, W, Cm).astype(shifted_ref.dtype)

        # Zero only the 1-pixel halo (interior is fully overwritten right below).
        zrow = jnp.zeros((3, 1, W, Cm), shifted_ref.dtype)
        shifted_ref[:, 0:1, :, :] = zrow                     # top halo row (all dx)
        shifted_ref[:, H + 1:H + 2, :, :] = zrow             # bottom halo row (all dx)
        zcol = jnp.zeros((1, H + 2, 1, Cm), shifted_ref.dtype)
        shifted_ref[0:1, :, 0:1, :] = zcol                   # dx = 0 left halo column
        shifted_ref[2:3, :, W - 1:W, :] = zcol               # dx = 2 right halo column

        # Three dx-shifted copies of the zero-padded combined map, built ONCE per image so
        # the 9-tap loop only does cheap third-minor addressing (no per-j sublane relayouts).
        shifted_ref[1, 1:H + 1, :, :] = res                      # dx = 1 (aligned store)
        shifted_ref[0, 1:H + 1, 1:W, :] = res[:, 0:W - 1, :]     # dx = 0
        shifted_ref[2, 1:H + 1, 0:W - 1, :] = res[:, 1:W, :]     # dx = 2

    # ---- stage 2: 3x3 conv (padding=1 via halo) + bias + ReLU for channel tile j ----
    w3j = w3_ref.at[j]                     # (3, 3, 512, TN) view of the resident bf16 weight
    b3j = b3_ref.at[j]                     # (1, TN) f32
    acc = jnp.broadcast_to(b3j[...], (H * W, TNl))            # bias-initialized accumulator
    for dx in range(3):
        for dy in range(3):
            patch = shifted_ref[dx, dy:dy + H].reshape(H * W, Cm)
            acc = acc + jnp.dot(patch, w3j[dy, dx], preferred_element_type=jnp.float32)
    out_ref[0] = jnp.maximum(acc, 0.0).reshape(H, W, TNl).astype(out_ref.dtype)


# ---------------------------------------------------------------------------
# Wrapper (NCHW<->NHWC, bf16 casts, block-diagonal 1x1 weight fold, resident w3 layout)
# ---------------------------------------------------------------------------
def feature_fusion_forward(vit_nchw, cnn_nchw, params, out_dtype=jnp.float32):
    # NCHW -> NHWC fused with the bf16 cast (the transpose already materializes a copy,
    # so the cast is nearly free and halves input DMA bytes into the pallas_call).
    vit = jnp.transpose(vit_nchw, (0, 2, 3, 1)).astype(jnp.bfloat16)
    cnn = jnp.transpose(cnn_nchw, (0, 2, 3, 1)).astype(jnp.bfloat16)
    x = jnp.concatenate([vit, cnn], axis=-1)                 # (N, H, W, Cv+Cc)
    N, H, W, Cin = x.shape
    Cv = vit.shape[-1]
    assert W % 8 == 0, "W must be sublane-aligned"           # TODO(synk): pad + mask ragged W
    n_j = C_OUT // TN

    # Fold the two 1x1 convs into one matmul with a block-diagonal (Cv+Cc, 512) weight.
    w1 = jnp.zeros((Cin, C_MID), jnp.float32)
    w1 = w1.at[:Cv, :256].set(params["wv"]).at[Cv:, 256:].set(params["wc"])
    w1 = w1.astype(jnp.bfloat16)
    b1 = jnp.concatenate([params["bv"].reshape(1, 256),
                          params["bc"].reshape(1, 256)], axis=-1).astype(jnp.float32)

    # Resident 3x3 weight: bf16, output channels split into a leading tile axis so the
    # kernel only dynamically indexes a major dim; constant index map => DMA'd once.
    w3 = params["w3"].reshape(3, 3, C_MID, n_j, TN)
    w3 = jnp.transpose(w3, (3, 0, 1, 2, 4)).astype(jnp.bfloat16)   # (n_j, 3, 3, 512, TN)
    b3 = params["b3"].reshape(n_j, 1, TN).astype(jnp.float32)

    out_bytes = jnp.finfo(out_dtype).bits // 8
    flops = 2 * N * H * W * (Cin * C_MID + 9 * C_MID * C_OUT)
    bytes_accessed = (x.size * 2 + w1.size * 2 + b1.size * 4 + w3.size * 2 + b3.size * 4
                      + N * H * W * C_OUT * out_bytes)

    out = pl.pallas_call(
        fused_ffm_kernel,
        out_shape=jax.ShapeDtypeStruct((N, H, W, C_OUT), out_dtype),
        grid_spec=pltpu.PrefetchScalarGridSpec(
            num_scalar_prefetch=0,
            grid=(N, n_j),
            in_specs=[
                pl.BlockSpec((1, H, W, Cin), lambda n, j: (n, 0, 0, 0)),            # x (bf16)
                pl.BlockSpec((Cin, C_MID), lambda n, j: (0, 0)),                    # w1 (bf16)
                pl.BlockSpec((1, C_MID), lambda n, j: (0, 0)),                      # b1 (f32)
                pl.BlockSpec((n_j, 3, 3, C_MID, TN), lambda n, j: (0, 0, 0, 0, 0)), # w3 resident
                pl.BlockSpec((n_j, 1, TN), lambda n, j: (0, 0, 0)),                 # b3 resident
            ],
            out_specs=pl.BlockSpec((1, H, W, TN), lambda n, j: (n, 0, 0, j)),
            scratch_shapes=[
                pltpu.VMEM((3, H + 2, W, C_MID), jnp.bfloat16),   # dx-pre-shifted padded combined
            ],
        ),
        compiler_params=pltpu.CompilerParams(
            # j must run sequentially per image (scratch filled at j == 0).
            dimension_semantics=("parallel", "arbitrary"),
            vmem_limit_bytes=64 * 1024 * 1024,
        ),
        cost_estimate=pl.CostEstimate(flops=flops, transcendentals=0,
                                      bytes_accessed=int(bytes_accessed)),
    )(x, w1, b1, w3, b3)

    return jnp.transpose(out, (0, 3, 1, 2))                  # NHWC -> NCHW


# ---------------------------------------------------------------------------
# Pure-JAX reference (full f32) for a correctness check
# ---------------------------------------------------------------------------
def reference_forward(vit_nchw, cnn_nchw, params):
    vit = jnp.transpose(vit_nchw, (0, 2, 3, 1))
    cnn = jnp.transpose(cnn_nchw, (0, 2, 3, 1))
    ov = jnp.einsum("nhwc,co->nhwo", vit, params["wv"]) + params["bv"]
    oc = jnp.einsum("nhwc,co->nhwo", cnn, params["wc"]) + params["bc"]
    comb = jnp.concatenate([ov, oc], axis=-1)
    out = lax.conv_general_dilated(
        comb, params["w3"], window_strides=(1, 1), padding=((1, 1), (1, 1)),
        dimension_numbers=("NHWC", "HWIO", "NHWC")) + params["b3"]
    out = jnp.maximum(out, 0.0)
    return jnp.transpose(out, (0, 3, 1, 2))


if __name__ == "__main__":
    # Small synthetic config: vit_channels=8, cnn_channels=8, N=2, H=W=8
    N, Cv, Cc, H, W = 2, 8, 8, 8, 8

    key = jax.random.PRNGKey(0)
    k = jax.random.split(key, 8)
    params = {
        "wv": jax.random.normal(k[0], (Cv, 256), jnp.float32) * 0.1,          # 1x1 conv_vit (Cin, Cout)
        "bv": jax.random.normal(k[1], (1, 256), jnp.float32) * 0.1,
        "wc": jax.random.normal(k[2], (Cc, 256), jnp.float32) * 0.1,          # 1x1 conv_cnn
        "bc": jax.random.normal(k[3], (1, 256), jnp.float32) * 0.1,
        "w3": jax.random.normal(k[4], (3, 3, 512, 768), jnp.float32) * 0.05,  # HWIO 3x3 conv_out
        "b3": jax.random.normal(k[5], (768,), jnp.float32) * 0.1,
    }
    vit_x = jax.random.normal(k[6], (N, Cv, H, W), jnp.float32)   # NCHW, like PyTorch
    cnn_x = jax.random.normal(k[7], (N, Cc, H, W), jnp.float32)

    out = jax.block_until_ready(feature_fusion_forward(vit_x, cnn_x, params))
    ref = jax.block_until_ready(reference_forward(vit_x, cnn_x, params))

    assert out.shape == (N, 768, H, W), out.shape
    # Tolerance loosened for bf16 MXU operands (f32 accumulation).
    assert jnp.allclose(out, ref, rtol=3e-2, atol=3e-2), "mismatch vs reference"

    print("KERNEL_OK")
</pallas_src>

<mosaic_0001>
module attributes {stable_mosaic.version = 11 : i64} {
  func.func @fused_ffm_kernel(%arg0: i32, %arg1: i32, %arg2: memref<1x8x8x16xbf16, #tpu.memory_space<vmem>>, %arg3: memref<16x512xbf16, #tpu.memory_space<vmem>>, %arg4: memref<1x512xf32, #tpu.memory_space<vmem>>, %arg5: memref<3x3x3x512x256xbf16, #tpu.memory_space<vmem>>, %arg6: memref<3x1x256xf32, #tpu.memory_space<vmem>>, %arg7: memref<1x8x8x256xf32, #tpu.memory_space<vmem>>, %arg8: memref<3x10x8x512xbf16, #tpu.memory_space<vmem>>) attributes {dimension_semantics = [#tpu.dimension_semantics<parallel>, #tpu.dimension_semantics<arbitrary>], iteration_bounds = array<i64: 2, 3>, scalar_prefetch = 0 : i64, scratch_operands = 1 : i64, tpu.core_type = #tpu.core_type<tc>, window_params = [{transform_indices = @transform_0, window_bounds = array<i64: 1, 8, 8, 16>}, {pipeline_mode = #tpu.pipeline_mode<synchronous>, transform_indices = @transform_1, window_bounds = array<i64: 16, 512>}, {pipeline_mode = #tpu.pipeline_mode<synchronous>, transform_indices = @transform_2, window_bounds = array<i64: 1, 512>}, {pipeline_mode = #tpu.pipeline_mode<synchronous>, transform_indices = @transform_3, window_bounds = array<i64: 3, 3, 3, 512, 256>}, {pipeline_mode = #tpu.pipeline_mode<synchronous>, transform_indices = @transform_4, window_bounds = array<i64: 3, 1, 256>}, {transform_indices = @transform_5, window_bounds = array<i64: 1, 8, 8, 256>}]} {
    %c0_i32 = arith.constant 0 : i32
    %0 = arith.cmpi eq, %arg1, %c0_i32 : i32
    %1 = arith.extui %0 : i1 to i32
    %c0_i32_0 = arith.constant 0 : i32
    %2 = arith.cmpi ne, %1, %c0_i32_0 : i32
    scf.if %2 {
      %c0_121 = arith.constant 0 : index
      %c0_122 = arith.constant 0 : index
      %c0_123 = arith.constant 0 : index
      %c0_124 = arith.constant 0 : index
      %95 = vector.load %arg2[%c0_121, %c0_122, %c0_123, %c0_124] : memref<1x8x8x16xbf16, #tpu.memory_space<vmem>>, vector<1x8x8x16xbf16>
      %96 = vector.shape_cast %95 : vector<1x8x8x16xbf16> to vector<8x8x16xbf16>
      %97 = vector.shape_cast %96 : vector<8x8x16xbf16> to vector<64x16xbf16>
      %c0_125 = arith.constant 0 : index
      %c0_126 = arith.constant 0 : index
      %98 = vector.load %arg3[%c0_125, %c0_126] : memref<16x512xbf16, #tpu.memory_space<vmem>>, vector<16x512xbf16>
      %cst_127 = arith.constant dense<0.000000e+00> : vector<64x512xf32>
      %99 = tpu.matmul %97, %98, %cst_127 {dimension_numbers = #tpu.dot_dimension_numbers<[1], [0], [0], [1], [0, 0, 1, 1], [], []>} : vector<64x16xbf16>, vector<16x512xbf16>, vector<64x512xf32> -> vector<64x512xf32>
      %c0_128 = arith.constant 0 : index
      %c0_129 = arith.constant 0 : index
      %100 = vector.load %arg4[%c0_128, %c0_129] : memref<1x512xf32, #tpu.memory_space<vmem>>, vector<1x512xf32>
      %101 = vector.broadcast %100 : vector<1x512xf32> to vector<64x512xf32>
      %102 = arith.addf %99, %101 : vector<64x512xf32>
      %103 = vector.shape_cast %102 : vector<64x512xf32> to vector<8x8x512xf32>
      %104 = arith.truncf %103 : vector<8x8x512xf32> to vector<8x8x512xbf16>
      %cst_130 = arith.constant 0.000000e+00 : bf16
      %105 = vector.broadcast %cst_130 : bf16 to vector<3x1x8x512xbf16>
      %c0_131 = arith.constant 0 : index
      %c0_132 = arith.constant 0 : index
      %c0_133 = arith.constant 0 : index
      %c0_134 = arith.constant 0 : index
      %106 = vector.load %arg8[%c0_131, %c0_132, %c0_133, %c0_134] : memref<3x10x8x512xbf16, #tpu.memory_space<vmem>>, vector<3x1x8x512xbf16>
      tpu.vector_store %arg8[%c0_131, %c0_132, %c0_133, %c0_134], %105 {strides = array<i32>} : memref<3x10x8x512xbf16, #tpu.memory_space<vmem>>, vector<3x1x8x512xbf16>,
      %c0_135 = arith.constant 0 : index
      %c9 = arith.constant 9 : index
      %c0_136 = arith.constant 0 : index
      %c0_137 = arith.constant 0 : index
      %107 = vector.load %arg8[%c0_135, %c9, %c0_136, %c0_137] : memref<3x10x8x512xbf16, #tpu.memory_space<vmem>>, vector<3x1x8x512xbf16>
      tpu.vector_store %arg8[%c0_135, %c9, %c0_136, %c0_137], %105 {strides = array<i32>} : memref<3x10x8x512xbf16, #tpu.memory_space<vmem>>, vector<3x1x8x512xbf16>,
      %cst_138 = arith.constant 0.000000e+00 : bf16
      %108 = vector.broadcast %cst_138 : bf16 to vector<1x10x1x512xbf16>
      %c0_139 = arith.constant 0 : index
      %c0_140 = arith.constant 0 : index
      %c0_141 = arith.constant 0 : index
      %c0_142 = arith.constant 0 : index
      %109 = vector.load %arg8[%c0_139, %c0_140, %c0_141, %c0_142] : memref<3x10x8x512xbf16, #tpu.memory_space<vmem>>, vector<1x10x1x512xbf16>
      tpu.vector_store %arg8[%c0_139, %c0_140, %c0_141, %c0_142], %108 {strides = array<i32>} : memref<3x10x8x512xbf16, #tpu.memory_space<vmem>>, vector<1x10x1x512xbf16>,
      %c2_143 = arith.constant 2 : index
      %c0_144 = arith.constant 0 : index
      %c7 = arith.constant 7 : index
      %c0_145 = arith.constant 0 : index
      %110 = vector.load %arg8[%c2_143, %c0_144, %c7, %c0_145] : memref<3x10x8x512xbf16, #tpu.memory_space<vmem>>, vector<1x10x1x512xbf16>
      tpu.vector_store %arg8[%c2_143, %c0_144, %c7, %c0_145], %108 {strides = array<i32>} : memref<3x10x8x512xbf16, #tpu.memory_space<vmem>>, vector<1x10x1x512xbf16>,
      %c1_146 = arith.constant 1 : index
      %c1_147 = arith.constant 1 : index
      %c0_148 = arith.constant 0 : index
      %c0_149 = arith.constant 0 : index
      %111 = vector.load %arg8[%c1_146, %c1_147, %c0_148, %c0_149] : memref<3x10x8x512xbf16, #tpu.memory_space<vmem>>, vector<1x8x8x512xbf16>
      %112 = vector.shape_cast %111 : vector<1x8x8x512xbf16> to vector<8x8x512xbf16>
      %113 = vector.shape_cast %104 : vector<8x8x512xbf16> to vector<1x8x8x512xbf16>
      tpu.vector_store %arg8[%c1_146, %c1_147, %c0_148, %c0_149], %113 {strides = array<i32>} : memref<3x10x8x512xbf16, #tpu.memory_space<vmem>>, vector<1x8x8x512xbf16>,
      %114 = vector.extract_strided_slice %104 {offsets = [0, 0, 0], sizes = [8, 7, 512], strides = [1, 1, 1]} : vector<8x8x512xbf16> to vector<8x7x512xbf16>
      %c0_150 = arith.constant 0 : index
      %c1_151 = arith.constant 1 : index
      %c1_152 = arith.constant 1 : index
      %c0_153 = arith.constant 0 : index
      %115 = vector.load %arg8[%c0_150, %c1_151, %c1_152, %c0_153] : memref<3x10x8x512xbf16, #tpu.memory_space<vmem>>, vector<1x8x7x512xbf16>
      %116 = vector.shape_cast %115 : vector<1x8x7x512xbf16> to vector<8x7x512xbf16>
      %117 = vector.shape_cast %114 : vector<8x7x512xbf16> to vector<1x8x7x512xbf16>
      tpu.vector_store %arg8[%c0_150, %c1_151, %c1_152, %c0_153], %117 {strides = array<i32>} : memref<3x10x8x512xbf16, #tpu.memory_space<vmem>>, vector<1x8x7x512xbf16>,
      %118 = vector.extract_strided_slice %104 {offsets = [0, 1, 0], sizes = [8, 7, 512], strides = [1, 1, 1]} : vector<8x8x512xbf16> to vector<8x7x512xbf16>
      %c2_154 = arith.constant 2 : index
      %c1_155 = arith.constant 1 : index
      %c0_156 = arith.constant 0 : index
      %c0_157 = arith.constant 0 : index
      %119 = vector.load %arg8[%c2_154, %c1_155, %c0_156, %c0_157] : memref<3x10x8x512xbf16, #tpu.memory_space<vmem>>, vector<1x8x7x512xbf16>
      %120 = vector.shape_cast %119 : vector<1x8x7x512xbf16> to vector<8x7x512xbf16>
      %121 = vector.shape_cast %118 : vector<8x7x512xbf16> to vector<1x8x7x512xbf16>
      tpu.vector_store %arg8[%c2_154, %c1_155, %c0_156, %c0_157], %121 {strides = array<i32>} : memref<3x10x8x512xbf16, #tpu.memory_space<vmem>>, vector<1x8x7x512xbf16>,
    } else {
    }
    %3 = arith.index_cast %arg1 : i32 to index
    %c0 = arith.constant 0 : index
    %c0_1 = arith.constant 0 : index
    %4 = vector.load %arg6[%3, %c0, %c0_1] : memref<3x1x256xf32, #tpu.memory_space<vmem>>, vector<1x1x256xf32>
    %5 = vector.shape_cast %4 : vector<1x1x256xf32> to vector<1x256xf32>
    %6 = vector.shape_cast %5 : vector<1x256xf32> to vector<1x256xf32>
    %7 = vector.broadcast %6 : vector<1x256xf32> to vector<64x256xf32>
    %c0_2 = arith.constant 0 : index
    %c0_3 = arith.constant 0 : index
    %c0_4 = arith.constant 0 : index
    %c0_5 = arith.constant 0 : index
    %8 = vector.load %arg8[%c0_2, %c0_3, %c0_4, %c0_5] : memref<3x10x8x512xbf16, #tpu.memory_space<vmem>>, vector<1x8x8x512xbf16>
    %9 = vector.shape_cast %8 : vector<1x8x8x512xbf16> to vector<8x8x512xbf16>
    %10 = vector.shape_cast %9 : vector<8x8x512xbf16> to vector<64x512xbf16>
    %c0_i32_6 = arith.constant 0 : i32
    %c0_i32_7 = arith.constant 0 : i32
    %c0_i32_8 = arith.constant 0 : i32
    %c0_i32_9 = arith.constant 0 : i32
    %11 = tpu.memref_slice %arg5[%arg1, %c0_i32_6, %c0_i32_7, %c0_i32_8, %c0_i32_9] : memref<3x3x3x512x256xbf16, #tpu.memory_space<vmem>> -> memref<1x3x3x512x256xbf16, #tpu.memory_space<vmem>>
    %12 = tpu.memref_squeeze %11 : memref<1x3x3x512x256xbf16, #tpu.memory_space<vmem>> -> memref<3x3x512x256xbf16, #tpu.memory_space<vmem>>
    %c0_10 = arith.constant 0 : index
    %c0_11 = arith.constant 0 : index
    %c0_12 = arith.constant 0 : index
    %c0_13 = arith.constant 0 : index
    %13 = vector.load %12[%c0_10, %c0_11, %c0_12, %c0_13] : memref<3x3x512x256xbf16, #tpu.memory_space<vmem>>, vector<1x1x512x256xbf16>
    %14 = vector.shape_cast %13 : vector<1x1x512x256xbf16> to vector<512x256xbf16>
    %cst = arith.constant dense<0.000000e+00> : vector<64x256xf32>
    %15 = tpu.matmul %10, %14, %cst {dimension_numbers = #tpu.dot_dimension_numbers<[1], [0], [0], [1], [0, 0, 1, 1], [], []>} : vector<64x512xbf16>, vector<512x256xbf16>, vector<64x256xf32> -> vector<64x256xf32>
    %16 = arith.addf %7, %15 : vector<64x256xf32>
    %c0_14 = arith.constant 0 : index
    %c1 = arith.constant 1 : index
    %c0_15 = arith.constant 0 : index
    %c0_16 = arith.constant 0 : index
    %17 = vector.load %arg8[%c0_14, %c1, %c0_15, %c0_16] : memref<3x10x8x512xbf16, #tpu.memory_space<vmem>>, vector<1x8x8x512xbf16>
    %18 = vector.shape_cast %17 : vector<1x8x8x512xbf16> to vector<8x8x512xbf16>
    %19 = vector.shape_cast %18 : vector<8x8x512xbf16> to vector<64x512xbf16>
    %c0_i32_17 = arith.constant 0 : i32
    %c0_i32_18 = arith.constant 0 : i32
    %c0_i32_19 = arith.constant 0 : i32
    %c0_i32_20 = arith.constant 0 : i32
    %20 = tpu.memref_slice %arg5[%arg1, %c0_i32_17, %c0_i32_18, %c0_i32_19, %c0_i32_20] : memref<3x3x3x512x256xbf16, #tpu.memory_space<vmem>> -> memref<1x3x3x512x256xbf16, #tpu.memory_space<vmem>>
    %21 = tpu.memref_squeeze %20 : memref<1x3x3x512x256xbf16, #tpu.memory_space<vmem>> -> memref<3x3x512x256xbf16, #tpu.memory_space<vmem>>
    %c1_21 = arith.constant 1 : index
    %c0_22 = arith.constant 0 : index
    %c0_23 = arith.constant 0 : index
    %c0_24 = arith.constant 0 : index
    %22 = vector.load %21[%c1_21, %c0_22, %c0_23, %c0_24] : memref<3x3x512x256xbf16, #tpu.memory_space<vmem>>, vector<1x1x512x256xbf16>
    %23 = vector.shape_cast %22 : vector<1x1x512x256xbf16> to vector<512x256xbf16>
    %cst_25 = arith.constant dense<0.000000e+00> : vector<64x256xf32>
    %24 = tpu.matmul %19, %23, %cst_25 {dimension_numbers = #tpu.dot_dimension_numbers<[1], [0], [0], [1], [0, 0, 1, 1], [], []>} : vector<64x512xbf16>, vector<512x256xbf16>, vector<64x256xf32> -> vector<64x256xf32>
    %25 = arith.addf %16, %24 : vector<64x256xf32>
    %c0_26 = arith.constant 0 : index
    %c2 = arith.constant 2 : index
    %c0_27 = arith.constant 0 : index
    %c0_28 = arith.constant 0 : index
    %26 = vector.load %arg8[%c0_26, %c2, %c0_27, %c0_28] : memref<3x10x8x512xbf16, #tpu.memory_space<vmem>>, vector<1x8x8x512xbf16>
    %27 = vector.shape_cast %26 : vector<1x8x8x512xbf16> to vector<8x8x512xbf16>
    %28 = vector.shape_cast %27 : vector<8x8x512xbf16> to vector<64x512xbf16>
    %c0_i32_29 = arith.constant 0 : i32
    %c0_i32_30 = arith.constant 0 : i32
    %c0_i32_31 = arith.constant 0 : i32
    %c0_i32_32 = arith.constant 0 : i32
    %29 = tpu.memref_slice %arg5[%arg1, %c0_i32_29, %c0_i32_30, %c0_i32_31, %c0_i32_32] : memref<3x3x3x512x256xbf16, #tpu.memory_space<vmem>> -> memref<1x3x3x512x256xbf16, #tpu.memory_space<vmem>>
    %30 = tpu.memref_squeeze %29 : memref<1x3x3x512x256xbf16, #tpu.memory_space<vmem>> -> memref<3x3x512x256xbf16, #tpu.memory_space<vmem>>
    %c2_33 = arith.constant 2 : index
    %c0_34 = arith.constant 0 : index
    %c0_35 = arith.constant 0 : index
    %c0_36 = arith.constant 0 : index
    %31 = vector.load %30[%c2_33, %c0_34, %c0_35, %c0_36] : memref<3x3x512x256xbf16, #tpu.memory_space<vmem>>, vector<1x1x512x256xbf16>
    %32 = vector.shape_cast %31 : vector<1x1x512x256xbf16> to vector<512x256xbf16>
    %cst_37 = arith.constant dense<0.000000e+00> : vector<64x256xf32>
    %33 = tpu.matmul %28, %32, %cst_37 {dimension_numbers = #tpu.dot_dimension_numbers<[1], [0], [0], [1], [0, 0, 1, 1], [], []>} : vector<64x512xbf16>, vector<512x256xbf16>, vector<64x256xf32> -> vector<64x256xf32>
    %34 = arith.addf %25, %33 : vector<64x256xf32>
    %c1_38 = arith.constant 1 : index
    %c0_39 = arith.constant 0 : index
    %c0_40 = arith.constant 0 : index
    %c0_41 = arith.constant 0 : index
    %35 = vector.load %arg8[%c1_38, %c0_39, %c0_40, %c0_41] : memref<3x10x8x512xbf16, #tpu.memory_space<vmem>>, vector<1x8x8x512xbf16>
    %36 = vector.shape_cast %35 : vector<1x8x8x512xbf16> to vector<8x8x512xbf16>
    %37 = vector.shape_cast %36 : vector<8x8x512xbf16> to vector<64x512xbf16>
    %c0_i32_42 = arith.constant 0 : i32
    %c0_i32_43 = arith.constant 0 : i32
    %c0_i32_44 = arith.constant 0 : i32
    %c0_i32_45 = arith.constant 0 : i32
    %38 = tpu.memref_slice %arg5[%arg1, %c0_i32_42, %c0_i32_43, %c0_i32_44, %c0_i32_45] : memref<3x3x3x512x256xbf16, #tpu.memory_space<vmem>> -> memref<1x3x3x512x256xbf16, #tpu.memory_space<vmem>>
    %39 = tpu.memref_squeeze %38 : memref<1x3x3x512x256xbf16, #tpu.memory_space<vmem>> -> memref<3x3x512x256xbf16, #tpu.memory_space<vmem>>
    %c0_46 = arith.constant 0 : index
    %c1_47 = arith.constant 1 : index
    %c0_48 = arith.constant 0 : index
    %c0_49 = arith.constant 0 : index
    %40 = vector.load %39[%c0_46, %c1_47, %c0_48, %c0_49] : memref<3x3x512x256xbf16, #tpu.memory_space<vmem>>, vector<1x1x512x256xbf16>
    %41 = vector.shape_cast %40 : vector<1x1x512x256xbf16> to vector<512x256xbf16>
    %cst_50 = arith.constant dense<0.000000e+00> : vector<64x256xf32>
    %42 = tpu.matmul %37, %41, %cst_50 {dimension_numbers = #tpu.dot_dimension_numbers<[1], [0], [0], [1], [0, 0, 1, 1], [], []>} : vector<64x512xbf16>, vector<512x256xbf16>, vector<64x256xf32> -> vector<64x256xf32>
    %43 = arith.addf %34, %42 : vector<64x256xf32>
    %c1_51 = arith.constant 1 : index
    %c1_52 = arith.constant 1 : index
    %c0_53 = arith.constant 0 : index
    %c0_54 = arith.constant 0 : index
    %44 = vector.load %arg8[%c1_51, %c1_52, %c0_53, %c0_54] : memref<3x10x8x512xbf16, #tpu.memory_space<vmem>>, vector<1x8x8x512xbf16>
    %45 = vector.shape_cast %44 : vector<1x8x8x512xbf16> to vector<8x8x512xbf16>
    %46 = vector.shape_cast %45 : vector<8x8x512xbf16> to vector<64x512xbf16>
    %c0_i32_55 = arith.constant 0 : i32
    %c0_i32_56 = arith.constant 0 : i32
    %c0_i32_57 = arith.constant 0 : i32
    %c0_i32_58 = arith.constant 0 : i32
    %47 = tpu.memref_slice %arg5[%arg1, %c0_i32_55, %c0_i32_56, %c0_i32_57, %c0_i32_58] : memref<3x3x3x512x256xbf16, #tpu.memory_space<vmem>> -> memref<1x3x3x512x256xbf16, #tpu.memory_space<vmem>>
    %48 = tpu.memref_squeeze %47 : memref<1x3x3x512x256xbf16, #tpu.memory_space<vmem>> -> memref<3x3x512x256xbf16, #tpu.memory_space<vmem>>
    %c1_59 = arith.constant 1 : index
    %c1_60 = arith.constant 1 : index
    %c0_61 = arith.constant 0 : index
    %c0_62 = arith.constant 0 : index
    %49 = vector.load %48[%c1_59, %c1_60, %c0_61, %c0_62] : memref<3x3x512x256xbf16, #tpu.memory_space<vmem>>, vector<1x1x512x256xbf16>
    %50 = vector.shape_cast %49 : vector<1x1x512x256xbf16> to vector<512x256xbf16>
    %cst_63 = arith.constant dense<0.000000e+00> : vector<64x256xf32>
    %51 = tpu.matmul %46, %50, %cst_63 {dimension_numbers = #tpu.dot_dimension_numbers<[1], [0], [0], [1], [0, 0, 1, 1], [], []>} : vector<64x512xbf16>, vector<512x256xbf16>, vector<64x256xf32> -> vector<64x256xf32>
    %52 = arith.addf %43, %51 : vector<64x256xf32>
    %c1_64 = arith.constant 1 : index
    %c2_65 = arith.constant 2 : index
    %c0_66 = arith.constant 0 : index
    %c0_67 = arith.constant 0 : index
    %53 = vector.load %arg8[%c1_64, %c2_65, %c0_66, %c0_67] : memref<3x10x8x512xbf16, #tpu.memory_space<vmem>>, vector<1x8x8x512xbf16>
    %54 = vector.shape_cast %53 : vector<1x8x8x512xbf16> to vector<8x8x512xbf16>
    %55 = vector.shape_cast %54 : vector<8x8x512xbf16> to vector<64x512xbf16>
    %c0_i32_68 = arith.constant 0 : i32
    %c0_i32_69 = arith.constant 0 : i32
    %c0_i32_70 = arith.constant 0 : i32
    %c0_i32_71 = arith.constant 0 : i32
    %56 = tpu.memref_slice %arg5[%arg1, %c0_i32_68, %c0_i32_69, %c0_i32_70, %c0_i32_71] : memref<3x3x3x512x256xbf16, #tpu.memory_space<vmem>> -> memref<1x3x3x512x256xbf16, #tpu.memory_space<vmem>>
    %57 = tpu.memref_squeeze %56 : memref<1x3x3x512x256xbf16, #tpu.memory_space<vmem>> -> memref<3x3x512x256xbf16, #tpu.memory_space<vmem>>
    %c2_72 = arith.constant 2 : index
    %c1_73 = arith.constant 1 : index
    %c0_74 = arith.constant 0 : index
    %c0_75 = arith.constant 0 : index
    %58 = vector.load %57[%c2_72, %c1_73, %c0_74, %c0_75] : memref<3x3x512x256xbf16, #tpu.memory_space<vmem>>, vector<1x1x512x256xbf16>
    %59 = vector.shape_cast %58 : vector<1x1x512x256xbf16> to vector<512x256xbf16>
    %cst_76 = arith.constant dense<0.000000e+00> : vector<64x256xf32>
    %60 = tpu.matmul %55, %59, %cst_76 {dimension_numbers = #tpu.dot_dimension_numbers<[1], [0], [0], [1], [0, 0, 1, 1], [], []>} : vector<64x512xbf16>, vector<512x256xbf16>, vector<64x256xf32> -> vector<64x256xf32>
    %61 = arith.addf %52, %60 : vector<64x256xf32>
    %c2_77 = arith.constant 2 : index
    %c0_78 = arith.constant 0 : index
    %c0_79 = arith.constant 0 : index
    %c0_80 = arith.constant 0 : index
    %62 = vector.load %arg8[%c2_77, %c0_78, %c0_79, %c0_80] : memref<3x10x8x512xbf16, #tpu.memory_space<vmem>>, vector<1x8x8x512xbf16>
    %63 = vector.shape_cast %62 : vector<1x8x8x512xbf16> to vector<8x8x512xbf16>
    %64 = vector.shape_cast %63 : vector<8x8x512xbf16> to vector<64x512xbf16>
    %c0_i32_81 = arith.constant 0 : i32
    %c0_i32_82 = arith.constant 0 : i32
    %c0_i32_83 = arith.constant 0 : i32
    %c0_i32_84 = arith.constant 0 : i32
    %65 = tpu.memref_slice %arg5[%arg1, %c0_i32_81, %c0_i32_82, %c0_i32_83, %c0_i32_84] : memref<3x3x3x512x256xbf16, #tpu.memory_space<vmem>> -> memref<1x3x3x512x256xbf16, #tpu.memory_space<vmem>>
    %66 = tpu.memref_squeeze %65 : memref<1x3x3x512x256xbf16, #tpu.memory_space<vmem>> -> memref<3x3x512x256xbf16, #tpu.memory_space<vmem>>
    %c0_85 = arith.constant 0 : index
    %c2_86 = arith.constant 2 : index
    %c0_87 = arith.constant 0 : index
    %c0_88 = arith.constant 0 : index
    %67 = vector.load %66[%c0_85, %c2_86, %c0_87, %c0_88] : memref<3x3x512x256xbf16, #tpu.memory_space<vmem>>, vector<1x1x512x256xbf16>
    %68 = vector.shape_cast %67 : vector<1x1x512x256xbf16> to vector<512x256xbf16>
    %cst_89 = arith.constant dense<0.000000e+00> : vector<64x256xf32>
    %69 = tpu.matmul %64, %68, %cst_89 {dimension_numbers = #tpu.dot_dimension_numbers<[1], [0], [0], [1], [0, 0, 1, 1], [], []>} : vector<64x512xbf16>, vector<512x256xbf16>, vector<64x256xf32> -> vector<64x256xf32>
    %70 = arith.addf %61, %69 : vector<64x256xf32>
    %c2_90 = arith.constant 2 : index
    %c1_91 = arith.constant 1 : index
    %c0_92 = arith.constant 0 : index
    %c0_93 = arith.constant 0 : index
    %71 = vector.load %arg8[%c2_90, %c1_91, %c0_92, %c0_93] : memref<3x10x8x512xbf16, #tpu.memory_space<vmem>>, vector<1x8x8x512xbf16>
    %72 = vector.shape_cast %71 : vector<1x8x8x512xbf16> to vector<8x8x512xbf16>
    %73 = vector.shape_cast %72 : vector<8x8x512xbf16> to vector<64x512xbf16>
    %c0_i32_94 = arith.constant 0 : i32
    %c0_i32_95 = arith.constant 0 : i32
    %c0_i32_96 = arith.constant 0 : i32
    %c0_i32_97 = arith.constant 0 : i32
    %74 = tpu.memref_slice %arg5[%arg1, %c0_i32_94, %c0_i32_95, %c0_i32_96, %c0_i32_97] : memref<3x3x3x512x256xbf16, #tpu.memory_space<vmem>> -> memref<1x3x3x512x256xbf16, #tpu.memory_space<vmem>>
    %75 = tpu.memref_squeeze %74 : memref<1x3x3x512x256xbf16, #tpu.memory_space<vmem>> -> memref<3x3x512x256xbf16, #tpu.memory_space<vmem>>
    %c1_98 = arith.constant 1 : index
    %c2_99 = arith.constant 2 : index
    %c0_100 = arith.constant 0 : index
    %c0_101 = arith.constant 0 : index
    %76 = vector.load %75[%c1_98, %c2_99, %c0_100, %c0_101] : memref<3x3x512x256xbf16, #tpu.memory_space<vmem>>, vector<1x1x512x256xbf16>
    %77 = vector.shape_cast %76 : vector<1x1x512x256xbf16> to vector<512x256xbf16>
    %cst_102 = arith.constant dense<0.000000e+00> : vector<64x256xf32>
    %78 = tpu.matmul %73, %77, %cst_102 {dimension_numbers = #tpu.dot_dimension_numbers<[1], [0], [0], [1], [0, 0, 1, 1], [], []>} : vector<64x512xbf16>, vector<512x256xbf16>, vector<64x256xf32> -> vector<64x256xf32>
    %79 = arith.addf %70, %78 : vector<64x256xf32>
    %c2_103 = arith.constant 2 : index
    %c2_104 = arith.constant 2 : index
    %c0_105 = arith.constant 0 : index
    %c0_106 = arith.constant 0 : index
    %80 = vector.load %arg8[%c2_103, %c2_104, %c0_105, %c0_106] : memref<3x10x8x512xbf16, #tpu.memory_space<vmem>>, vector<1x8x8x512xbf16>
    %81 = vector.shape_cast %80 : vector<1x8x8x512xbf16> to vector<8x8x512xbf16>
    %82 = vector.shape_cast %81 : vector<8x8x512xbf16> to vector<64x512xbf16>
    %c0_i32_107 = arith.constant 0 : i32
    %c0_i32_108 = arith.constant 0 : i32
    %c0_i32_109 = arith.constant 0 : i32
    %c0_i32_110 = arith.constant 0 : i32
    %83 = tpu.memref_slice %arg5[%arg1, %c0_i32_107, %c0_i32_108, %c0_i32_109, %c0_i32_110] : memref<3x3x3x512x256xbf16, #tpu.memory_space<vmem>> -> memref<1x3x3x512x256xbf16, #tpu.memory_space<vmem>>
    %84 = tpu.memref_squeeze %83 : memref<1x3x3x512x256xbf16, #tpu.memory_space<vmem>> -> memref<3x3x512x256xbf16, #tpu.memory_space<vmem>>
    %c2_111 = arith.constant 2 : index
    %c2_112 = arith.constant 2 : index
    %c0_113 = arith.constant 0 : index
    %c0_114 = arith.constant 0 : index
    %85 = vector.load %84[%c2_111, %c2_112, %c0_113, %c0_114] : memref<3x3x512x256xbf16, #tpu.memory_space<vmem>>, vector<1x1x512x256xbf16>
    %86 = vector.shape_cast %85 : vector<1x1x512x256xbf16> to vector<512x256xbf16>
    %cst_115 = arith.constant dense<0.000000e+00> : vector<64x256xf32>
    %87 = tpu.matmul %82, %86, %cst_115 {dimension_numbers = #tpu.dot_dimension_numbers<[1], [0], [0], [1], [0, 0, 1, 1], [], []>} : vector<64x512xbf16>, vector<512x256xbf16>, vector<64x256xf32> -> vector<64x256xf32>
    %88 = arith.addf %79, %87 : vector<64x256xf32>
    %cst_116 = arith.constant 0.000000e+00 : f32
    %89 = vector.broadcast %cst_116 : f32 to vector<64x256xf32>
    %90 = arith.maximumf %88, %89 : vector<64x256xf32>
    %91 = vector.shape_cast %90 : vector<64x256xf32> to vector<8x8x256xf32>
    %c0_117 = arith.constant 0 : index
    %c0_118 = arith.constant 0 : index
    %c0_119 = arith.constant 0 : index
    %c0_120 = arith.constant 0 : index
    %92 = vector.load %arg7[%c0_117, %c0_118, %c0_119, %c0_120] : memref<1x8x8x256xf32, #tpu.memory_space<vmem>>, vector<1x8x8x256xf32>
    %93 = vector.shape_cast %92 : vector<1x8x8x256xf32> to vector<8x8x256xf32>
    %94 = vector.shape_cast %91 : vector<8x8x256xf32> to vector<1x8x8x256xf32>
    tpu.vector_store %arg7[%c0_117, %c0_118, %c0_119, %c0_120], %94 {strides = array<i32>} : memref<1x8x8x256xf32, #tpu.memory_space<vmem>>, vector<1x8x8x256xf32>,
    return
  }
  func.func @transform_0(%arg0: i32, %arg1: i32) -> (i32, i32, i32, i32) {
    %c0_i32 = arith.constant 0 : i32
    %c0_i32_0 = arith.constant 0 : i32
    %c0_i32_1 = arith.constant 0 : i32
    %c0_i32_2 = arith.constant 0 : i32
    return %arg0, %c0_i32, %c0_i32_0, %c0_i32_1 : i32, i32, i32, i32
  }
  func.func @transform_1(%arg0: i32, %arg1: i32) -> (i32, i32) {
    %c0_i32 = arith.constant 0 : i32
    %c0_i32_0 = arith.constant 0 : i32
    %c0_i32_1 = arith.constant 0 : i32
    return %c0_i32, %c0_i32_0 : i32, i32
  }
  func.func @transform_2(%arg0: i32, %arg1: i32) -> (i32, i32) {
    %c0_i32 = arith.constant 0 : i32
    %c0_i32_0 = arith.constant 0 : i32
    %c0_i32_1 = arith.constant 0 : i32
    return %c0_i32, %c0_i32_0 : i32, i32
  }
  func.func @transform_3(%arg0: i32, %arg1: i32) -> (i32, i32, i32, i32, i32) {
    %c0_i32 = arith.constant 0 : i32
    %c0_i32_0 = arith.constant 0 : i32
    %c0_i32_1 = arith.constant 0 : i32
    %c0_i32_2 = arith.constant 0 : i32
    %c0_i32_3 = arith.constant 0 : i32
    %c0_i32_4 = arith.constant 0 : i32
    return %c0_i32, %c0_i32_0, %c0_i32_1, %c0_i32_2, %c0_i32_3 : i32, i32, i32, i32, i32
  }
  func.func @transform_4(%arg0: i32, %arg1: i32) -> (i32, i32, i32) {
    %c0_i32 = arith.constant 0 : i32
    %c0_i32_0 = arith.constant 0 : i32
    %c0_i32_1 = arith.constant 0 : i32
    %c0_i32_2 = arith.constant 0 : i32
    return %c0_i32, %c0_i32_0, %c0_i32_1 : i32, i32, i32
  }
  func.func @transform_5(%arg0: i32, %arg1: i32) -> (i32, i32, i32, i32) {
    %c0_i32 = arith.constant 0 : i32
    %c0_i32_0 = arith.constant 0 : i32
    %c0_i32_1 = arith.constant 0 : i32
    return %arg0, %c0_i32, %c0_i32_0, %arg1 : i32, i32, i32, i32
  }
}

</mosaic_0001>

<bundles_post_ra>
// kernel: tpu_custom_call.1
= control target key start
LH: loop header
LB: loop body
LE: loop exit
PB: predicated region body
PF: predicated region fallthrough
CT: control target
= control target key end

     0   :  { %s11831_s0 = inlined_call_operand.hbm [shape: bf16[2,8,8,16], index: 0, kind: input, shape index: {}]   ;;  %s11832_s1 = inlined_call_operand.hbm [shape: bf16[16,512], index: 1, kind: input, shape index: {}]   ;;  %s11833_s2 = inlined_call_operand.hbm [shape: f32[1,512], index: 2, kind: input, shape index: {}]   ;;  %s11834_s3 = inlined_call_operand.hbm [shape: bf16[3,3,3,512,256], index: 3, kind: input, shape index: {}]   ;;  %s11835_s4 = inlined_call_operand.hbm [shape: f32[3,1,256], index: 4, kind: input, shape index: {}]   ;;  %s11836_s5 = inlined_call_operand.hbm [shape: f32[2,8,8,768], index: 5, kind: output, shape index: {}]  }
   0x1   :  { %11850 = sst [smem:[#allocation23_spill]] %s11832_s1 }
   0x2   :  { %11851 = sst [smem:[#allocation24_spill]] %s11836_s5 }
   0x3   :  { %10 = vsyncpa [#allocation4], 0 }
   0x4   :  { %12 = vsyncpa [#allocation4 + $0x1], 0 }
   0x5   :  { %13 = vsyncpa [#allocation7], 0 }
   0x6   :  { %14 = vsyncpa [#allocation10], 0 }
   0x7   :  { %15 = vsyncpa [#allocation5], 0 }
   0x8   :  { %17 = vsyncpa [#allocation5 + $0x1], 0  ;;  %s10283_s18 = smov 0   ;;  %s10285_s19 = smov 0  }
   0x9   :  { %s10287_s20 = smov 0   ;;  %s10289_s21 = smov 0  }
   0xa   :  { %s10291_s22 = smov 0   ;;  %s10293_s23 = smov 0  }
   0xb   :  { %s10295_s24 = smov 0   ;;  %s10297_s25 = smov 0  }
   0xc   :  { %s10299_s26 = smov 0   ;;  %s10301_s27 = smov 0  }
   0xd   :  { %s10303_s28 = smov 0  }
   0xe LB: > { %11852 = sst [smem:[#allocation17_spill]] %s10193_s18  ;;  %s7151_s29 = sadd.s32 4294967295, %s10233_s28   ;;  %s10233_s28 = sphi %s10303_s28, %s23_s28   ;;  %s10229_s27 = sphi %s10301_s27, %s11911_s27   ;;  %s10225_s26 = sphi %s10299_s26, %s11910_s26   ;;  %s10221_s25 = sphi %s10297_s25, %s11909_s25   ;;  %s10217_s24 = sphi %s10295_s24, %s11908_s24   ;;  %s10213_s23 = sphi %s10293_s23, %s11907_s23   ;;  %s10209_s22 = sphi %s10291_s22, %s11906_s22   ;;  %s10205_s21 = sphi %s10289_s21, %s11905_s21   ;;  %s10201_s20 = sphi %s10287_s20, %s11904_s20   ;;  %s10197_s19 = sphi %s10285_s19, %s11903_s19   ;;  %s10193_s18 = sphi %s10283_s18, %s11902_s18  }
   0xf   : > { %11853 = sst [smem:[#allocation18_spill]] %s10197_s19  ;;  %s7152_s30 = sadd.s32 4294967294, %s10233_s28  }
  0x10   : > { %11854 = sst [smem:[#allocation19_spill]] %s10217_s24  ;;  %p55_p0 = scmp.ne.s32.totalorder %s10209_s22, %s10205_s21 }
  0x11   : > { %11855 = sst [smem:[#allocation20_spill]] %s10221_s25  ;;  %p10339_p1 = scmp.eq.s32.totalorder %s7151_s29, 0 }
  0x12   : > { %p164_p2 = scmp.ne.s32.totalorder %s10201_s20, %s10197_s19  ;;  %p165_p3 = scmp.eq.s32.totalorder %s7151_s29, 5 }
  0x13   : > { %s11856_s6 = scalar_select %p10339_p1, 1, 0 }
  0x14   : > { %p10347_p4 = por %p10339_p1, %p55_p0  ;;  %p170_p5 = scmp.ne.s32.totalorder %s10197_s19, %s10193_s18 }
  0x15   : > { %p10353_p6 = por %p165_p3, %p164_p2  ;;  %p171_p7 = scmp.eq.s32.totalorder %s7152_s30, 5 }
  0x16   : > { %s11857_s7 = scalar_select %p10347_p4, 1, 0 }
  0x17   : > { %s11858_s8 = scalar_select %p10353_p6, 1, 0 }
  0x18   : > { %p7153_p8 = scmp.ge.s32.totalorder %s10233_s28, 1  ;;  %p178_p9 = scmp.lt.s32.totalorder %s10233_s28, 7 }
  0x19   : > { %11859 = sst [smem:[#allocation21_spill]] %s11858_s8  ;;  %p10359_p10 = por %p171_p7, %p170_p5 }
  0x1a   : > { %p10363_p11 = pnand %p7153_p8, %p178_p9  ;;  %s10235_s11 = smov [#allocation6]  }
  0x1b   : > { %s11860_s9 = scalar_select %p10359_p10, 1, 0 }
  0x1c   : > { %s11862_s10 = scalar_select %p10363_p11, 1, 0 }
  0x1d   : > { %11861 = sst [smem:[#allocation22_spill]] %s11860_s9  ;;  %s190_s12 = sshll.u32 %s10235_s11, 4  ;;  %s191_s12 = int_to_ptr.vmem [resolvable:$true] %s190_s12 }
  0x1e   : > { %p8768_p12 = pneg %p10363_p11  ;;  %s10236_s14 = smov [#allocation9]  }
  0x1f   : > { %s214_s15 = sshll.u32 %s10236_s14, 4  ;;  %s11864_s1 = sld [smem:[#allocation23_spill]]  ;;  %s10375_s15 = int_to_ptr.vmem [resolvable:$true] %s214_s15 }
  0x20   : > { %p10371_p13 = pnand %p8768_p12, %p10339_p1 }
  0x22   : > { %p10385_p2 = pneg %p10371_p13 }
  0x25   : > { %s9961_s21 = scalar_lea.hbm %s11864_s1, 512 }
  0x26   : > { %p9962_p0 = scmp.ne.s32.totalorder %s11864_s1, %s9961_s21  ;;  %p9968_p7 = scmp.lt.u32.totalorder %s9961_s21, %s11864_s1 }
  0x28   : > { %p9964_p3 = pnand %p10385_p2, %p9962_p0 }
  0x2a   : > { %p9965_p5 = pneg %p9964_p3 }
  0x2c   : > { %p9970_p8 = pnand %p9968_p7, %p9965_p5 }
  0x2e   : > { %9973 = shalt.err (!%p9970_p8)
}
  0x2f   : > { %s9974_s16 = scalar_lea.vmem %s191_s12, 512  ;;  %p9982_p6 = scmp.lt.s32.totalorder %s191_s12, %s191_s12 }
  0x30   : > { %p9975_p9 = scmp.ne.s32.totalorder %s191_s12, %s9974_s16  ;;  %p9983_p1 = scmp.lt.s32.totalorder %s9974_s16, %s9974_s16 }
  0x32   : > { %p9977_p12 = pnand %p9975_p9, %p10385_p2  ;;  %p9984_p4 = por %p9983_p1, %p9982_p6 }
  0x34   : > { %p9978_p10 = pneg %p9977_p12 }
  0x36   : > { %p9985_p11 = pnand %p9984_p4, %p9978_p10 }
  0x38   : > { %9988 = shalt.err (!%p9985_p11)
}
  0x39   : > { %s10237_s17 = smov 256   ;;  %s10238_s29 = smov 16  }
  0x3a   : > { %8771 = dma.hbm_to_vmem [thread:$0]  (!%p10371_p13), %s11864_s1, 512, %s191_s12, [#allocation7], %s10237_s17, %s10237_s17, %s10238_s29  }
  0x3b   : > { %s9989_s18 = scalar_lea.hbm %s11834_s3, 221184 }
  0x3c   : > { %p9990_p0 = scmp.ne.s32.totalorder %s11834_s3, %s9989_s18  ;;  %p9996_p6 = scmp.lt.u32.totalorder %s9989_s18, %s11834_s3 }
  0x3e   : > { %p9992_p1 = pnand %p9990_p0, %p10385_p2 }
  0x40   : > { %p9993_p4 = pneg %p9992_p1 }
  0x42   : > { %p9998_p10 = pnand %p9996_p6, %p9993_p4 }
  0x44   : > { %10001 = shalt.err (!%p9998_p10)
}
  0x45   : > { %s10002_s12 = scalar_lea.vmem %s10375_s15, 221184  ;;  %p10010_p7 = scmp.lt.s32.totalorder %s10375_s15, %s10375_s15 }
  0x46   : > { %p10003_p11 = scmp.ne.s32.totalorder %s10375_s15, %s10002_s12  ;;  %p10011_p8 = scmp.lt.s32.totalorder %s10002_s12, %s10002_s12 }
  0x48   : > { %p10005_p3 = pnand %p10003_p11, %p10385_p2  ;;  %p10012_p9 = por %p10011_p8, %p10010_p7 }
  0x4a   : > { %p10006_p5 = pneg %p10005_p3 }
  0x4c   : > { %p10013_p12 = pnand %p10012_p9, %p10006_p5 }
  0x4e   : > { %10016 = shalt.err (!%p10013_p12)
}
  0x4f   : > { %s10239_s5 = smov 128   ;;  %s10240_s18 = smov 8  }
  0x50   : > { %8777 = dma.hbm_to_vmem [thread:$0]  (!%p10371_p13), %s11834_s3, 221184, %s10375_s15, [#allocation10], %s10239_s5, %s10239_s5, %s10240_s18  }
  0x51   : > { %s10241_s17 = smov [#allocation8]   ;;  %s10242_s9 = smov [#allocation11]  }
  0x52   : > { %s204_s29 = sshll.u32 %s10241_s17, 4  ;;  %s227_s21 = sshll.u32 %s10242_s9, 4  ;;  %s205_s29 = int_to_ptr.vmem [resolvable:$true] %s204_s29  ;;  %s228_s21 = int_to_ptr.vmem [resolvable:$true] %s227_s21 }
  0x53   : > { %s10017_s16 = scalar_lea.hbm %s11833_s2, 64 }
  0x54   : > { %p10018_p0 = scmp.ne.s32.totalorder %s11833_s2, %s10017_s16  ;;  %p10024_p6 = scmp.lt.u32.totalorder %s10017_s16, %s11833_s2 }
  0x56   : > { %p10020_p1 = pnand %p10018_p0, %p10385_p2 }
  0x58   : > { %p10021_p4 = pneg %p10020_p1 }
  0x5a   : > { %p10026_p10 = pnand %p10024_p6, %p10021_p4 }
  0x5c   : > { %10029 = shalt.err (!%p10026_p10)
}
  0x5d   : > { %s10030_s15 = scalar_lea.vmem %s205_s29, 64  ;;  %p10038_p7 = scmp.lt.s32.totalorder %s205_s29, %s205_s29 }
  0x5e   : > { %p10031_p11 = scmp.ne.s32.totalorder %s205_s29, %s10030_s15  ;;  %p10039_p8 = scmp.lt.s32.totalorder %s10030_s15, %s10030_s15 }
  0x60   : > { %p10033_p3 = pnand %p10031_p11, %p10385_p2  ;;  %p10040_p9 = por %p10039_p8, %p10038_p7 }
  0x62   : > { %p10034_p5 = pneg %p10033_p3 }
  0x64   : > { %p10041_p12 = pnand %p10040_p9, %p10034_p5 }
  0x66   : > { %10044 = shalt.err (!%p10041_p12)
}
  0x67   : > { %8774 = dma.hbm_to_vmem [thread:$0]  (!%p10371_p13), %s11833_s2, 64, %s205_s29, [#allocation7]  }
  0x68   : > { %s10045_s18 = scalar_lea.hbm %s11835_s4, 96 }
  0x69   : > { %p10046_p0 = scmp.ne.s32.totalorder %s11835_s4, %s10045_s18  ;;  %p10052_p6 = scmp.lt.u32.totalorder %s10045_s18, %s11835_s4 }
  0x6b   : > { %p10048_p1 = pnand %p10046_p0, %p10385_p2 }
  0x6d   : > { %p10049_p4 = pneg %p10048_p1 }
  0x6f   : > { %p10054_p10 = pnand %p10052_p6, %p10049_p4 }
  0x71   : > { %10057 = shalt.err (!%p10054_p10)
}
  0x72   : > { %s10058_s30 = scalar_lea.vmem %s228_s21, 96  ;;  %p10066_p7 = scmp.lt.s32.totalorder %s228_s21, %s228_s21 }
  0x73   : > { %p10059_p11 = scmp.ne.s32.totalorder %s228_s21, %s10058_s30  ;;  %p10067_p8 = scmp.lt.s32.totalorder %s10058_s30, %s10058_s30 }
  0x75   : > { %p10061_p3 = pnand %p10059_p11, %p10385_p2  ;;  %p10068_p9 = por %p10067_p8, %p10066_p7 }
  0x77   : > { %p10062_p5 = pneg %p10061_p3 }
  0x79   : > { %p10069_p12 = pnand %p10068_p9, %p10062_p5 }
  0x7b   : > { %10072 = shalt.err (!%p10069_p12)
}
  0x7c   : > { %s10243_s29 = smov 32   ;;  %s10244_s11 = smov 2  }
  0x7d   : > { %8780 = dma.hbm_to_vmem [thread:$0]  (!%p10371_p13), %s11835_s4, 96, %s228_s21, [#allocation10], %s10243_s29, %s10243_s29, %s10244_s11  }
  0x7e   : > { %s32_s12 = sadd.s32 1, %s10225_s26  ;;  %s35_s15 = sadd.s32 1, %s10229_s27 }
  0x7f   : > { %p33_p2 = scmp.ge.s32.totalorder %s32_s12, 3  ;;  %s42_s1 = sadd.s32 1, %s10213_s23 }
  0x80   : > { %p49_p0 = scmp.ne.s32.totalorder %s10213_s23, %s10209_s22  ;;  %p50_p1 = scmp.eq.s32.totalorder %s10233_s28, 0 }
  0x81   : > { %s11913_s12 = smov (%p33_p2, %s32_s12), 0  ;;  %s11915_s15 = smov (!%p33_p2, %s35_s15), %s10229_s27 }
  0x82   : > { %s150_s13 = ssub.s32 %s10225_s26, %s11913_s12  ;;  %p37_p4 = scmp.ge.s32.totalorder %s11915_s15, 2 }
  0x83   : > { %s154_s5 = sadd.s32 1, %s10201_s20  ;;  %p10472_p6 = por %p50_p1, %p49_p0 }
  0x84   : > { %p8793_p13 = scmp.lt.s32.totalorder %s10233_s28, 6  ;;  %s11917_s15 = smov (%p37_p4, %s11915_s15), 0 }
  0x85   : > { %s241_s19 = sand.u32 1, %s10213_s23   ;;  %s8441_s24 = sshll.u32 %s10229_s27, 9 }
  0x86   : > { %s39_s18 = ssub.s32 %s10229_s27, %s11917_s15  ;;  %s7159_s8 = sshll.u32 %s241_s19, 5 }
  0x87   : > { %p40_p10 = scmp.eq.s32.totalorder %s39_s18, 0  ;;  %s151_s25 = sor.u32 %s150_s13, %s39_s18 }
  0x88   : > { %p152_p11 = scmp.eq.s32.totalorder %s151_s25, 0  ;;  %s10492_s11 = scalar_lea.hbm %s11831_s0, %s8441_s24 }
  0x89   : > { %s10484_s17 = scalar_select %p40_p10, %s10213_s23, %s42_s1  }
  0x8a   : > { %s10487_s9 = scalar_select %p152_p11, %s10201_s20, %s154_s5  }
  0x8b   : > { %s245_s14 = scalar_lea.vmem [#allocation3], %s7159_s8  ;;  %p10498_p3 = pnand %p8793_p13, %p10472_p6 }
  0x8c   : > { %s252_s16 = sshll.u32 %s245_s14, 4  ;;  %s10504_s1 = scalar_lea.sflag [#allocation4], %s241_s19  ;;  %s10502_s16 = int_to_ptr.vmem [resolvable:$true] %s252_s16 }
  0x8d   : > { %s10073_s5 = scalar_lea.hbm %s10492_s11, 512  ;;  %p10075_p7 = pneg %p10498_p3 }
  0x8e   : > { %p10074_p5 = scmp.ne.s32.totalorder %s10492_s11, %s10073_s5  ;;  %s10078_s18 = scalar_lea.hbm %s11831_s0, 1024 }
  0x8f   : > { %p10079_p12 = scmp.lt.u32.totalorder %s10492_s11, %s11831_s0  ;;  %p10080_p2 = scmp.lt.u32.totalorder %s10078_s18, %s10073_s5 }
  0x90   : > { %p10076_p8 = pnand %p10075_p7, %p10074_p5  ;;  %p10082_p1 = scmp.lt.u32.totalorder %s10073_s5, %s10492_s11 }
  0x91   : > { %p10081_p0 = por %p10080_p2, %p10079_p12 }
  0x92   : > { %p10077_p9 = pneg %p10076_p8 }
  0x93   : > { %p10083_p4 = por %p10082_p1, %p10081_p0 }
  0x95   : > { %p10084_p6 = pnand %p10083_p4, %p10077_p9 }
  0x97   : > { %10087 = shalt.err (!%p10084_p6)
}
  0x98   : > { %s10088_s19 = scalar_lea.vmem %s10502_s16, 512  ;;  %s10245_s30 = smov [#allocation3]  }
  0x99   : > { %p10089_p13 = scmp.ne.s32.totalorder %s10502_s16, %s10088_s19  ;;  %s10093_s29 = sshll.u32 %s10245_s30, 4  ;;  %s10094_s29 = int_to_ptr.vmem [resolvable:$false] %s10093_s29 }
  0x9a   : > { %s10095_s14 = scalar_lea.vmem %s10094_s29, 1024  ;;  %p10096_p5 = scmp.lt.s32.totalorder %s10502_s16, %s10094_s29 }
  0x9b   : > { %p10091_p10 = pnand %p10089_p13, %p10075_p7  ;;  %p10097_p8 = scmp.lt.s32.totalorder %s10095_s14, %s10088_s19 }
  0x9d   : > { %p10092_p11 = pneg %p10091_p10  ;;  %p10098_p12 = por %p10097_p8, %p10096_p5 }
  0x9f   : > { %p10099_p2 = pnand %p10098_p12, %p10092_p11 }
  0xa1   : > { %10102 = shalt.err (!%p10099_p2)
}
  0xa2   : > { %s10246_s5 = smov 64   ;;  %s10247_s21 = smov 4  }
  0xa3   : > { %8784 = dma.hbm_to_vmem [thread:$0]  (!%p10498_p3), %s10492_s11, 512, %s10502_s16, %s10504_s1, %s10246_s5, %s10246_s5, %s10247_s21  }
  0xa4   : > { %p11868_p7 = scmp.ne.s32.totalorder %s11862_s10, 0 }
  0xa5   : > { %s266_s24 = sand.u32 (!%p11868_p7), 1, %s10209_s22   ;;  %p11869_p9 = scmp.ne.s32.totalorder (!%p11868_p7), %s11857_s7, 0 }
  0xa6   : > { %264 = sbr.rel (%p11868_p7) target bundleno = 1312 (0x520), region = 40  ;;  %s7163_s18 = sshll.u32 (!%p11868_p7), %s266_s24, 5 }
  0xa7   : > { %s267_s25 = scalar_lea.sflag (!%p11868_p7), [#allocation4], %s266_s24  ;;  %s10535_s8 = scalar_lea.vmem (!%p11868_p7), [#allocation3], %s7163_s18 }
  0xad   : > { %10176 = dma.done.wait (%p11869_p9), %s267_s25, 512  }
  0xae   : > { %10178 = vsyncadd (%p11869_p9), %s267_s25, 4294966784  ;;  %p11870_p0 = scmp.ne.s32.totalorder %s11856_s6, 0 }
  0xb0   : > { %10180 = dma.done.wait (%p11870_p0), [#allocation7], 576  }
  0xb1   : > { %10182 = vsyncadd (%p11870_p0), [#allocation7], 4294966720 }
  0xb2   : > { %10184 = dma.done.wait (%p11870_p0), [#allocation10], 221280  }
  0xb3   : > { %10186 = vsyncadd (%p11870_p0), [#allocation10], 4294746016  ;;  %s11871_s10 = sld [smem:[#allocation18_spill]]  ;;  %s11872_s7 = sld [smem:[#allocation19_spill]] }
  0xb9   : > { %s310_s11 = sand.u32 1, %s11871_s10   ;;  %p7169_p3 = scmp.ne.s32.totalorder %s11872_s7, 0 }
  0xba   : > { %s7168_s16 = sshll.u32 %s310_s11, 7  ;;  %v8903_v0 = vld [vmem:[#allocation6 + $0x4] ss:$16 sps:$4 sm:$0xff] (!%p7169_p3)   ;;  %vm597_vm0 = vcmask (!%p7169_p3), 1040384   ;;  %v8905_v1 = vld [vmem:[#allocation6 + $0xc] ss:$16 sps:$4 sm:$0xff] (!%p7169_p3)  }
  0xbb   : > { %s10552_s13 = scalar_lea.vmem [#allocation12], %s7168_s16  ;;  %318 = sbr.rel (%p7169_p3) target bundleno = 465 (0x1d1), region = 64  ;;  %v10248_v2 = vmov (!%p7169_p3), 0   ;;  %vm598_vm1 = vsmask.f32 (!%p7169_p3), 256  ;;  %406 = vmatprep.subr.bf16.mxu0 (!%p7169_p3), %v8903_v0  ;;  %vm600_vm3 = vcmask (!%p7169_p3), 1044484   ;;  %479 = vmatprep.subr.bf16.mxu1 (!%p7169_p3), %v8905_v1 }
  0xbc   : > { %438 = vmatprep.mubr.bf16.mxu0 (!%p7169_p3), %v10248_v2  ;;  %584 = vst [vmem:[#allocation2] sm:$0xff] (!%p7169_p3), %v10248_v2  ;;  %585 = vst [vmem:[#allocation2 + $0x8] sm:$0xff] (!%p7169_p3), %v10248_v2  ;;  %511 = vmatprep.mubr.bf16.mxu1 (!%p7169_p3), %v10248_v2  ;;  %v8907_v3 = vld [vmem:[#allocation6] ss:$16 sps:$4 sm:$0xff] (!%p7169_p3)   ;;  %v8908_v4 = vld [vmem:[#allocation6 + $0x8] ss:$16 sps:$4 sm:$0xff] (!%p7169_p3)  }
  0xbd   : > { %586 = vst [vmem:[#allocation2 + $0xa0] sm:$0xff] (!%p7169_p3), %v10248_v2  ;;  %587 = vst [vmem:[#allocation2 + $0xa8] sm:$0xff] (!%p7169_p3), %v10248_v2  ;;  %vm665_vm4 = vcmask (!%p7169_p3), 1043459   ;;  %vm601_vm5 = vsmask.f32 (!%p7169_p3), 4352  ;;  %vm668_vm7 = vcmask (!%p7169_p3), 1047559   ;;  %407 = vmatpush1.bf16.msra.mxu0 (!%p7169_p3), %v8907_v3  ;;  %480 = vmatpush1.bf16.msra.mxu1 (!%p7169_p3), %v8908_v4 }
  0xbe   : > { %588 = vst [vmem:[#allocation2 + $0x140] sm:$0xff] (!%p7169_p3), %v10248_v2  ;;  %589 = vst [vmem:[#allocation2 + $0x148] sm:$0xff] (!%p7169_p3), %v10248_v2  ;;  %vm666_vm6 = vsmask.f32 (!%p7169_p3), 7950  ;;  %v8909_v5 = vld [vmem:[%s10535_s8] sm:$0xff] (!%p7169_p3)   ;;  %vm393_vm11 = vcmask (!%p7169_p3), 130048  }
  0xbf   : > { %591 = vst [vmem:[#allocation2 + $0x90] sm:$0xff] (!%p7169_p3), %v10248_v2  ;;  %592 = vst [vmem:[#allocation2 + $0x98] sm:$0xff] (!%p7169_p3), %v10248_v2  ;;  %vm669_vm9 = vsmask.f32 (!%p7169_p3), 7966  ;;  %v8910_v16 = vld [vmem:[%s10535_s8 + $0x8] sm:$0xff] (!%p7169_p3)   ;;  %v8911_v27 = vld [vmem:[%s10535_s8 + $0x10] sm:$0xff] (!%p7169_p3)  }
  0xc0   : > { %593 = vst [vmem:[#allocation2 + $0x130] sm:$0xff] (!%p7169_p3), %v10248_v2  ;;  %594 = vst [vmem:[#allocation2 + $0x138] sm:$0xff] (!%p7169_p3), %v10248_v2  ;;  %7178 = vmatmul.mubr.msk.bf16.vlgmr.msra.gmra.mrb[0].mxu0 (!%p7169_p3), %vm393_vm11, %v8909_v5  ;;  %7182 = vmatmul.mubr.msk.bf16.vlgmr.msra.gmra.mrb[0].mxu1 (!%p7169_p3), %vm393_vm11, %v8909_v5  ;;  %v8912_v28 = vld [vmem:[%s10535_s8 + $0x18] sm:$0xff] (!%p7169_p3)   ;;  %v610_v29 = vld [vmem:[#allocation2 + $0x10] sm:$0x11] (!%p7169_p3)  ;;  %vm974_vm15 = vcmask (!%p7169_p3), 1043456  }
  0xc1   : > { %595 = vst [vmem:[#allocation2 + $0x1d0] sm:$0xff] (!%p7169_p3), %v10248_v2  ;;  %596 = vst [vmem:[#allocation2 + $0x1d8] sm:$0xff] (!%p7169_p3), %v10248_v2  ;;  %448 = vmatprep.mubr.bf16.mxu0 (!%p7169_p3), %v10248_v2  ;;  %521 = vmatprep.mubr.bf16.mxu1 (!%p7169_p3), %v10248_v2  ;;  %v678_v30 = vld [vmem:[#allocation2 + $0x150] sm:$0x88] (!%p7169_p3)  ;;  %v613_v31 = vld [vmem:[#allocation2 + $0x18] sm:$0x11] (!%p7169_p3) }
  0xc2   : > { %vm599_vm2 = vmand %vm597_vm0, %vm598_vm1  ;;  %v681_v35 = vld [vmem:[#allocation2 + $0x158] sm:$0x88]  ;;  %v616_v37 = vld [vmem:[#allocation2 + $0x20] sm:$0x11]  ;;  %vm975_vm0 = vsmask.f32 7938 }
  0xc3   : > { %vm602_vm8 = vmand %vm600_vm3, %vm601_vm5  ;;  %v604_v9 = vld [vmem:[#allocation2] sm:$0x11]  ;;  %v607_v10 = vld [vmem:[#allocation2 + $0x8] sm:$0x11]  ;;  %vm977_vm1 = vcmask 1047556  }
  0xc4   : > { %vm10571_vm10 = vmor %vm602_vm8, %vm599_vm2  ;;  %v619_v38 = vld [vmem:[#allocation2 + $0x28] sm:$0x11]  ;;  %v684_v41 = vld [vmem:[#allocation2 + $0x160] sm:$0x88]  ;;  %vm978_vm2 = vsmask.f32 7954 }
  0xc5   : > { %vm10575_vm12 = vmand %vm665_vm4, %vm666_vm6  ;;  %v605_v12 = vsel %vm10571_vm10, 0, %v604_v9  ;;  %v608_v13 = vsel %vm10571_vm10, 0, %v607_v10  ;;  %v672_v19 = vld [vmem:[#allocation2 + $0x140] sm:$0x88]  ;;  %v675_v20 = vld [vmem:[#allocation2 + $0x148] sm:$0x88] }
  0xc6   : > { %vm10579_vm13 = vmand %vm668_vm7, %vm669_vm9  ;;  %v658_v11 = vld [vmem:[#allocation2 + $0x90] sm:$0x11]  ;;  %v661_v15 = vld [vmem:[#allocation2 + $0x98] sm:$0x11]  ;;  %606 = vst [vmem:[#allocation2] sm:$0x11] %v605_v12 }
  0xc7   : > { %v659_v14 = vsel %vm10571_vm10, 0, %v658_v11  ;;  %609 = vst [vmem:[#allocation2 + $0x8] sm:$0x11] %v608_v13  ;;  %v662_v17 = vsel %vm10571_vm10, 0, %v661_v15  ;;  %vm10600_vm14 = vmor %vm10579_vm13, %vm10575_vm12  ;;  %v611_v32 = vsel %vm10571_vm10, 0, %v610_v29  ;;  %v614_v34 = vsel %vm10571_vm10, 0, %v613_v31 }
  0xc8   : > { %660 = vst [vmem:[#allocation2 + $0x90] sm:$0x11] %v659_v14  ;;  %663 = vst [vmem:[#allocation2 + $0x98] sm:$0x11] %v662_v17  ;;  %v673_v21 = vsel %vm10600_vm14, 0, %v672_v19  ;;  %v676_v22 = vsel %vm10600_vm14, 0, %v675_v20  ;;  %7179 = vmatmul.mubr.msk.bf16.gmra.mrb[4].mxu0 %vm393_vm11, %v8910_v16  ;;  %7183 = vmatmul.mubr.msk.bf16.gmra.mrb[4].mxu1 %vm393_vm11, %v8910_v16  ;;  %v333_v31 = vlaneseq }
  0xc9   : > { %v726_v23 = vld [vmem:[#allocation2 + $0x1d0] sm:$0x88]  ;;  %v729_v24 = vld [vmem:[#allocation2 + $0x1d8] sm:$0x88]  ;;  %674 = vst [vmem:[#allocation2 + $0x140] sm:$0x88] %v673_v21  ;;  %458 = vmatprep.mubr.bf16.mxu0 %v10248_v2  ;;  %531 = vmatprep.mubr.bf16.mxu1 %v10248_v2  ;;  %vm10706_vm4 = vmand %vm974_vm15, %vm975_vm0 }
  0xca   : > { %677 = vst [vmem:[#allocation2 + $0x148] sm:$0x88] %v676_v22  ;;  %v727_v25 = vsel %vm10600_vm14, 0, %v726_v23  ;;  %v730_v26 = vsel %vm10600_vm14, 0, %v729_v24  ;;  %v679_v33 = vsel %vm10600_vm14, 0, %v678_v30  ;;  %v682_v36 = vsel %vm10600_vm14, 0, %v681_v35  ;;  %vm10712_vm6 = vmand %vm977_vm1, %vm978_vm2 }
  0xcb   : > { %728 = vst [vmem:[#allocation2 + $0x1d0] sm:$0x88] %v727_v25  ;;  %731 = vst [vmem:[#allocation2 + $0x1d8] sm:$0x88] %v730_v26  ;;  %v617_v39 = vsel %vm10571_vm10, 0, %v616_v37  ;;  %v620_v40 = vsel %vm10571_vm10, 0, %v619_v38 }
  0xcc   : > { %612 = vst [vmem:[#allocation2 + $0x10] sm:$0x11] %v611_v32  ;;  %680 = vst [vmem:[#allocation2 + $0x150] sm:$0x88] %v679_v33  ;;  %v687_v42 = vld [vmem:[#allocation2 + $0x168] sm:$0x88] }
  0xcd   : > { %615 = vst [vmem:[#allocation2 + $0x18] sm:$0x11] %v614_v34  ;;  %683 = vst [vmem:[#allocation2 + $0x158] sm:$0x88] %v682_v36  ;;  %v685_v43 = vsel %vm10600_vm14, 0, %v684_v41  ;;  %v688_v44 = vsel %vm10600_vm14, 0, %v687_v42 }
  0xce   : > { %618 = vst [vmem:[#allocation2 + $0x20] sm:$0x11] %v617_v39  ;;  %621 = vst [vmem:[#allocation2 + $0x28] sm:$0x11] %v620_v40  ;;  %v622_v45 = vld [vmem:[#allocation2 + $0x30] sm:$0x11] }
  0xcf   : > { %686 = vst [vmem:[#allocation2 + $0x160] sm:$0x88] %v685_v43  ;;  %689 = vst [vmem:[#allocation2 + $0x168] sm:$0x88] %v688_v44  ;;  %v625_v46 = vld [vmem:[#allocation2 + $0x38] sm:$0x11] }
  0xd0   : > { %7180 = vmatmul.mubr.msk.bf16.gmra.mrb[8].mxu0 %vm393_vm11, %v8911_v27  ;;  %7184 = vmatmul.mubr.msk.bf16.gmra.mrb[8].mxu1 %vm393_vm11, %v8911_v27  ;;  %v623_v47 = vsel %vm10571_vm10, 0, %v622_v45  ;;  %v626_v48 = vsel %vm10571_vm10, 0, %v625_v46  ;;  %v690_v49 = vld [vmem:[#allocation2 + $0x170] sm:$0x88]  ;;  %v693_v50 = vld [vmem:[#allocation2 + $0x178] sm:$0x88]  ;;  %vm10732_vm9 = vmor %vm10712_vm6, %vm10706_vm4 }
  0xd1   : > { %468 = vmatprep.mubr.bf16.mxu0 %v10248_v2  ;;  %541 = vmatprep.mubr.bf16.mxu1 %v10248_v2  ;;  %624 = vst [vmem:[#allocation2 + $0x30] sm:$0x11] %v623_v47  ;;  %627 = vst [vmem:[#allocation2 + $0x38] sm:$0x11] %v626_v48  ;;  %v691_v51 = vsel %vm10600_vm14, 0, %v690_v49  ;;  %v694_v52 = vsel %vm10600_vm14, 0, %v693_v50 }
  0xd2   : > { %v628_v53 = vld [vmem:[#allocation2 + $0x40] sm:$0x11]  ;;  %v631_v54 = vld [vmem:[#allocation2 + $0x48] sm:$0x11]  ;;  %692 = vst [vmem:[#allocation2 + $0x170] sm:$0x88] %v691_v51 }
  0xd3   : > { %695 = vst [vmem:[#allocation2 + $0x178] sm:$0x88] %v694_v52  ;;  %v629_v55 = vsel %vm10571_vm10, 0, %v628_v53  ;;  %v632_v56 = vsel %vm10571_vm10, 0, %v631_v54  ;;  %v696_v57 = vld [vmem:[#allocation2 + $0x180] sm:$0x88] }
  0xd4   : > { %630 = vst [vmem:[#allocation2 + $0x40] sm:$0x11] %v629_v55  ;;  %633 = vst [vmem:[#allocation2 + $0x48] sm:$0x11] %v632_v56  ;;  %v699_v58 = vld [vmem:[#allocation2 + $0x188] sm:$0x88] }
  0xd5   : > { %v697_v59 = vsel %vm10600_vm14, 0, %v696_v57  ;;  %v700_v60 = vsel %vm10600_vm14, 0, %v699_v58  ;;  %v634_v61 = vld [vmem:[#allocation2 + $0x50] sm:$0x11]  ;;  %v637_v63 = vld [vmem:[#allocation2 + $0x58] sm:$0x11] }
  0xd6   : > { %698 = vst [vmem:[#allocation2 + $0x180] sm:$0x88] %v697_v59  ;;  %701 = vst [vmem:[#allocation2 + $0x188] sm:$0x88] %v700_v60  ;;  %v635_v62 = vsel %vm10571_vm10, 0, %v634_v61  ;;  %v638_v1 = vsel %vm10571_vm10, 0, %v637_v63 }
  0xd7   : > { %636 = vst [vmem:[#allocation2 + $0x50] sm:$0x11] %v635_v62  ;;  %v702_v0 = vld [vmem:[#allocation2 + $0x190] sm:$0x88]  ;;  %639 = vst [vmem:[#allocation2 + $0x58] sm:$0x11] %v638_v1 }
  0xd8   : > { %7181 = vmatmul.mubr.msk.bf16.gmra.mrb[12].mxu0 %vm393_vm11, %v8912_v28  ;;  %7185 = vmatmul.mubr.msk.bf16.gmra.mrb[12].mxu1 %vm393_vm11, %v8912_v28  ;;  %v703_v2 = vsel %vm10600_vm14, 0, %v702_v0  ;;  %v705_v3 = vld [vmem:[#allocation2 + $0x198] sm:$0x88]  ;;  %v640_v5 = vld [vmem:[#allocation2 + $0x60] sm:$0x11]  ;;  %v334_v32 = vshrl.u32 %v333_v31, 7 }
  0xd9   : > { %704 = vst [vmem:[#allocation2 + $0x190] sm:$0x88] %v703_v2  ;;  %v706_v4 = vsel %vm10600_vm14, 0, %v705_v3  ;;  %v643_v7 = vld [vmem:[#allocation2 + $0x68] sm:$0x11]  ;;  %v641_v8 = vsel %vm10571_vm10, 0, %v640_v5 }
  0xda   : > { %707 = vst [vmem:[#allocation2 + $0x198] sm:$0x88] %v706_v4  ;;  %v644_v9 = vsel %vm10571_vm10, 0, %v643_v7  ;;  %642 = vst [vmem:[#allocation2 + $0x60] sm:$0x11] %v641_v8  ;;  %v335_v33 = vsub.s32 0, %v334_v32 }
  0xdb   : > { %v708_v10 = vld [vmem:[#allocation2 + $0x1a0] sm:$0x88]  ;;  %645 = vst [vmem:[#allocation2 + $0x68] sm:$0x11] %v644_v9  ;;  %v711_v11 = vld [vmem:[#allocation2 + $0x1a8] sm:$0x88] }
  0xdc   : > { %v709_v12 = vsel %vm10600_vm14, 0, %v708_v10  ;;  %v712_v13 = vsel %vm10600_vm14, 0, %v711_v11  ;;  %v646_v14 = vld [vmem:[#allocation2 + $0x70] sm:$0x11]  ;;  %v649_v15 = vld [vmem:[#allocation2 + $0x78] sm:$0x11] }
  0xdd   : > { %710 = vst [vmem:[#allocation2 + $0x1a0] sm:$0x88] %v709_v12  ;;  %713 = vst [vmem:[#allocation2 + $0x1a8] sm:$0x88] %v712_v13  ;;  %v647_v16 = vsel %vm10571_vm10, 0, %v646_v14  ;;  %v650_v17 = vsel %vm10571_vm10, 0, %v649_v15 }
  0xde   : > { %648 = vst [vmem:[#allocation2 + $0x70] sm:$0x11] %v647_v16  ;;  %v714_v19 = vld [vmem:[#allocation2 + $0x1b0] sm:$0x88]  ;;  %651 = vst [vmem:[#allocation2 + $0x78] sm:$0x11] %v650_v17 }
  0xdf   : > { %v717_v20 = vld [vmem:[#allocation2 + $0x1b8] sm:$0x88]  ;;  %v715_v21 = vsel %vm10600_vm14, 0, %v714_v19  ;;  %v652_v23 = vld [vmem:[#allocation2 + $0x80] sm:$0x11]  ;;  %v343_v34 = vsub.s32 2, %v334_v32 }
  0xe0   : > { %v718_v22 = vsel %vm10600_vm14, 0, %v717_v20  ;;  %716 = vst [vmem:[#allocation2 + $0x1b0] sm:$0x88] %v715_v21  ;;  %v653_v24 = vsel %vm10571_vm10, 0, %v652_v23  ;;  %v655_v25 = vld [vmem:[#allocation2 + $0x88] sm:$0x11] }
  0xe1   : > { %719 = vst [vmem:[#allocation2 + $0x1b8] sm:$0x88] %v718_v22  ;;  %654 = vst [vmem:[#allocation2 + $0x80] sm:$0x11] %v653_v24  ;;  %v720_v26 = vld [vmem:[#allocation2 + $0x1c0] sm:$0x88] }
  0xe2   : > { %v656_v27 = vsel %vm10571_vm10, 0, %v655_v25  ;;  %v721_v28 = vsel %vm10600_vm14, 0, %v720_v26  ;;  %v723_v29 = vld [vmem:[#allocation2 + $0x1c8] sm:$0x88]  ;;  %v331_v35 = vld [vmem:[#allocation8] sm:$0xf] }
  0xe3   : > { %657 = vst [vmem:[#allocation2 + $0x88] sm:$0x11] %v656_v27  ;;  %722 = vst [vmem:[#allocation2 + $0x1c0] sm:$0x88] %v721_v28  ;;  %v724_v30 = vsel %vm10600_vm14, 0, %v723_v29  ;;  %v339_v36 = vsub.s32 1, %v334_v32  ;;  %v10688_v38 = vrot.slane %v331_v35, %v335_v33  ;;  %v10690_v6 = vrot.slane %v331_v35, %v343_v34 }
  0xe4   : > { %725 = vst [vmem:[#allocation2 + $0x1c8] sm:$0x88] %v724_v30  ;;  %v347_v37 = vsub.s32 3, %v334_v32  ;;  %vm1110_vm3 = vsmask.f32 3328  ;;  %v981_v0 = vld [vmem:[#allocation2 + $0x10] sm:$0xff] }
  0xe5   : > { %v10692_v39 = vrot.slane %v331_v35, %v339_v36  ;;  %vm1112_vm5 = vsmask.f32 7424  ;;  %vm10718_vm7 = vmand %vm974_vm15, %vm1110_vm3  ;;  %v984_v2 = vld [vmem:[#allocation2 + $0x18] sm:$0xff]  ;;  %v1115_v28 = vld [vmem:[#allocation2 + $0x150] sm:$0xff] }
  0xe6   : > { %v10694_v40 = vrot.slane %v331_v35, %v347_v37  ;;  %vm10724_vm8 = vmand %vm977_vm1, %vm1112_vm5 }
  0xe7   : > { %vm10740_vm10 = vmor %vm10724_vm8, %vm10718_vm7 }
 0x193   : > { %v440_v41 = vpop.f32.mrb[0].mxu0  ;;  %v513_v42 = vpop.f32.mrb[0].mxu1 }
 0x194   : > { %v441_v18 = vadd.f32 %v440_v41, %v10688_v38  ;;  %v514_v43 = vadd.f32 %v513_v42, %v10690_v6  ;;  %v442_v44 = vpop.f32.mrb[1].mxu0  ;;  %v515_v45 = vpop.f32.mrb[1].mxu1  ;;  %v1118_v41 = vld [vmem:[#allocation2 + $0x158] sm:$0xff]  ;;  %v987_v42 = vld [vmem:[#allocation2 + $0x20] sm:$0xff] }
 0x195   : > { %v443_v46 = vadd.f32 %v442_v44, %v10692_v39  ;;  %v516_v47 = vadd.f32 %v515_v45, %v10694_v40  ;;  %v444_v48 = vpop.f32.mrb[2].mxu0  ;;  %v517_v49 = vpop.f32.mrb[2].mxu1 }
 0x196   : > { %v445_v50 = vadd.f32 %v444_v48, %v10688_v38  ;;  %v518_v51 = vadd.f32 %v517_v49, %v10690_v6  ;;  %v446_v52 = vpop.f32.mrb[3].mxu0  ;;  %v519_v53 = vpop.f32.mrb[3].mxu1  ;;  %v1121_v48 = vld [vmem:[#allocation2 + $0x160] sm:$0xff]  ;;  %v990_v49 = vld [vmem:[#allocation2 + $0x28] sm:$0xff] }
 0x197   : > { %v8442_v54 = vpack.c.bf16 %v443_v46, %v441_v18  ;;  %v8443_v55 = vpack.c.bf16 %v516_v47, %v514_v43  ;;  %v447_v56 = vadd.f32 %v446_v52, %v10692_v39  ;;  %v520_v57 = vadd.f32 %v519_v53, %v10694_v40 }
 0x199   : > { %829 = vst [vmem:[#allocation2 + $0xb0] sm:$0xff] %v8442_v54  ;;  %v846_v59 = vshrl.u32 %v8442_v54, 16  ;;  %v849_v60 = vshll.u32 %v8442_v54, 16  ;;  %830 = vst [vmem:[#allocation2 + $0xb8] sm:$0xff] %v8443_v55  ;;  %v853_v62 = vshrl.u32 %v8443_v55, 16  ;;  %v856_v63 = vshll.u32 %v8443_v55, 16 }
 0x19a   : > { %v8444_v3 = vpack.c.bf16 %v447_v56, %v445_v50  ;;  %v8445_v4 = vpack.c.bf16 %v520_v57, %v518_v51 }
 0x19b   : > { %v848_v5 = vrot.slane %v846_v59, 7  ;;  %v1029_v7 = vrot.slane %v846_v59, 4  ;;  %v1030_v8 = vrot.slane %v849_v60, 5  ;;  %v855_v10 = vrot.slane %v853_v62, 7  ;;  %v450_v11 = vpop.f32.mrb[4].mxu0  ;;  %v523_v12 = vpop.f32.mrb[4].mxu1 }
 0x19c   : > { %v1033_v14 = vrot.slane %v853_v62, 4  ;;  %v1034_v15 = vrot.slane %v856_v63, 5  ;;  %831 = vst [vmem:[#allocation2 + $0xc0] sm:$0xff] %v8444_v3  ;;  %v860_v16 = vshrl.u32 %v8444_v3, 16  ;;  %v863_v17 = vshll.u32 %v8444_v3, 16  ;;  %832 = vst [vmem:[#allocation2 + $0xc8] sm:$0xff] %v8445_v4 }
 0x19d   : > { %v452_v19 = vpop.f32.mrb[5].mxu0  ;;  %v525_v20 = vpop.f32.mrb[5].mxu1  ;;  %v851_v21 = vor.u32 %v849_v60, %v848_v5  ;;  %v1031_v22 = vor.u32 %v1030_v8, %v1029_v7  ;;  %v858_v23 = vor.u32 %v856_v63, %v855_v10  ;;  %v867_v24 = vshrl.u32 %v8445_v4, 16 }
 0x19e   : > { %v454_v25 = vpop.f32.mrb[6].mxu0  ;;  %v527_v26 = vpop.f32.mrb[6].mxu1  ;;  %v1035_v29 = vor.u32 %v1034_v15, %v1033_v14  ;;  %v862_v30 = vrot.slane %v860_v16, 7  ;;  %v1037_v31 = vrot.slane %v860_v16, 4  ;;  %v1038_v32 = vrot.slane %v863_v17, 5 }
 0x19f   : > { %v456_v33 = vpop.f32.mrb[7].mxu0  ;;  %v529_v34 = vpop.f32.mrb[7].mxu1  ;;  %v982_v35 = vsel %vm10732_vm9, %v851_v21, %v981_v0  ;;  %v1032_v36 = vrot.slane %v1031_v22, 4  ;;  %v985_v37 = vsel %vm10732_vm9, %v858_v23, %v984_v2  ;;  %v869_v18 = vrot.slane %v867_v24, 7 }
 0x1a0   : > { %983 = vst [vmem:[#allocation2 + $0x10] sm:$0xff] %v982_v35  ;;  %986 = vst [vmem:[#allocation2 + $0x18] sm:$0xff] %v985_v37  ;;  %v1036_v43 = vrot.slane %v1035_v29, 4  ;;  %v865_v44 = vor.u32 %v863_v17, %v862_v30  ;;  %v1039_v45 = vor.u32 %v1038_v32, %v1037_v31  ;;  %v870_v46 = vshll.u32 %v8445_v4, 16 }
 0x1a1   : > { %v1116_v47 = vsel %vm10740_vm10, %v1032_v36, %v1115_v28  ;;  %v1041_v50 = vrot.slane %v867_v24, 4  ;;  %v451_v51 = vadd.f32 %v450_v11, %v10688_v38  ;;  %v524_v52 = vadd.f32 %v523_v12, %v10690_v6  ;;  %v1124_v12 = vld [vmem:[#allocation2 + $0x168] sm:$0xff] }
 0x1a2   : > { %1117 = vst [vmem:[#allocation2 + $0x150] sm:$0xff] %v1116_v47  ;;  %v1119_v53 = vsel %vm10740_vm10, %v1036_v43, %v1118_v41  ;;  %v988_v54 = vsel %vm10732_vm9, %v865_v44, %v987_v42  ;;  %v1040_v55 = vrot.slane %v1039_v45, 4  ;;  %v872_v56 = vor.u32 %v870_v46, %v869_v18  ;;  %v996_v43 = vld [vmem:[#allocation2 + $0x38] sm:$0xff]  ;;  %v999_v44 = vld [vmem:[#allocation2 + $0x40] sm:$0xff] }
 0x1a3   : > { %1120 = vst [vmem:[#allocation2 + $0x158] sm:$0xff] %v1119_v53  ;;  %989 = vst [vmem:[#allocation2 + $0x20] sm:$0xff] %v988_v54  ;;  %v1042_v57 = vrot.slane %v870_v46, 5  ;;  %v453_v58 = vadd.f32 %v452_v19, %v10692_v39  ;;  %v526_v59 = vadd.f32 %v525_v20, %v10694_v40  ;;  %v455_v60 = vadd.f32 %v454_v25, %v10688_v38  ;;  %v460_v61 = vpop.f32.mrb[8].mxu0  ;;  %v533_v62 = vpop.f32.mrb[8].mxu1 }
 0x1a4   : > { %v1122_v63 = vsel %vm10740_vm10, %v1040_v55, %v1121_v48  ;;  %v991_v0 = vsel %vm10732_vm9, %v872_v56, %v990_v49  ;;  %v528_v1 = vadd.f32 %v527_v26, %v10690_v6  ;;  %v457_v2 = vadd.f32 %v456_v33, %v10692_v39  ;;  %v462_v3 = vpop.f32.mrb[9].mxu0  ;;  %v10765_v4 = vpop.f32.mrb[9].mxu1  ;;  %v1127_v49 = vld [vmem:[#allocation2 + $0x170] sm:$0xff] }
 0x1a5   : > { %1123 = vst [vmem:[#allocation2 + $0x160] sm:$0xff] %v1122_v63  ;;  %992 = vst [vmem:[#allocation2 + $0x28] sm:$0xff] %v991_v0  ;;  %v1043_v5 = vor.u32 %v1042_v57, %v1041_v50  ;;  %v8446_v7 = vpack.c.bf16 %v453_v58, %v451_v51  ;;  %v8447_v8 = vpack.c.bf16 %v526_v59, %v524_v52  ;;  %v10768_v10 = vpop.f32.mrb[10].mxu0  ;;  %v10770_v11 = vpop.f32.mrb[10].mxu1  ;;  %v1130_v58 = vld [vmem:[#allocation2 + $0x178] sm:$0xff] }
 0x1a6   : > { %v530_v9 = vadd.f32 %v529_v34, %v10694_v40  ;;  %v8448_v14 = vpack.c.bf16 %v457_v2, %v455_v60  ;;  %v10773_v15 = vadd.f32 %v460_v61, %v10688_v38  ;;  %v10776_v16 = vadd.f32 %v533_v62, %v10690_v6  ;;  %v10781_v19 = vpop.f32.mrb[11].mxu0  ;;  %v10783_v20 = vpop.f32.mrb[11].mxu1  ;;  %v993_v34 = vld [vmem:[#allocation2 + $0x30] sm:$0xff]  ;;  %v1133_v2 = vld [vmem:[#allocation2 + $0x180] sm:$0xff] }
 0x1a7   : > { %v10779_v17 = vadd.f32 %v462_v3, %v10692_v39  ;;  %v1044_v21 = vrot.slane %v1043_v5, 4  ;;  %833 = vst [vmem:[#allocation2 + $0xd0] sm:$0xff] %v8446_v7  ;;  %v874_v22 = vshrl.u32 %v8446_v7, 16  ;;  %v877_v23 = vshll.u32 %v8446_v7, 16  ;;  %834 = vst [vmem:[#allocation2 + $0xd8] sm:$0xff] %v8447_v8 }
 0x1a8   : > { %v881_v24 = vshrl.u32 %v8447_v8, 16  ;;  %v884_v25 = vshll.u32 %v8447_v8, 16  ;;  %835 = vst [vmem:[#allocation2 + $0xe0] sm:$0xff] %v8448_v14  ;;  %v888_v26 = vshrl.u32 %v8448_v14, 16  ;;  %v891_v28 = vshll.u32 %v8448_v14, 16 }
 0x1a9   : > { %v8449_v29 = vpack.c.bf16 %v530_v9, %v528_v1  ;;  %v1125_v30 = vsel %vm10740_vm10, %v1044_v21, %v1124_v12  ;;  %v876_v31 = vrot.slane %v874_v22, 7  ;;  %v1045_v32 = vrot.slane %v874_v22, 4  ;;  %v1002_v12 = vld [vmem:[#allocation2 + $0x48] sm:$0xff] }
 0x1aa   : > { %v1046_v33 = vrot.slane %v877_v23, 5  ;;  %1126 = vst [vmem:[#allocation2 + $0x168] sm:$0xff] %v1125_v30  ;;  %v883_v35 = vrot.slane %v881_v24, 7  ;;  %v1049_v36 = vrot.slane %v881_v24, 4  ;;  %v1050_v37 = vrot.slane %v884_v25, 5 }
 0x1ab   : > { %v890_v41 = vrot.slane %v888_v26, 7  ;;  %836 = vst [vmem:[#allocation2 + $0xe8] sm:$0xff] %v8449_v29  ;;  %v879_v42 = vor.u32 %v877_v23, %v876_v31  ;;  %v1053_v45 = vrot.slane %v888_v26, 4  ;;  %v1054_v46 = vrot.slane %v891_v28, 5  ;;  %v470_v47 = vpop.f32.mrb[12].mxu0  ;;  %v10787_v48 = vpop.f32.mrb[12].mxu1 }
 0x1ac   : > { %v1047_v18 = vor.u32 %v1046_v33, %v1045_v32  ;;  %v886_v50 = vor.u32 %v884_v25, %v883_v35  ;;  %v1051_v51 = vor.u32 %v1050_v37, %v1049_v36  ;;  %v895_v53 = vshrl.u32 %v8449_v29, 16  ;;  %v10789_v54 = vpop.f32.mrb[13].mxu0  ;;  %v10791_v55 = vpop.f32.mrb[13].mxu1  ;;  %v1136_v32 = vld [vmem:[#allocation2 + $0x188] sm:$0xff] }
 0x1ad   : > { %v893_v52 = vor.u32 %v891_v28, %v890_v41  ;;  %v994_v56 = vsel %vm10732_vm9, %v879_v42, %v993_v34  ;;  %v1055_v59 = vor.u32 %v1054_v46, %v1053_v45  ;;  %v898_v60 = vshll.u32 %v8449_v29, 16  ;;  %v10795_v61 = vpop.f32.mrb[14].mxu0  ;;  %v10797_v62 = vpop.f32.mrb[14].mxu1 }
 0x1ae   : > { %v1048_v57 = vrot.slane %v1047_v18, 4  ;;  %995 = vst [vmem:[#allocation2 + $0x30] sm:$0xff] %v994_v56  ;;  %v997_v63 = vsel %vm10732_vm9, %v886_v50, %v996_v43  ;;  %v1052_v0 = vrot.slane %v1051_v51, 4  ;;  %v897_v3 = vrot.slane %v895_v53, 7  ;;  %v10803_v5 = vpop.f32.mrb[15].mxu0  ;;  %v10805_v7 = vpop.f32.mrb[15].mxu1 }
 0x1af   : > { %v1000_v1 = vsel %vm10732_vm9, %v893_v52, %v999_v44  ;;  %998 = vst [vmem:[#allocation2 + $0x38] sm:$0xff] %v997_v63  ;;  %v1056_v9 = vrot.slane %v1055_v59, 4  ;;  %v1057_v14 = vrot.slane %v895_v53, 4  ;;  %v1058_v21 = vrot.slane %v898_v60, 5  ;;  %v1005_v18 = vld [vmem:[#allocation2 + $0x50] sm:$0xff]  ;;  %v1008_v50 = vld [vmem:[#allocation2 + $0x58] sm:$0xff] }
 0x1b0   : > { %v1128_v8 = vsel %vm10740_vm10, %v1048_v57, %v1127_v49  ;;  %1001 = vst [vmem:[#allocation2 + $0x40] sm:$0xff] %v1000_v1  ;;  %v1131_v22 = vsel %vm10740_vm10, %v1052_v0, %v1130_v58  ;;  %v900_v23 = vor.u32 %v898_v60, %v897_v3  ;;  %v8450_v24 = vpack.c.bf16 %v10779_v17, %v10773_v15 }
 0x1b1   : > { %1129 = vst [vmem:[#allocation2 + $0x170] sm:$0xff] %v1128_v8  ;;  %v536_v25 = vadd.f32 %v10765_v4, %v10694_v40  ;;  %1132 = vst [vmem:[#allocation2 + $0x178] sm:$0xff] %v1131_v22  ;;  %v1134_v26 = vsel %vm10740_vm10, %v1056_v9, %v1133_v2  ;;  %v1059_v28 = vor.u32 %v1058_v21, %v1057_v14  ;;  %v1142_v8 = vld [vmem:[#allocation2 + $0x198] sm:$0xff]  ;;  %v1011_v9 = vld [vmem:[#allocation2 + $0x60] sm:$0xff] }
 0x1b2   : > { %v465_v29 = vadd.f32 %v10768_v10, %v10688_v38  ;;  %v538_v30 = vadd.f32 %v10770_v11, %v10690_v6  ;;  %1135 = vst [vmem:[#allocation2 + $0x180] sm:$0xff] %v1134_v26  ;;  %v1003_v31 = vsel %vm10732_vm9, %v900_v23, %v1002_v12  ;;  %837 = vst [vmem:[#allocation2 + $0xf0] sm:$0xff] %v8450_v24  ;;  %v902_v15 = vshrl.u32 %v8450_v24, 16  ;;  %v1145_v26 = vld [vmem:[#allocation2 + $0x1a0] sm:$0xff] }
 0x1b3   : > { %v905_v17 = vshll.u32 %v8450_v24, 16  ;;  %v8451_v4 = vpack.c.bf16 %v536_v25, %v10776_v16  ;;  %1004 = vst [vmem:[#allocation2 + $0x48] sm:$0xff] %v1003_v31  ;;  %v1060_v33 = vrot.slane %v1059_v28, 4  ;;  %v467_v34 = vadd.f32 %v10781_v19, %v10692_v39  ;;  %v1014_v24 = vld [vmem:[#allocation2 + $0x68] sm:$0xff] }
 0x1b4   : > { %v540_v10 = vadd.f32 %v10783_v20, %v10694_v40  ;;  %v471_v11 = vadd.f32 %v470_v47, %v10688_v38  ;;  %v904_v35 = vrot.slane %v902_v15, 7  ;;  %v1061_v36 = vrot.slane %v902_v15, 4  ;;  %v1139_v20 = vld [vmem:[#allocation2 + $0x190] sm:$0xff] }
 0x1b5   : > { %v1062_v37 = vrot.slane %v905_v17, 5  ;;  %838 = vst [vmem:[#allocation2 + $0xf8] sm:$0xff] %v8451_v4  ;;  %v909_v41 = vshrl.u32 %v8451_v4, 16  ;;  %v1137_v42 = vsel %vm10740_vm10, %v1060_v33, %v1136_v32  ;;  %v912_v16 = vshll.u32 %v8451_v4, 16 }
 0x1b6   : > { %v8452_v43 = vpack.c.bf16 %v467_v34, %v465_v29  ;;  %v8453_v44 = vpack.c.bf16 %v540_v10, %v538_v30  ;;  %1138 = vst [vmem:[#allocation2 + $0x188] sm:$0xff] %v1137_v42  ;;  %v907_v45 = vor.u32 %v905_v17, %v904_v35  ;;  %v544_v29 = vadd.f32 %v10787_v48, %v10690_v6  ;;  %v1148_v48 = vld [vmem:[#allocation2 + $0x1a8] sm:$0xff] }
 0x1b7   : > { %v1063_v19 = vor.u32 %v1062_v37, %v1061_v36  ;;  %v911_v46 = vrot.slane %v909_v41, 7  ;;  %v1065_v49 = vrot.slane %v909_v41, 4  ;;  %v1066_v47 = vrot.slane %v912_v16, 5 }
 0x1b8   : > { %839 = vst [vmem:[#allocation2 + $0x100] sm:$0xff] %v8452_v43  ;;  %v916_v51 = vshrl.u32 %v8452_v43, 16  ;;  %v919_v52 = vshll.u32 %v8452_v43, 16  ;;  %840 = vst [vmem:[#allocation2 + $0x108] sm:$0xff] %v8453_v44  ;;  %v923_v53 = vshrl.u32 %v8453_v44, 16  ;;  %v1006_v56 = vsel %vm10732_vm9, %v907_v45, %v1005_v18 }
 0x1b9   : > { %v1064_v57 = vrot.slane %v1063_v19, 4  ;;  %v914_v58 = vor.u32 %v912_v16, %v911_v46  ;;  %v926_v59 = vshll.u32 %v8453_v44, 16  ;;  %1007 = vst [vmem:[#allocation2 + $0x50] sm:$0xff] %v1006_v56  ;;  %v1067_v60 = vor.u32 %v1066_v47, %v1065_v49 }
 0x1ba   : > { %v918_v63 = vrot.slane %v916_v51, 7  ;;  %v1069_v0 = vrot.slane %v916_v51, 4  ;;  %v1070_v1 = vrot.slane %v919_v52, 5  ;;  %v925_v12 = vrot.slane %v923_v53, 7 }
 0x1bb   : > { %v1140_v2 = vsel %vm10740_vm10, %v1064_v57, %v1139_v20  ;;  %v1009_v3 = vsel %vm10732_vm9, %v914_v58, %v1008_v50  ;;  %v1073_v14 = vrot.slane %v923_v53, 4  ;;  %v1068_v21 = vrot.slane %v1067_v60, 4  ;;  %v1154_v60 = vld [vmem:[#allocation2 + $0x1b8] sm:$0xff] }
 0x1bc   : > { %1141 = vst [vmem:[#allocation2 + $0x190] sm:$0xff] %v1140_v2  ;;  %1010 = vst [vmem:[#allocation2 + $0x58] sm:$0xff] %v1009_v3  ;;  %v921_v22 = vor.u32 %v919_v52, %v918_v63  ;;  %v1071_v23 = vor.u32 %v1070_v1, %v1069_v0  ;;  %v1074_v25 = vrot.slane %v926_v59, 5  ;;  %v928_v28 = vor.u32 %v926_v59, %v925_v12  ;;  %v1151_v52 = vld [vmem:[#allocation2 + $0x1b0] sm:$0xff]  ;;  %v1023_v63 = vld [vmem:[#allocation2 + $0x80] sm:$0xff] }
 0x1bd   : > { %v473_v30 = vadd.f32 %v10789_v54, %v10692_v39  ;;  %v546_v31 = vadd.f32 %v10791_v55, %v10694_v40  ;;  %v1143_v32 = vsel %vm10740_vm10, %v1068_v21, %v1142_v8  ;;  %v475_v54 = vadd.f32 %v10795_v61, %v10688_v38  ;;  %v1157_v12 = vld [vmem:[#allocation2 + $0x1c0] sm:$0xff] }
 0x1be   : > { %v1012_v15 = vsel %vm10732_vm9, %v921_v22, %v1011_v9  ;;  %v1072_v17 = vrot.slane %v1071_v23, 4  ;;  %v1075_v4 = vor.u32 %v1074_v25, %v1073_v14  ;;  %1144 = vst [vmem:[#allocation2 + $0x198] sm:$0xff] %v1143_v32  ;;  %v1015_v33 = vsel %vm10732_vm9, %v928_v28, %v1014_v24  ;;  %v1026_v25 = vld [vmem:[#allocation2 + $0x88] sm:$0xff] }
 0x1bf   : > { %1013 = vst [vmem:[#allocation2 + $0x60] sm:$0xff] %v1012_v15  ;;  %v8454_v34 = vpack.c.bf16 %v473_v30, %v471_v11  ;;  %v8455_v10 = vpack.c.bf16 %v546_v31, %v544_v29  ;;  %1016 = vst [vmem:[#allocation2 + $0x68] sm:$0xff] %v1015_v33  ;;  %v548_v36 = vadd.f32 %v10797_v62, %v10690_v6  ;;  %v1160_v32 = vld [vmem:[#allocation2 + $0x1c8] sm:$0xff] }
 0x1c0   : > { %v1146_v55 = vsel %vm10740_vm10, %v1072_v17, %v1145_v26  ;;  %v1076_v35 = vrot.slane %v1075_v4, 4  ;;  %v477_v37 = vadd.f32 %v10803_v5, %v10692_v39  ;;  %v550_v16 = vadd.f32 %v10805_v7, %v10694_v40  ;;  %v1017_v39 = vld [vmem:[#allocation2 + $0x70] sm:$0xff]  ;;  %v1020_v5 = vld [vmem:[#allocation2 + $0x78] sm:$0xff] }
 0x1c1   : > { %1147 = vst [vmem:[#allocation2 + $0x1a0] sm:$0xff] %v1146_v55  ;;  %841 = vst [vmem:[#allocation2 + $0x110] sm:$0xff] %v8454_v34  ;;  %v930_v41 = vshrl.u32 %v8454_v34, 16  ;;  %v933_v42 = vshll.u32 %v8454_v34, 16  ;;  %v937_v11 = vshrl.u32 %v8455_v10, 16  ;;  %v940_v18 = vshll.u32 %v8455_v10, 16 }
 0x1c2   : > { %842 = vst [vmem:[#allocation2 + $0x118] sm:$0xff] %v8455_v10  ;;  %v1149_v38 = vsel %vm10740_vm10, %v1076_v35, %v1148_v48  ;;  %v8456_v61 = vpack.c.bf16 %v477_v37, %v475_v54  ;;  %v8457_v51 = vpack.c.bf16 %v550_v16, %v548_v36 }
 0x1c3   : > { %1150 = vst [vmem:[#allocation2 + $0x1a8] sm:$0xff] %v1149_v38  ;;  %v932_v43 = vrot.slane %v930_v41, 7  ;;  %v1077_v6 = vrot.slane %v930_v41, 4  ;;  %v1078_v62 = vrot.slane %v933_v42, 5  ;;  %v939_v44 = vrot.slane %v937_v11, 7 }
 0x1c4   : > { %v1081_v45 = vrot.slane %v937_v11, 4  ;;  %v1082_v19 = vrot.slane %v940_v18, 5  ;;  %843 = vst [vmem:[#allocation2 + $0x120] sm:$0xff] %v8456_v61  ;;  %v944_v46 = vshrl.u32 %v8456_v61, 16  ;;  %v947_v49 = vshll.u32 %v8456_v61, 16  ;;  %844 = vst [vmem:[#allocation2 + $0x128] sm:$0xff] %v8457_v51 }
 0x1c5   : > { %v935_v20 = vor.u32 %v933_v42, %v932_v43  ;;  %v1079_v50 = vor.u32 %v1078_v62, %v1077_v6  ;;  %v942_v47 = vor.u32 %v940_v18, %v939_v44  ;;  %v951_v0 = vshrl.u32 %v8457_v51, 16 }
 0x1c6   : > { %v1083_v53 = vor.u32 %v1082_v19, %v1081_v45  ;;  %v946_v56 = vrot.slane %v944_v46, 7  ;;  %v1085_v40 = vrot.slane %v944_v46, 4  ;;  %v1086_v7 = vrot.slane %v947_v49, 5 }
 0x1c7   : > { %v1018_v57 = vsel %vm10732_vm9, %v935_v20, %v1017_v39  ;;  %v1080_v58 = vrot.slane %v1079_v50, 4  ;;  %v1021_v59 = vsel %vm10732_vm9, %v942_v47, %v1020_v5  ;;  %v954_v8 = vshll.u32 %v8457_v51, 16 }
 0x1c8   : > { %1019 = vst [vmem:[#allocation2 + $0x70] sm:$0xff] %v1018_v57  ;;  %1022 = vst [vmem:[#allocation2 + $0x78] sm:$0xff] %v1021_v59  ;;  %v1084_v1 = vrot.slane %v1083_v53, 4  ;;  %v949_v2 = vor.u32 %v947_v49, %v946_v56  ;;  %v1087_v3 = vor.u32 %v1086_v7, %v1085_v40  ;;  %v953_v14 = vrot.slane %v951_v0, 7 }
 0x1c9   : > { %v1152_v9 = vsel %vm10740_vm10, %v1080_v58, %v1151_v52  ;;  %v1089_v21 = vrot.slane %v951_v0, 4  ;;  %v1090_v26 = vrot.slane %v954_v8, 5 }
 0x1ca   : > { %1153 = vst [vmem:[#allocation2 + $0x1b0] sm:$0xff] %v1152_v9  ;;  %v1155_v22 = vsel %vm10740_vm10, %v1084_v1, %v1154_v60  ;;  %v1024_v23 = vsel %vm10732_vm9, %v949_v2, %v1023_v63  ;;  %v1088_v24 = vrot.slane %v1087_v3, 4  ;;  %v956_v28 = vor.u32 %v954_v8, %v953_v14 }
 0x1cb   : > { %1156 = vst [vmem:[#allocation2 + $0x1b8] sm:$0xff] %v1155_v22  ;;  %1025 = vst [vmem:[#allocation2 + $0x80] sm:$0xff] %v1024_v23  ;;  %v1091_v30 = vor.u32 %v1090_v26, %v1089_v21 }
 0x1cc   : > { %v1158_v29 = vsel %vm10740_vm10, %v1088_v24, %v1157_v12  ;;  %v1027_v31 = vsel %vm10732_vm9, %v956_v28, %v1026_v25 }
 0x1cd   : > { %1159 = vst [vmem:[#allocation2 + $0x1c0] sm:$0xff] %v1158_v29  ;;  %1028 = vst [vmem:[#allocation2 + $0x88] sm:$0xff] %v1027_v31  ;;  %v1092_v15 = vrot.slane %v1091_v30, 4 }
 0x1cf   : > { %v1161_v17 = vsel %vm10740_vm10, %v1092_v15, %v1160_v32 }
 0x1d0   : > { %1162 = vst [vmem:[#allocation2 + $0x1c8] sm:$0xff] %v1161_v17 }
 0x1d1 PF: > { %s11893_s6 = sld [smem:[#allocation19_spill]]  ;;  %v10880_v33 = vld [vmem:[#allocation2 + $0x10] sm:$0xff]  ;;  %v10882_v48 = vld [vmem:[#allocation2 + $0xb8] sm:$0xff]  ;;  %v10886_v34 = vld [vmem:[#allocation2 + $0xc8] sm:$0xff]  ;;  %s11894_s14 = sld [smem:[#allocation20_spill]] }
 0x1d2   : > { %v10878_v4 = vld [vmem:[#allocation2] sm:$0xff]  ;;  %v7783_v10 = vcombine.high %v10882_v48, %v10886_v34  ;;  %s7022_s25 = sshll.u32 %s10552_s13, 4  ;;  %s11896_s8 = sld [smem:[#allocation21_spill]]  ;;  %s11763_s25 = int_to_ptr.vmem [resolvable:$true] %s7022_s25 }
 0x1d3   : > { %v7205_v13 = vcombine.high %v10878_v4, %v10880_v33  ;;  %s11897_s7 = sld [smem:[#allocation24_spill]] }
 0x1d4   : > { %4341 = vmatprep.mubr.bf16.mxu0 %v7783_v10 }
 0x1d5   : > { %1692 = vmatprep.mubr.bf16.mxu1 %v7205_v13 }
 0x1d7   : > { %s8458_s1 = smul.u32 4608, %s11893_s6  ;;  %s7202_s30 = sshll.u32 %s11893_s6, 1 }
 0x1d8   : > { %s1164_s29 = scalar_lea.vmem [#allocation11], %s7202_s30  ;;  %s8747_s5 = smul.u32 48, %s11894_s14 }
 0x1d9   : > { %s10890_s19 = scalar_lea.vmem [#allocation9], %s8458_s1  ;;  %s11770_s1 = scalar_lea.sflag [#allocation5], %s310_s11 }
 0x1da   : > { %v8913_v27 = vld [vmem:[%s10890_s19 + $0x4] ss:$8 sps:$4 sm:$0xff]   ;;  %v8917_v55 = vld [vmem:[%s10890_s19] ss:$8 sps:$4 sm:$0xff]   ;;  %v8919_v36 = vld [vmem:[%s10890_s19 + $0x14] ss:$8 sps:$4 sm:$0xff]   ;;  %s7019_s21 = sadd.s32 %s8747_s5, %s7202_s30 }
 0x1db   : > { %v8915_v54 = vld [vmem:[%s10890_s19 + $0x904] ss:$8 sps:$4 sm:$0xff]   ;;  %1660 = vmatprep.subr.bf16.mxu1 %v8913_v27  ;;  %v8918_v35 = vld [vmem:[%s10890_s19 + $0x900] ss:$8 sps:$4 sm:$0xff]   ;;  %v8921_v37 = vld [vmem:[%s10890_s19 + $0x914] ss:$8 sps:$4 sm:$0xff]  }
 0x1dc   : > { %4309 = vmatprep.subr.bf16.mxu0 %v8915_v54  ;;  %1661 = vmatpush1.bf16.msra.mxu1 %v8917_v55  ;;  %v8923_v41 = vld [vmem:[%s10890_s19 + $0x10] ss:$8 sps:$4 sm:$0xff]   ;;  %v8925_v11 = vld [vmem:[%s10890_s19 + $0x24] ss:$8 sps:$4 sm:$0xff]   ;;  %v8929_v38 = vld [vmem:[%s10890_s19 + $0x20] ss:$8 sps:$4 sm:$0xff]  }
 0x1dd   : > { %4310 = vmatpush1.bf16.msra.mxu0 %v8918_v35  ;;  %1662 = vmatprep.subr.bf16.mxu1 %v8919_v36  ;;  %v8924_v42 = vld [vmem:[%s10890_s19 + $0x910] ss:$8 sps:$4 sm:$0xff]   ;;  %v8927_v18 = vld [vmem:[%s10890_s19 + $0x924] ss:$8 sps:$4 sm:$0xff]   ;;  %v8930_v61 = vld [vmem:[%s10890_s19 + $0x920] ss:$8 sps:$4 sm:$0xff]  }
 0x1de   : > { %4311 = vmatprep.subr.bf16.mxu0 %v8921_v37  ;;  %v8931_v16 = vld [vmem:[%s10890_s19 + $0x34] ss:$8 sps:$4 sm:$0xff]   ;;  %v8935_v6 = vld [vmem:[%s10890_s19 + $0x30] ss:$8 sps:$4 sm:$0xff]   ;;  %v8937_v44 = vld [vmem:[%s10890_s19 + $0x44] ss:$8 sps:$4 sm:$0xff]  }
 0x1df   : > { %v8933_v43 = vld [vmem:[%s10890_s19 + $0x934] ss:$8 sps:$4 sm:$0xff]   ;;  %v8936_v62 = vld [vmem:[%s10890_s19 + $0x930] ss:$8 sps:$4 sm:$0xff]   ;;  %v8939_v39 = vld [vmem:[%s10890_s19 + $0x944] ss:$8 sps:$4 sm:$0xff]  }
 0x1e0   : > { %1663 = vmatpush1.bf16.msra.mxu1 %v8923_v41  ;;  %v8941_v5 = vld [vmem:[%s10890_s19 + $0x40] ss:$8 sps:$4 sm:$0xff]   ;;  %v8943_v19 = vld [vmem:[%s10890_s19 + $0x54] ss:$8 sps:$4 sm:$0xff]   ;;  %v8947_v49 = vld [vmem:[%s10890_s19 + $0x50] ss:$8 sps:$4 sm:$0xff]  }
 0x1e1   : > { %4312 = vmatpush1.bf16.msra.mxu0 %v8924_v42  ;;  %1664 = vmatprep.subr.bf16.mxu1 %v8925_v11  ;;  %v8942_v45 = vld [vmem:[%s10890_s19 + $0x940] ss:$8 sps:$4 sm:$0xff]   ;;  %v8945_v46 = vld [vmem:[%s10890_s19 + $0x954] ss:$8 sps:$4 sm:$0xff]   ;;  %v8948_v20 = vld [vmem:[%s10890_s19 + $0x950] ss:$8 sps:$4 sm:$0xff]  }
 0x1e2   : > { %4313 = vmatprep.subr.bf16.mxu0 %v8927_v18  ;;  %v8949_v50 = vld [vmem:[%s10890_s19 + $0x64] ss:$8 sps:$4 sm:$0xff]   ;;  %v8953_v51 = vld [vmem:[%s10890_s19 + $0x60] ss:$8 sps:$4 sm:$0xff]   ;;  %v8955_v53 = vld [vmem:[%s10890_s19 + $0x74] ss:$8 sps:$4 sm:$0xff]  }
 0x1e3   : > { %v8951_v47 = vld [vmem:[%s10890_s19 + $0x964] ss:$8 sps:$4 sm:$0xff]   ;;  %v8954_v52 = vld [vmem:[%s10890_s19 + $0x960] ss:$8 sps:$4 sm:$0xff]   ;;  %v8957_v56 = vld [vmem:[%s10890_s19 + $0x974] ss:$8 sps:$4 sm:$0xff]  }
 0x1e4   : > { %1665 = vmatpush1.bf16.msra.mxu1 %v8929_v38  ;;  %v8959_v40 = vld [vmem:[%s10890_s19 + $0x70] ss:$8 sps:$4 sm:$0xff]   ;;  %v8961_v57 = vld [vmem:[%s10890_s19 + $0x84] ss:$8 sps:$4 sm:$0xff]   ;;  %v8965_v59 = vld [vmem:[%s10890_s19 + $0x80] ss:$8 sps:$4 sm:$0xff]   ;;  %v7204_v38 = vcombine.low %v10878_v4, %v10880_v33 }
 0x1e5   : > { %4314 = vmatpush1.bf16.msra.mxu0 %v8930_v61  ;;  %1666 = vmatprep.subr.bf16.mxu1 %v8931_v16  ;;  %v8960_v7 = vld [vmem:[%s10890_s19 + $0x970] ss:$8 sps:$4 sm:$0xff]   ;;  %v8963_v58 = vld [vmem:[%s10890_s19 + $0x984] ss:$8 sps:$4 sm:$0xff]   ;;  %v8966_v60 = vld [vmem:[%s10890_s19 + $0x980] ss:$8 sps:$4 sm:$0xff]   ;;  %v7782_v16 = vcombine.low %v10882_v48, %v10886_v34 }
 0x1e6   : > { %4315 = vmatprep.subr.bf16.mxu0 %v8933_v43  ;;  %v8967_v63 = vld [vmem:[%s10890_s19 + $0x94] ss:$8 sps:$4 sm:$0xff]   ;;  %v8971_v1 = vld [vmem:[%s10890_s19 + $0x90] ss:$8 sps:$4 sm:$0xff]   ;;  %v8973_v3 = vld [vmem:[%s10890_s19 + $0xa4] ss:$8 sps:$4 sm:$0xff]  }
 0x1e7   : > { %v8969_v0 = vld [vmem:[%s10890_s19 + $0x994] ss:$8 sps:$4 sm:$0xff]   ;;  %v8972_v2 = vld [vmem:[%s10890_s19 + $0x990] ss:$8 sps:$4 sm:$0xff]   ;;  %v8975_v8 = vld [vmem:[%s10890_s19 + $0x9a4] ss:$8 sps:$4 sm:$0xff]  }
 0x1e8   : > { %1667 = vmatpush1.bf16.msra.mxu1 %v8935_v6  ;;  %v8977_v9 = vld [vmem:[%s10890_s19 + $0xa0] ss:$8 sps:$4 sm:$0xff]   ;;  %v8979_v14 = vld [vmem:[%s10890_s19 + $0xb4] ss:$8 sps:$4 sm:$0xff]   ;;  %v8983_v22 = vld [vmem:[%s10890_s19 + $0xb0] ss:$8 sps:$4 sm:$0xff]  }
 0x1e9   : > { %4316 = vmatpush1.bf16.msra.mxu0 %v8936_v62  ;;  %1668 = vmatprep.subr.bf16.mxu1 %v8937_v44  ;;  %v8978_v12 = vld [vmem:[%s10890_s19 + $0x9a0] ss:$8 sps:$4 sm:$0xff]   ;;  %v8981_v21 = vld [vmem:[%s10890_s19 + $0x9b4] ss:$8 sps:$4 sm:$0xff]   ;;  %v8984_v23 = vld [vmem:[%s10890_s19 + $0x9b0] ss:$8 sps:$4 sm:$0xff]  }
 0x1ea   : > { %4317 = vmatprep.subr.bf16.mxu0 %v8939_v39  ;;  %v8985_v24 = vld [vmem:[%s10890_s19 + $0xc4] ss:$8 sps:$4 sm:$0xff]   ;;  %v8989_v26 = vld [vmem:[%s10890_s19 + $0xc0] ss:$8 sps:$4 sm:$0xff]   ;;  %v8991_v29 = vld [vmem:[%s10890_s19 + $0xd4] ss:$8 sps:$4 sm:$0xff]  }
 0x1eb   : > { %v8987_v25 = vld [vmem:[%s10890_s19 + $0x9c4] ss:$8 sps:$4 sm:$0xff]   ;;  %v8990_v28 = vld [vmem:[%s10890_s19 + $0x9c0] ss:$8 sps:$4 sm:$0xff]   ;;  %v8993_v30 = vld [vmem:[%s10890_s19 + $0x9d4] ss:$8 sps:$4 sm:$0xff]  }
 0x1ec   : > { %1669 = vmatpush1.bf16.msra.mxu1 %v8941_v5  ;;  %v8995_v31 = vld [vmem:[%s10890_s19 + $0xd0] ss:$8 sps:$4 sm:$0xff]   ;;  %v8997_v15 = vld [vmem:[%s10890_s19 + $0xe4] ss:$8 sps:$4 sm:$0xff]   ;;  %v9001_v13 = vld [vmem:[%s10890_s19 + $0xe0] ss:$8 sps:$4 sm:$0xff]  }
 0x1ed   : > { %4318 = vmatpush1.bf16.msra.mxu0 %v8942_v45  ;;  %1670 = vmatprep.subr.bf16.mxu1 %v8943_v19  ;;  %v8996_v32 = vld [vmem:[%s10890_s19 + $0x9d0] ss:$8 sps:$4 sm:$0xff]   ;;  %v8999_v17 = vld [vmem:[%s10890_s19 + $0x9e4] ss:$8 sps:$4 sm:$0xff]   ;;  %v9002_v10 = vld [vmem:[%s10890_s19 + $0x9e0] ss:$8 sps:$4 sm:$0xff]  }
 0x1ee   : > { %4319 = vmatprep.subr.bf16.mxu0 %v8945_v46  ;;  %v9003_v27 = vld [vmem:[%s10890_s19 + $0xf4] ss:$8 sps:$4 sm:$0xff]   ;;  %v9007_v55 = vld [vmem:[%s10890_s19 + $0xf0] ss:$8 sps:$4 sm:$0xff]   ;;  %v9013_v36 = vld [vmem:[%s10890_s19 + $0x104] ss:$8 sps:$4 sm:$0xff]  }
 0x1ef   : > { %v9005_v54 = vld [vmem:[%s10890_s19 + $0x9f4] ss:$8 sps:$4 sm:$0xff]   ;;  %v9008_v35 = vld [vmem:[%s10890_s19 + $0x9f0] ss:$8 sps:$4 sm:$0xff]   ;;  %v9018_v37 = vld [vmem:[%s10890_s19 + $0xe04] ss:$8 sps:$4 sm:$0xff]  }
 0x1f0   : > { %1671 = vmatpush1.bf16.msra.mxu1 %v8947_v49  ;;  %v10958_v41 = vld [vmem:[#allocation2 + $0x20] sm:$0xff]  ;;  %v1183_v42 = vld [vmem:[#allocation2 + $0x30] sm:$0xff]  ;;  %v10960_v11 = vld [vmem:[#allocation2 + $0xd8] sm:$0xff]  ;;  %s8438_s24 = sshll.u32 %s7019_s21, 7  ;;  %p11898_p4 = scmp.ne.s32.totalorder %s11896_s8, 0 }
 0x1f1   : > { %4320 = vmatpush1.bf16.msra.mxu0 %v8948_v20  ;;  %1672 = vmatprep.subr.bf16.mxu1 %v8949_v50  ;;  %v3762_v18 = vld [vmem:[#allocation2 + $0xe8] sm:$0xff]  ;;  %v9021_v6 = vld [vmem:[%s10890_s19 + $0x114] ss:$8 sps:$4 sm:$0xff]   ;;  %v7209_v44 = vcombine.high %v10958_v41, %v1183_v42  ;;  %v9019_v4 = vld [vmem:[%s10890_s19 + $0x110] ss:$8 sps:$4 sm:$0xff]   ;;  %v7208_v46 = vcombine.low %v10958_v41, %v1183_v42  ;;  %s11760_s6 = scalar_lea.hbm %s11897_s7, %s8438_s24  ;;  %s10249_s30 = smov [#allocation12]  }
 0x1f2   : > { %4321 = vmatprep.subr.bf16.mxu0 %v8951_v47  ;;  %v9011_v61 = vld [vmem:[%s10890_s19 + $0x100] ss:$8 sps:$4 sm:$0xff]   ;;  %v9024_v62 = vld [vmem:[%s10890_s19 + $0xe14] ss:$8 sps:$4 sm:$0xff]   ;;  %v7787_v39 = vcombine.high %v10960_v11, %v3762_v18  ;;  %v9022_v33 = vld [vmem:[%s10890_s19 + $0xe10] ss:$8 sps:$4 sm:$0xff]   ;;  %v7786_v49 = vcombine.low %v10960_v11, %v3762_v18 }
 0x1f3   : > { %v9016_v43 = vld [vmem:[%s10890_s19 + $0xe00] ss:$8 sps:$4 sm:$0xff]   ;;  %v9027_v48 = vld [vmem:[%s10890_s19 + $0x124] ss:$8 sps:$4 sm:$0xff]   ;;  %v9033_v20 = vld [vmem:[%s10890_s19 + $0x134] ss:$8 sps:$4 sm:$0xff]  }
 0x1f4   : > { %1673 = vmatpush1.bf16.msra.mxu1 %v8953_v51  ;;  %v9030_v34 = vld [vmem:[%s10890_s19 + $0xe24] ss:$8 sps:$4 sm:$0xff]   ;;  %v9025_v45 = vld [vmem:[%s10890_s19 + $0x120] ss:$8 sps:$4 sm:$0xff]   ;;  %v9036_v50 = vld [vmem:[%s10890_s19 + $0xe34] ss:$8 sps:$4 sm:$0xff]  }
 0x1f5   : > { %4322 = vmatpush1.bf16.msra.mxu0 %v8954_v52  ;;  %1674 = vmatprep.subr.bf16.mxu1 %v8955_v53  ;;  %v10976_v5 = vld [vmem:[#allocation2 + $0x40] sm:$0xff]  ;;  %v9031_v47 = vld [vmem:[%s10890_s19 + $0x130] ss:$8 sps:$4 sm:$0xff]   ;;  %v9069_v42 = vld [vmem:[%s10890_s19 + $0x194] ss:$8 sps:$4 sm:$0xff]  }
 0x1f6   : > { %4323 = vmatprep.subr.bf16.mxu0 %v8957_v56  ;;  %v9028_v19 = vld [vmem:[%s10890_s19 + $0xe20] ss:$8 sps:$4 sm:$0xff]   ;;  %v10985_v51 = vld [vmem:[#allocation2 + $0x50] sm:$0xff]  ;;  %v9039_v56 = vld [vmem:[%s10890_s19 + $0x144] ss:$8 sps:$4 sm:$0xff]  }
 0x1f7   : > { %v9034_v52 = vld [vmem:[%s10890_s19 + $0xe30] ss:$8 sps:$4 sm:$0xff]   ;;  %v7213_v53 = vcombine.high %v10976_v5, %v10985_v51  ;;  %v9072_v18 = vld [vmem:[%s10890_s19 + $0xe94] ss:$8 sps:$4 sm:$0xff]  }
 0x1f8   : > { %1675 = vmatpush1.bf16.msra.mxu1 %v8959_v40  ;;  %v10991_v40 = vld [vmem:[#allocation2 + $0xf8] sm:$0xff] }
 0x1f9   : > { %4324 = vmatpush1.bf16.msra.mxu0 %v8960_v7  ;;  %1676 = vmatprep.subr.bf16.mxu1 %v8961_v57  ;;  %v10993_v7 = vld [vmem:[#allocation2 + $0x108] sm:$0xff] }
 0x1fa   : > { %4325 = vmatprep.subr.bf16.mxu0 %v8963_v58  ;;  %v9042_v57 = vld [vmem:[%s10890_s19 + $0xe44] ss:$8 sps:$4 sm:$0xff]   ;;  %v7791_v58 = vcombine.high %v10991_v40, %v10993_v7 }
 0x1fc   : > { %1677 = vmatpush1.bf16.msra.mxu1 %v8965_v59  ;;  %v9037_v59 = vld [vmem:[%s10890_s19 + $0x140] ss:$8 sps:$4 sm:$0xff]  }
 0x1fd   : > { %4326 = vmatpush1.bf16.msra.mxu0 %v8966_v60  ;;  %1678 = vmatprep.subr.bf16.mxu1 %v8967_v63  ;;  %v9040_v60 = vld [vmem:[%s10890_s19 + $0xe40] ss:$8 sps:$4 sm:$0xff]   ;;  %v7212_v63 = vcombine.low %v10976_v5, %v10985_v51 }
 0x1fe   : > { %4327 = vmatprep.subr.bf16.mxu0 %v8969_v0  ;;  %v7790_v0 = vcombine.low %v10991_v40, %v10993_v7 }
 0x200   : > { %1679 = vmatpush1.bf16.msra.mxu1 %v8971_v1  ;;  %v9045_v1 = vld [vmem:[%s10890_s19 + $0x154] ss:$8 sps:$4 sm:$0xff]  }
 0x201   : > { %4328 = vmatpush1.bf16.msra.mxu0 %v8972_v2  ;;  %1680 = vmatprep.subr.bf16.mxu1 %v8973_v3  ;;  %v9048_v2 = vld [vmem:[%s10890_s19 + $0xe54] ss:$8 sps:$4 sm:$0xff]   ;;  %v11006_v3 = vld [vmem:[#allocation2 + $0x60] sm:$0xff] }
 0x202   : > { %4329 = vmatprep.subr.bf16.mxu0 %v8975_v8  ;;  %v1191_v8 = vld [vmem:[#allocation2 + $0x70] sm:$0xff] }
 0x204   : > { %1681 = vmatpush1.bf16.msra.mxu1 %v8977_v9  ;;  %v9043_v9 = vld [vmem:[%s10890_s19 + $0x150] ss:$8 sps:$4 sm:$0xff]  }
 0x205   : > { %4330 = vmatpush1.bf16.msra.mxu0 %v8978_v12  ;;  %1682 = vmatprep.subr.bf16.mxu1 %v8979_v14  ;;  %v7217_v12 = vcombine.high %v11006_v3, %v1191_v8  ;;  %v11010_v14 = vld [vmem:[#allocation2 + $0x118] sm:$0xff] }
 0x206   : > { %4331 = vmatprep.subr.bf16.mxu0 %v8981_v21  ;;  %v3770_v21 = vld [vmem:[#allocation2 + $0x128] sm:$0xff] }
 0x208   : > { %1683 = vmatpush1.bf16.msra.mxu1 %v8983_v22  ;;  %v9046_v22 = vld [vmem:[%s10890_s19 + $0xe50] ss:$8 sps:$4 sm:$0xff]  }
 0x209   : > { %4332 = vmatpush1.bf16.msra.mxu0 %v8984_v23  ;;  %1684 = vmatprep.subr.bf16.mxu1 %v8985_v24  ;;  %v9051_v23 = vld [vmem:[%s10890_s19 + $0x164] ss:$8 sps:$4 sm:$0xff]   ;;  %v7795_v24 = vcombine.high %v11010_v14, %v3770_v21 }
 0x20a   : > { %4333 = vmatprep.subr.bf16.mxu0 %v8987_v25  ;;  %v9054_v25 = vld [vmem:[%s10890_s19 + $0xe64] ss:$8 sps:$4 sm:$0xff]  }
 0x20c   : > { %1685 = vmatpush1.bf16.msra.mxu1 %v8989_v26  ;;  %v9049_v26 = vld [vmem:[%s10890_s19 + $0x160] ss:$8 sps:$4 sm:$0xff]  }
 0x20d   : > { %4334 = vmatpush1.bf16.msra.mxu0 %v8990_v28  ;;  %1686 = vmatprep.subr.bf16.mxu1 %v8991_v29  ;;  %v9052_v28 = vld [vmem:[%s10890_s19 + $0xe60] ss:$8 sps:$4 sm:$0xff]   ;;  %v7216_v29 = vcombine.low %v11006_v3, %v1191_v8  ;;  %v9125_v8 = vld [vmem:[%s10890_s19 + $0x604] ss:$8 sps:$4 sm:$0xff]  }
 0x20e   : > { %4335 = vmatprep.subr.bf16.mxu0 %v8993_v30  ;;  %v7794_v30 = vcombine.low %v11010_v14, %v3770_v21  ;;  %v9126_v21 = vld [vmem:[#allocation2 + $0xc0] ss:$16 sps:$4 sm:$0xff]  }
 0x210   : > { %1687 = vmatpush1.bf16.msra.mxu1 %v8995_v31  ;;  %v11020_v31 = vld [vmem:[#allocation2 + $0x8] sm:$0xff] }
 0x211   : > { %4336 = vmatpush1.bf16.msra.mxu0 %v8996_v32  ;;  %1688 = vmatprep.subr.bf16.mxu1 %v8997_v15  ;;  %v11022_v32 = vld [vmem:[#allocation2 + $0x18] sm:$0xff] }
 0x212   : > { %4337 = vmatprep.subr.bf16.mxu0 %v8999_v17  ;;  %v9057_v15 = vld [vmem:[%s10890_s19 + $0x174] ss:$8 sps:$4 sm:$0xff]  }
 0x213   : > { %v9060_v17 = vld [vmem:[%s10890_s19 + $0xe74] ss:$8 sps:$4 sm:$0xff]  }
 0x214   : > { %1689 = vmatpush1.bf16.msra.mxu1 %v9001_v13  ;;  %v7207_v13 = vcombine.high %v11020_v31, %v11022_v32 }
 0x215   : > { %4338 = vmatpush1.bf16.msra.mxu0 %v9002_v10  ;;  %1690 = vmatprep.subr.bf16.mxu1 %v9003_v27  ;;  %v9128_v10 = vld [vmem:[#allocation2 + $0xc4] ss:$16 sps:$4 sm:$0xff]   ;;  %v9055_v27 = vld [vmem:[%s10890_s19 + $0x170] ss:$8 sps:$4 sm:$0xff]  }
 0x216   : > { %4339 = vmatprep.subr.bf16.mxu0 %v9005_v54  ;;  %v9058_v54 = vld [vmem:[%s10890_s19 + $0xe70] ss:$8 sps:$4 sm:$0xff]  }
 0x218   : > { %1691 = vmatpush1.bf16.msra.mxu1 %v9007_v55  ;;  %v9063_v55 = vld [vmem:[%s10890_s19 + $0x184] ss:$8 sps:$4 sm:$0xff]  }
 0x219   : > { %4340 = vmatpush1.bf16.msra.mxu0 %v9008_v35  ;;  %1733 = vmatprep.subr.bf16.mxu1 %v9013_v36  ;;  %v9066_v35 = vld [vmem:[%s10890_s19 + $0xe84] ss:$8 sps:$4 sm:$0xff]   ;;  %v9061_v36 = vld [vmem:[%s10890_s19 + $0x180] ss:$8 sps:$4 sm:$0xff]  }
 0x21a   : > { %4880 = vmatprep.subr.bf16.mxu0 %v9018_v37  ;;  %v9064_v37 = vld [vmem:[%s10890_s19 + $0xe80] ss:$8 sps:$4 sm:$0xff]  }
 0x21b   : > { %1693 = vmatmul.mubr.bf16.vlgmr.msra.gmra.mrb[0].mxu1 %v7204_v38  ;;  %v9067_v38 = vld [vmem:[%s10890_s19 + $0x190] ss:$8 sps:$4 sm:$0xff]  }
 0x21c   : > { %4342 = vmatmul.mubr.bf16.vlgmr.msra.gmra.mrb[0].mxu0 %v7782_v16  ;;  %1734 = vmatpush1.bf16.msra.mxu1 %v9011_v61  ;;  %v9070_v61 = vld [vmem:[%s10890_s19 + $0xe90] ss:$8 sps:$4 sm:$0xff]   ;;  %v9076_v16 = vld [vmem:[%s10890_s19 + $0x1a4] ss:$8 sps:$4 sm:$0xff]  }
 0x21d   : > { %4881 = vmatpush1.bf16.msra.mxu0 %v9016_v43  ;;  %1735 = vmatprep.subr.bf16.mxu1 %v9021_v6  ;;  %v9080_v43 = vld [vmem:[%s10890_s19 + $0xea4] ss:$8 sps:$4 sm:$0xff]   ;;  %v9074_v6 = vld [vmem:[%s10890_s19 + $0x1a0] ss:$8 sps:$4 sm:$0xff]  }
 0x21e   : > { %4882 = vmatprep.subr.bf16.mxu0 %v9024_v62  ;;  %1702 = vmatprep.mubr.bf16.mxu1 %v7209_v44  ;;  %v9078_v62 = vld [vmem:[%s10890_s19 + $0xea0] ss:$8 sps:$4 sm:$0xff]   ;;  %v9085_v44 = vld [vmem:[%s10890_s19 + $0x1b4] ss:$8 sps:$4 sm:$0xff]  }
 0x21f   : > { %4351 = vmatprep.mubr.bf16.mxu0 %v7787_v39  ;;  %v9088_v39 = vld [vmem:[%s10890_s19 + $0xeb4] ss:$8 sps:$4 sm:$0xff]  }
 0x220   : > { %1736 = vmatpush1.bf16.msra.mxu1 %v9019_v4  ;;  %v9083_v4 = vld [vmem:[%s10890_s19 + $0x1b0] ss:$8 sps:$4 sm:$0xff]  }
 0x221   : > { %4883 = vmatpush1.bf16.msra.mxu0 %v9022_v33  ;;  %1737 = vmatprep.subr.bf16.mxu1 %v9027_v48  ;;  %v9086_v33 = vld [vmem:[%s10890_s19 + $0xeb0] ss:$8 sps:$4 sm:$0xff]   ;;  %v9092_v48 = vld [vmem:[%s10890_s19 + $0x1c4] ss:$8 sps:$4 sm:$0xff]  }
 0x222   : > { %4884 = vmatprep.subr.bf16.mxu0 %v9030_v34  ;;  %v9096_v34 = vld [vmem:[%s10890_s19 + $0xec4] ss:$8 sps:$4 sm:$0xff]  }
 0x223   : > { %1703 = vmatmul.mubr.bf16.gmra.mrb[4].mxu1 %v7208_v46  ;;  %v7357_v46 = vcombine.high %v10985_v51, %v11006_v3 }
 0x224   : > { %4352 = vmatmul.mubr.bf16.gmra.mrb[4].mxu0 %v7786_v49  ;;  %1738 = vmatpush1.bf16.msra.mxu1 %v9025_v45  ;;  %v9090_v45 = vld [vmem:[%s10890_s19 + $0x1c0] ss:$8 sps:$4 sm:$0xff]   ;;  %v9101_v49 = vld [vmem:[%s10890_s19 + $0x1d4] ss:$8 sps:$4 sm:$0xff]  }
 0x225   : > { %4885 = vmatpush1.bf16.msra.mxu0 %v9028_v19  ;;  %1739 = vmatprep.subr.bf16.mxu1 %v9033_v20  ;;  %v9094_v19 = vld [vmem:[%s10890_s19 + $0xec0] ss:$8 sps:$4 sm:$0xff]   ;;  %v9104_v20 = vld [vmem:[%s10890_s19 + $0xed4] ss:$8 sps:$4 sm:$0xff]  }
 0x226   : > { %4886 = vmatprep.subr.bf16.mxu0 %v9036_v50  ;;  %1712 = vmatprep.mubr.bf16.mxu1 %v7213_v53  ;;  %v7935_v50 = vcombine.high %v10993_v7, %v11010_v14  ;;  %v9099_v53 = vld [vmem:[%s10890_s19 + $0x1d0] ss:$8 sps:$4 sm:$0xff]  }
 0x227   : > { %4361 = vmatprep.mubr.bf16.mxu0 %v7791_v58  ;;  %v9112_v58 = vld [vmem:[%s10890_s19 + $0xee4] ss:$8 sps:$4 sm:$0xff]  }
 0x228   : > { %1740 = vmatpush1.bf16.msra.mxu1 %v9031_v47  ;;  %v7356_v47 = vcombine.low %v10985_v51, %v11006_v3  ;;  %v11219_v51 = vld [vmem:[#allocation2 + $0x140] sm:$0xff] }
 0x229   : > { %4887 = vmatpush1.bf16.msra.mxu0 %v9034_v52  ;;  %1741 = vmatprep.subr.bf16.mxu1 %v9039_v56  ;;  %v7934_v52 = vcombine.low %v10993_v7, %v11010_v14  ;;  %v9102_v56 = vld [vmem:[%s10890_s19 + $0xed0] ss:$8 sps:$4 sm:$0xff]   ;;  %v9277_v14 = vld [vmem:[%s10890_s19 + $0x760] ss:$8 sps:$4 sm:$0xff]  }
 0x22a   : > { %4888 = vmatprep.subr.bf16.mxu0 %v9042_v57  ;;  %v9108_v57 = vld [vmem:[%s10890_s19 + $0x1e4] ss:$8 sps:$4 sm:$0xff]   ;;  %v11221_v7 = vld [vmem:[#allocation2 + $0x150] sm:$0xff] }
 0x22b   : > { %1713 = vmatmul.mubr.bf16.gmra.mrb[8].mxu1 %v7212_v63  ;;  %v9117_v63 = vld [vmem:[%s10890_s19 + $0x1f4] ss:$8 sps:$4 sm:$0xff]  }
 0x22c   : > { %4362 = vmatmul.mubr.bf16.gmra.mrb[8].mxu0 %v7790_v0  ;;  %1742 = vmatpush1.bf16.msra.mxu1 %v9037_v59  ;;  %v9106_v59 = vld [vmem:[%s10890_s19 + $0x1e0] ss:$8 sps:$4 sm:$0xff]   ;;  %v9120_v0 = vld [vmem:[%s10890_s19 + $0xef4] ss:$8 sps:$4 sm:$0xff]  }
 0x22d   : > { %4889 = vmatpush1.bf16.msra.mxu0 %v9040_v60  ;;  %1743 = vmatprep.subr.bf16.mxu1 %v9045_v1  ;;  %v9110_v60 = vld [vmem:[%s10890_s19 + $0xee0] ss:$8 sps:$4 sm:$0xff]   ;;  %v9115_v1 = vld [vmem:[%s10890_s19 + $0x1f0] ss:$8 sps:$4 sm:$0xff]  }
 0x22e   : > { %4890 = vmatprep.subr.bf16.mxu0 %v9048_v2  ;;  %1722 = vmatprep.mubr.bf16.mxu1 %v7217_v12  ;;  %v9118_v2 = vld [vmem:[%s10890_s19 + $0xef0] ss:$8 sps:$4 sm:$0xff]   ;;  %v9123_v12 = vld [vmem:[%s10890_s19 + $0x600] ss:$8 sps:$4 sm:$0xff]  }
 0x22f   : > { %4371 = vmatprep.mubr.bf16.mxu0 %v7795_v24  ;;  %v11077_v24 = vld [vmem:[#allocation2 + $0x38] sm:$0xff] }
 0x230   : > { %1744 = vmatpush1.bf16.msra.mxu1 %v9043_v9  ;;  %v9131_v9 = vld [vmem:[%s10890_s19 + $0xf04] ss:$8 sps:$4 sm:$0xff]  }
 0x231   : > { %4891 = vmatpush1.bf16.msra.mxu0 %v9046_v22  ;;  %1745 = vmatprep.subr.bf16.mxu1 %v9051_v23  ;;  %v7206_v22 = vcombine.low %v11020_v31, %v11022_v32  ;;  %v11075_v23 = vld [vmem:[#allocation2 + $0x28] sm:$0xff] }
 0x232   : > { %4892 = vmatprep.subr.bf16.mxu0 %v9054_v25  ;;  %v9129_v25 = vld [vmem:[%s10890_s19 + $0xf00] ss:$8 sps:$4 sm:$0xff]   ;;  %v7211_v31 = vcombine.high %v11075_v23, %v11077_v24 }
 0x233   : > { %1723 = vmatmul.mubr.bf16.gmra.mrb[12].mxu1 %v7216_v29  ;;  %v9134_v29 = vld [vmem:[%s10890_s19 + $0x614] ss:$8 sps:$4 sm:$0xff]  }
 0x234   : > { %4372 = vmatmul.mubr.bf16.gmra.mrb[12].mxu0 %v7794_v30  ;;  %1746 = vmatpush1.bf16.msra.mxu1 %v9049_v26  ;;  %v7350_v26 = vcombine.low %v11022_v32, %v11075_v23  ;;  %v9137_v30 = vld [vmem:[%s10890_s19 + $0xf14] ss:$8 sps:$4 sm:$0xff]  }
 0x235   : > { %4893 = vmatpush1.bf16.msra.mxu0 %v9052_v28  ;;  %1747 = vmatprep.subr.bf16.mxu1 %v9057_v15  ;;  %v7351_v28 = vcombine.high %v11022_v32, %v11075_v23  ;;  %v9190_v15 = vld [vmem:[#allocation2 + $0xe4] ss:$16 sps:$4 sm:$0xff]  }
 0x236   : > { %4894 = vmatprep.subr.bf16.mxu0 %v9060_v17  ;;  %1765 = vmatprep.mubr.bf16.mxu1 %v7207_v13  ;;  %v9132_v17 = vld [vmem:[%s10890_s19 + $0x610] ss:$8 sps:$4 sm:$0xff]   ;;  %v5051_v32 = vld [vmem:[#allocation2 + $0x180] sm:$0xff] }
 0x237   : > { %4912 = vmatprep.mubr.bf16.mxu0 %v9128_v10  ;;  %v9135_v13 = vld [vmem:[%s10890_s19 + $0xf10] ss:$8 sps:$4 sm:$0xff]   ;;  %v9140_v10 = vld [vmem:[%s10890_s19 + $0x624] ss:$8 sps:$4 sm:$0xff]  }
 0x238   : > { %1748 = vmatpush1.bf16.msra.mxu1 %v9055_v27  ;;  %v9143_v27 = vld [vmem:[%s10890_s19 + $0xf24] ss:$8 sps:$4 sm:$0xff]  }
 0x239   : > { %4895 = vmatpush1.bf16.msra.mxu0 %v9058_v54  ;;  %1749 = vmatprep.subr.bf16.mxu1 %v9063_v55  ;;  %v9138_v54 = vld [vmem:[%s10890_s19 + $0x620] ss:$8 sps:$4 sm:$0xff]  }
 0x23a   : > { %4896 = vmatprep.subr.bf16.mxu0 %v9066_v35  ;;  %v9196_v55 = vld [vmem:[#allocation2 + $0xe0] ss:$16 sps:$4 sm:$0xff]   ;;  %v7210_v35 = vcombine.low %v11075_v23, %v11077_v24 }
 0x23c   : > { %1750 = vmatpush1.bf16.msra.mxu1 %v9061_v36  ;;  %v11095_v36 = vld [vmem:[#allocation2 + $0x48] sm:$0xff] }
 0x23d   : > { %4897 = vmatpush1.bf16.msra.mxu0 %v9064_v37  ;;  %1751 = vmatprep.subr.bf16.mxu1 %v9069_v42  ;;  %v11097_v37 = vld [vmem:[#allocation2 + $0x58] sm:$0xff]  ;;  %v9141_v42 = vld [vmem:[%s10890_s19 + $0xf20] ss:$8 sps:$4 sm:$0xff]  }
 0x23e   : > { %4898 = vmatprep.subr.bf16.mxu0 %v9072_v18  ;;  %v9146_v18 = vld [vmem:[%s10890_s19 + $0x634] ss:$8 sps:$4 sm:$0xff]  }
 0x240   : > { %1752 = vmatpush1.bf16.msra.mxu1 %v9067_v38  ;;  %v9149_v38 = vld [vmem:[%s10890_s19 + $0xf34] ss:$8 sps:$4 sm:$0xff]  }
 0x241   : > { %4899 = vmatpush1.bf16.msra.mxu0 %v9070_v61  ;;  %1753 = vmatprep.subr.bf16.mxu1 %v9076_v16  ;;  %v7215_v61 = vcombine.high %v11095_v36, %v11097_v37  ;;  %v9207_v16 = vld [vmem:[#allocation2 + $0x104] ss:$16 sps:$4 sm:$0xff]  }
 0x242   : > { %4900 = vmatprep.subr.bf16.mxu0 %v9080_v43  ;;  %v9144_v43 = vld [vmem:[%s10890_s19 + $0x630] ss:$8 sps:$4 sm:$0xff]  }
 0x244   : > { %1754 = vmatpush1.bf16.msra.mxu1 %v9074_v6  ;;  %v9147_v6 = vld [vmem:[%s10890_s19 + $0xf30] ss:$8 sps:$4 sm:$0xff]  }
 0x245   : > { %4901 = vmatpush1.bf16.msra.mxu0 %v9078_v62  ;;  %1755 = vmatprep.subr.bf16.mxu1 %v9085_v44  ;;  %v9152_v62 = vld [vmem:[%s10890_s19 + $0x644] ss:$8 sps:$4 sm:$0xff]  }
 0x246   : > { %4902 = vmatprep.subr.bf16.mxu0 %v9088_v39  ;;  %v9155_v44 = vld [vmem:[%s10890_s19 + $0xf44] ss:$8 sps:$4 sm:$0xff]   ;;  %v9150_v39 = vld [vmem:[%s10890_s19 + $0x640] ss:$8 sps:$4 sm:$0xff]  }
 0x248   : > { %1756 = vmatpush1.bf16.msra.mxu1 %v9083_v4  ;;  %v9213_v4 = vld [vmem:[#allocation2 + $0x100] ss:$16 sps:$4 sm:$0xff]  }
 0x249   : > { %4903 = vmatpush1.bf16.msra.mxu0 %v9086_v33  ;;  %1757 = vmatprep.subr.bf16.mxu1 %v9092_v48  ;;  %v7214_v33 = vcombine.low %v11095_v36, %v11097_v37  ;;  %v11111_v48 = vld [vmem:[#allocation2 + $0x68] sm:$0xff] }
 0x24a   : > { %4904 = vmatprep.subr.bf16.mxu0 %v9096_v34  ;;  %v1192_v34 = vld [vmem:[#allocation2 + $0x78] sm:$0xff] }
 0x24c   : > { %1758 = vmatpush1.bf16.msra.mxu1 %v9090_v45  ;;  %v9153_v45 = vld [vmem:[%s10890_s19 + $0xf40] ss:$8 sps:$4 sm:$0xff]  }
 0x24d   : > { %4905 = vmatpush1.bf16.msra.mxu0 %v9094_v19  ;;  %1759 = vmatprep.subr.bf16.mxu1 %v9101_v49  ;;  %v9158_v19 = vld [vmem:[%s10890_s19 + $0x654] ss:$8 sps:$4 sm:$0xff]  }
 0x24e   : > { %4906 = vmatprep.subr.bf16.mxu0 %v9104_v20  ;;  %v9161_v49 = vld [vmem:[%s10890_s19 + $0xf54] ss:$8 sps:$4 sm:$0xff]   ;;  %v7219_v20 = vcombine.high %v11111_v48, %v1192_v34 }
 0x250   : > { %1760 = vmatpush1.bf16.msra.mxu1 %v9099_v53  ;;  %v9224_v53 = vld [vmem:[#allocation2 + $0x124] ss:$16 sps:$4 sm:$0xff]  }
 0x251   : > { %4907 = vmatpush1.bf16.msra.mxu0 %v9102_v56  ;;  %1761 = vmatprep.subr.bf16.mxu1 %v9108_v57  ;;  %v9156_v56 = vld [vmem:[%s10890_s19 + $0x650] ss:$8 sps:$4 sm:$0xff]  }
 0x252   : > { %4908 = vmatprep.subr.bf16.mxu0 %v9112_v58  ;;  %v9159_v57 = vld [vmem:[%s10890_s19 + $0xf50] ss:$8 sps:$4 sm:$0xff]   ;;  %v9164_v58 = vld [vmem:[%s10890_s19 + $0x664] ss:$8 sps:$4 sm:$0xff]  }
 0x254   : > { %1762 = vmatpush1.bf16.msra.mxu1 %v9106_v59  ;;  %v9167_v59 = vld [vmem:[%s10890_s19 + $0xf64] ss:$8 sps:$4 sm:$0xff]  }
 0x255   : > { %4909 = vmatpush1.bf16.msra.mxu0 %v9110_v60  ;;  %1763 = vmatprep.subr.bf16.mxu1 %v9117_v63  ;;  %v9162_v60 = vld [vmem:[%s10890_s19 + $0x660] ss:$8 sps:$4 sm:$0xff]   ;;  %v7218_v63 = vcombine.low %v11111_v48, %v1192_v34  ;;  %v9219_v34 = vld [vmem:[%s10890_s19 + $0xfd4] ss:$8 sps:$4 sm:$0xff]  }
 0x256   : > { %4910 = vmatprep.subr.bf16.mxu0 %v9120_v0  ;;  %v9230_v0 = vld [vmem:[#allocation2 + $0x120] ss:$16 sps:$4 sm:$0xff]  }
 0x258   : > { %1764 = vmatpush1.bf16.msra.mxu1 %v9115_v1  ;;  %v9165_v1 = vld [vmem:[%s10890_s19 + $0xf60] ss:$8 sps:$4 sm:$0xff]  }
 0x259   : > { %4911 = vmatpush1.bf16.msra.mxu0 %v9118_v2  ;;  %2304 = vmatprep.subr.bf16.mxu1 %v9125_v8  ;;  %v9170_v2 = vld [vmem:[%s10890_s19 + $0x674] ss:$8 sps:$4 sm:$0xff]  }
 0x25a   : > { %4953 = vmatprep.subr.bf16.mxu0 %v9131_v9  ;;  %v9173_v8 = vld [vmem:[%s10890_s19 + $0xf74] ss:$8 sps:$4 sm:$0xff]  }
 0x25b   : > { %1766 = vmatmul.mubr.bf16.vlgmr.msra.gmra.mrb[0].mxu1 %v7206_v22  ;;  %v11126_v9 = vld [vmem:[#allocation2 + $0x10] sm:$0xff] }
 0x25c   : > { %4913 = vmatmul.mubr.bf16.vlgmr.msra.gmra.mrb[0].mxu0 %v9126_v21  ;;  %2305 = vmatpush1.bf16.msra.mxu1 %v9123_v12  ;;  %v7349_v12 = vcombine.high %v11126_v9, %v10958_v41  ;;  %v11130_v21 = vld [vmem:[#allocation2 + $0xc8] sm:$0xff] }
 0x25d   : > { %4954 = vmatpush1.bf16.msra.mxu0 %v9129_v25  ;;  %2306 = vmatprep.subr.bf16.mxu1 %v9134_v29  ;;  %v7927_v22 = vcombine.high %v11130_v21, %v10960_v11  ;;  %v9168_v25 = vld [vmem:[%s10890_s19 + $0x670] ss:$8 sps:$4 sm:$0xff]   ;;  %v9179_v41 = vld [vmem:[%s10890_s19 + $0xf84] ss:$8 sps:$4 sm:$0xff]   ;;  %v9174_v11 = vld [vmem:[%s10890_s19 + $0x680] ss:$8 sps:$4 sm:$0xff]  }
 0x25e   : > { %4955 = vmatprep.subr.bf16.mxu0 %v9137_v30  ;;  %1775 = vmatprep.mubr.bf16.mxu1 %v7211_v31  ;;  %v9171_v29 = vld [vmem:[%s10890_s19 + $0xf70] ss:$8 sps:$4 sm:$0xff]   ;;  %v9176_v30 = vld [vmem:[%s10890_s19 + $0x684] ss:$8 sps:$4 sm:$0xff]   ;;  %v9177_v31 = vld [vmem:[%s10890_s19 + $0xf80] ss:$8 sps:$4 sm:$0xff]  }
 0x25f   : > { %4922 = vmatprep.mubr.bf16.mxu0 %v9190_v15  ;;  %v9182_v15 = vld [vmem:[%s10890_s19 + $0x694] ss:$8 sps:$4 sm:$0xff]  }
 0x260   : > { %2307 = vmatpush1.bf16.msra.mxu1 %v9132_v17  ;;  %v9185_v17 = vld [vmem:[%s10890_s19 + $0xf94] ss:$8 sps:$4 sm:$0xff]  }
 0x261   : > { %4956 = vmatpush1.bf16.msra.mxu0 %v9135_v13  ;;  %2308 = vmatprep.subr.bf16.mxu1 %v9140_v10  ;;  %v9180_v13 = vld [vmem:[%s10890_s19 + $0x690] ss:$8 sps:$4 sm:$0xff]  }
 0x262   : > { %4957 = vmatprep.subr.bf16.mxu0 %v9143_v27  ;;  %v9183_v10 = vld [vmem:[%s10890_s19 + $0xf90] ss:$8 sps:$4 sm:$0xff]   ;;  %v9189_v27 = vld [vmem:[%s10890_s19 + $0x6a4] ss:$8 sps:$4 sm:$0xff]  }
 0x263   : > { %1776 = vmatmul.mubr.bf16.gmra.mrb[4].mxu1 %v7210_v35  ;;  %v9192_v35 = vld [vmem:[%s10890_s19 + $0xfa0] ss:$8 sps:$4 sm:$0xff]  }
 0x264   : > { %4923 = vmatmul.mubr.bf16.gmra.mrb[4].mxu0 %v9196_v55  ;;  %2309 = vmatpush1.bf16.msra.mxu1 %v9138_v54  ;;  %v9194_v54 = vld [vmem:[%s10890_s19 + $0xfa4] ss:$8 sps:$4 sm:$0xff]   ;;  %v9187_v55 = vld [vmem:[%s10890_s19 + $0x6a0] ss:$8 sps:$4 sm:$0xff]  }
 0x265   : > { %4958 = vmatpush1.bf16.msra.mxu0 %v9141_v42  ;;  %2310 = vmatprep.subr.bf16.mxu1 %v9146_v18  ;;  %v9199_v42 = vld [vmem:[%s10890_s19 + $0x6b4] ss:$8 sps:$4 sm:$0xff]   ;;  %v7355_v18 = vcombine.high %v11077_v24, %v11095_v36 }
 0x266   : > { %4959 = vmatprep.subr.bf16.mxu0 %v9149_v38  ;;  %1785 = vmatprep.mubr.bf16.mxu1 %v7215_v61  ;;  %v9202_v38 = vld [vmem:[%s10890_s19 + $0xfb4] ss:$8 sps:$4 sm:$0xff]   ;;  %v7354_v61 = vcombine.low %v11077_v24, %v11095_v36  ;;  %v5055_v24 = vld [vmem:[#allocation2 + $0x1a0] sm:$0xff] }
 0x267   : > { %4932 = vmatprep.mubr.bf16.mxu0 %v9207_v16  ;;  %v9197_v16 = vld [vmem:[%s10890_s19 + $0x6b0] ss:$8 sps:$4 sm:$0xff]  }
 0x268   : > { %2311 = vmatpush1.bf16.msra.mxu1 %v9144_v43  ;;  %v9200_v43 = vld [vmem:[%s10890_s19 + $0xfb0] ss:$8 sps:$4 sm:$0xff]  }
 0x269   : > { %4960 = vmatpush1.bf16.msra.mxu0 %v9147_v6  ;;  %2312 = vmatprep.subr.bf16.mxu1 %v9152_v62  ;;  %v9206_v6 = vld [vmem:[%s10890_s19 + $0x6c4] ss:$8 sps:$4 sm:$0xff]  }
 0x26a   : > { %4961 = vmatprep.subr.bf16.mxu0 %v9155_v44  ;;  %v9211_v62 = vld [vmem:[%s10890_s19 + $0xfc4] ss:$8 sps:$4 sm:$0xff]   ;;  %v9204_v44 = vld [vmem:[%s10890_s19 + $0x6c0] ss:$8 sps:$4 sm:$0xff]  }
 0x26b   : > { %1786 = vmatmul.mubr.bf16.gmra.mrb[8].mxu1 %v7214_v33  ;;  %v9216_v33 = vld [vmem:[%s10890_s19 + $0x6d4] ss:$8 sps:$4 sm:$0xff]  }
 0x26c   : > { %4933 = vmatmul.mubr.bf16.gmra.mrb[8].mxu0 %v9213_v4  ;;  %2313 = vmatpush1.bf16.msra.mxu1 %v9150_v39  ;;  %v9209_v39 = vld [vmem:[%s10890_s19 + $0xfc0] ss:$8 sps:$4 sm:$0xff]   ;;  %v7359_v4 = vcombine.high %v11097_v37, %v11111_v48 }
 0x26d   : > { %4962 = vmatpush1.bf16.msra.mxu0 %v9153_v45  ;;  %2314 = vmatprep.subr.bf16.mxu1 %v9158_v19  ;;  %v7358_v45 = vcombine.low %v11097_v37, %v11111_v48  ;;  %v9214_v19 = vld [vmem:[%s10890_s19 + $0x6d0] ss:$8 sps:$4 sm:$0xff]   ;;  %v9392_v48 = vld [vmem:[%s10890_s19 + $0x560] ss:$8 sps:$4 sm:$0xff]  }
 0x26e   : > { %4963 = vmatprep.subr.bf16.mxu0 %v9161_v49  ;;  %1795 = vmatprep.mubr.bf16.mxu1 %v7219_v20  ;;  %v9217_v49 = vld [vmem:[%s10890_s19 + $0xfd0] ss:$8 sps:$4 sm:$0xff]   ;;  %v9223_v20 = vld [vmem:[%s10890_s19 + $0x6e4] ss:$8 sps:$4 sm:$0xff]  }
 0x26f   : > { %4942 = vmatprep.mubr.bf16.mxu0 %v9224_v53  ;;  %v9228_v53 = vld [vmem:[%s10890_s19 + $0xfe4] ss:$8 sps:$4 sm:$0xff]   ;;  %v11316_v37 = vld [vmem:[#allocation2 + $0x158] sm:$0xff] }
 0x270   : > { %2315 = vmatpush1.bf16.msra.mxu1 %v9156_v56  ;;  %v9221_v56 = vld [vmem:[%s10890_s19 + $0x6e0] ss:$8 sps:$4 sm:$0xff]  }
 0x271   : > { %4964 = vmatpush1.bf16.msra.mxu0 %v9159_v57  ;;  %2316 = vmatprep.subr.bf16.mxu1 %v9164_v58  ;;  %v9226_v57 = vld [vmem:[%s10890_s19 + $0xfe0] ss:$8 sps:$4 sm:$0xff]   ;;  %v9233_v58 = vld [vmem:[%s10890_s19 + $0x6f4] ss:$8 sps:$4 sm:$0xff]  }
 0x272   : > { %4965 = vmatprep.subr.bf16.mxu0 %v9167_v59  ;;  %v9236_v59 = vld [vmem:[%s10890_s19 + $0xff4] ss:$8 sps:$4 sm:$0xff]  }
 0x273   : > { %1796 = vmatmul.mubr.bf16.gmra.mrb[12].mxu1 %v7218_v63  ;;  %v9234_v63 = vld [vmem:[%s10890_s19 + $0xff0] ss:$8 sps:$4 sm:$0xff]  }
 0x274   : > { %4943 = vmatmul.mubr.bf16.gmra.mrb[12].mxu0 %v9230_v0  ;;  %2317 = vmatpush1.bf16.msra.mxu1 %v9162_v60  ;;  %v9231_v60 = vld [vmem:[%s10890_s19 + $0x6f0] ss:$8 sps:$4 sm:$0xff]   ;;  %v9241_v0 = vld [vmem:[%s10890_s19 + $0x704] ss:$8 sps:$4 sm:$0xff]  }
 0x275   : > { %4966 = vmatpush1.bf16.msra.mxu0 %v9165_v1  ;;  %2318 = vmatprep.subr.bf16.mxu1 %v9170_v2  ;;  %v9246_v1 = vld [vmem:[%s10890_s19 + $0x404] ss:$8 sps:$4 sm:$0xff]  }
 0x276   : > { %4967 = vmatprep.subr.bf16.mxu0 %v9173_v8  ;;  %2336 = vmatprep.mubr.bf16.mxu1 %v7349_v12  ;;  %v9943_v2 = vld [vmem:[#allocation2 + $0x20] sm:$0xff] }
 0x277   : > { %4985 = vmatprep.mubr.bf16.mxu0 %v7927_v22  ;;  %v7348_v8 = vcombine.low %v11126_v9, %v9943_v2  ;;  %v9239_v12 = vld [vmem:[%s10890_s19 + $0x700] ss:$8 sps:$4 sm:$0xff]   ;;  %v9944_v22 = vld [vmem:[#allocation2 + $0xd8] sm:$0xff]  ;;  %v9291_v2 = vld [vmem:[%s10890_s19 + $0x784] ss:$8 sps:$4 sm:$0xff]  }
 0x278   : > { %2319 = vmatpush1.bf16.msra.mxu1 %v9168_v25  ;;  %v7926_v25 = vcombine.low %v11130_v21, %v9944_v22  ;;  %v9946_v9 = vld [vmem:[#allocation2 + $0xe8] sm:$0xff]  ;;  %v9247_v21 = vld [vmem:[%s10890_s19 + $0x710] ss:$8 sps:$4 sm:$0xff]  }
 0x279   : > { %4968 = vmatpush1.bf16.msra.mxu0 %v9171_v29  ;;  %2320 = vmatprep.subr.bf16.mxu1 %v9176_v30  ;;  %v9244_v29 = vld [vmem:[%s10890_s19 + $0x400] ss:$8 sps:$4 sm:$0xff]   ;;  %v9249_v30 = vld [vmem:[%s10890_s19 + $0x714] ss:$8 sps:$4 sm:$0xff]  }
 0x27a   : > { %4969 = vmatprep.subr.bf16.mxu0 %v9179_v41  ;;  %v9252_v41 = vld [vmem:[%s10890_s19 + $0x414] ss:$8 sps:$4 sm:$0xff]   ;;  %v9292_v22 = vld [vmem:[%s10890_s19 + $0x480] ss:$8 sps:$4 sm:$0xff]  }
 0x27c   : > { %2321 = vmatpush1.bf16.msra.mxu1 %v9174_v11  ;;  %v9945_v11 = vld [vmem:[#allocation2 + $0x30] sm:$0xff] }
 0x27d   : > { %4970 = vmatpush1.bf16.msra.mxu0 %v9177_v31  ;;  %2322 = vmatprep.subr.bf16.mxu1 %v9182_v15  ;;  %v7353_v31 = vcombine.high %v9945_v11, %v10976_v5  ;;  %v7931_v15 = vcombine.high %v9946_v9, %v10991_v40  ;;  %v9253_v5 = vld [vmem:[%s10890_s19 + $0x720] ss:$8 sps:$4 sm:$0xff]  }
 0x27e   : > { %4971 = vmatprep.subr.bf16.mxu0 %v9185_v17  ;;  %v9250_v17 = vld [vmem:[%s10890_s19 + $0x410] ss:$8 sps:$4 sm:$0xff]  }
 0x280   : > { %2323 = vmatpush1.bf16.msra.mxu1 %v9180_v13  ;;  %v9255_v13 = vld [vmem:[%s10890_s19 + $0x724] ss:$8 sps:$4 sm:$0xff]  }
 0x281   : > { %4972 = vmatpush1.bf16.msra.mxu0 %v9183_v10  ;;  %2324 = vmatprep.subr.bf16.mxu1 %v9189_v27  ;;  %v9258_v10 = vld [vmem:[%s10890_s19 + $0x424] ss:$8 sps:$4 sm:$0xff]  }
 0x282   : > { %4973 = vmatprep.subr.bf16.mxu0 %v9194_v54  ;;  %v9947_v27 = vld [vmem:[#allocation2 + $0x40] sm:$0xff] }
 0x283   : > { %v7352_v54 = vcombine.low %v9945_v11, %v9947_v27  ;;  %v9308_v11 = vld [vmem:[%s10890_s19 + $0x4a4] ss:$8 sps:$4 sm:$0xff]   ;;  %v9318_v27 = vld [vmem:[%s10890_s19 + $0x7c0] ss:$8 sps:$4 sm:$0xff]  }
 0x284   : > { %2325 = vmatpush1.bf16.msra.mxu1 %v9187_v55  ;;  %v7930_v55 = vcombine.low %v9946_v9, %v10991_v40  ;;  %v9270_v40 = vld [vmem:[%s10890_s19 + $0x444] ss:$8 sps:$4 sm:$0xff]   ;;  %v9306_v9 = vld [vmem:[%s10890_s19 + $0x4a0] ss:$8 sps:$4 sm:$0xff]  }
 0x285   : > { %4974 = vmatpush1.bf16.msra.mxu0 %v9192_v35  ;;  %2326 = vmatprep.subr.bf16.mxu1 %v9199_v42  ;;  %v9256_v35 = vld [vmem:[%s10890_s19 + $0x420] ss:$8 sps:$4 sm:$0xff]   ;;  %v9261_v42 = vld [vmem:[%s10890_s19 + $0x734] ss:$8 sps:$4 sm:$0xff]  }
 0x286   : > { %4975 = vmatprep.subr.bf16.mxu0 %v9202_v38  ;;  %v9264_v38 = vld [vmem:[%s10890_s19 + $0x434] ss:$8 sps:$4 sm:$0xff]  }
 0x288   : > { %2327 = vmatpush1.bf16.msra.mxu1 %v9197_v16  ;;  %v9259_v16 = vld [vmem:[%s10890_s19 + $0x730] ss:$8 sps:$4 sm:$0xff]  }
 0x289   : > { %4976 = vmatpush1.bf16.msra.mxu0 %v9200_v43  ;;  %2328 = vmatprep.subr.bf16.mxu1 %v9206_v6  ;;  %v9262_v43 = vld [vmem:[%s10890_s19 + $0x430] ss:$8 sps:$4 sm:$0xff]   ;;  %v9267_v6 = vld [vmem:[%s10890_s19 + $0x744] ss:$8 sps:$4 sm:$0xff]  }
 0x28a   : > { %4977 = vmatprep.subr.bf16.mxu0 %v9211_v62  ;;  %v9265_v62 = vld [vmem:[%s10890_s19 + $0x740] ss:$8 sps:$4 sm:$0xff]  }
 0x28c   : > { %2329 = vmatpush1.bf16.msra.mxu1 %v9204_v44  ;;  %v1837_v44 = vld [vmem:[#allocation2 + $0x80] sm:$0xff] }
 0x28d   : > { %4978 = vmatpush1.bf16.msra.mxu0 %v9209_v39  ;;  %2330 = vmatprep.subr.bf16.mxu1 %v9216_v33  ;;  %v4414_v39 = vld [vmem:[#allocation2 + $0x138] sm:$0xff]  ;;  %v9268_v33 = vld [vmem:[%s10890_s19 + $0x440] ss:$8 sps:$4 sm:$0xff]  }
 0x28e   : > { %4979 = vmatprep.subr.bf16.mxu0 %v9219_v34  ;;  %v9273_v34 = vld [vmem:[%s10890_s19 + $0x754] ss:$8 sps:$4 sm:$0xff]  }
 0x290   : > { %2331 = vmatpush1.bf16.msra.mxu1 %v9214_v19  ;;  %v9276_v19 = vld [vmem:[%s10890_s19 + $0x454] ss:$8 sps:$4 sm:$0xff]  }
 0x291   : > { %4980 = vmatpush1.bf16.msra.mxu0 %v9217_v49  ;;  %2332 = vmatprep.subr.bf16.mxu1 %v9223_v20  ;;  %v9948_v49 = vld [vmem:[#allocation2 + $0x70] sm:$0xff] }
 0x292   : > { %4981 = vmatprep.subr.bf16.mxu0 %v9228_v53  ;;  %v7361_v20 = vcombine.high %v9948_v49, %v1837_v44  ;;  %v9949_v53 = vld [vmem:[#allocation2 + $0x128] sm:$0xff]  ;;  %v7360_v3 = vcombine.low %v9948_v49, %v1837_v44  ;;  %v9348_v44 = vld [vmem:[%s10890_s19 + $0x4f4] ss:$8 sps:$4 sm:$0xff]  }
 0x293   : > { %v9351_v49 = vld [vmem:[%s10890_s19 + $0xc00] ss:$8 sps:$4 sm:$0xff]  }
 0x294   : > { %2333 = vmatpush1.bf16.msra.mxu1 %v9221_v56  ;;  %v9271_v56 = vld [vmem:[%s10890_s19 + $0x750] ss:$8 sps:$4 sm:$0xff]  }
 0x295   : > { %4982 = vmatpush1.bf16.msra.mxu0 %v9226_v57  ;;  %2334 = vmatprep.subr.bf16.mxu1 %v9233_v58  ;;  %v9279_v57 = vld [vmem:[%s10890_s19 + $0x764] ss:$8 sps:$4 sm:$0xff]  }
 0x296   : > { %4983 = vmatprep.subr.bf16.mxu0 %v9236_v59  ;;  %v9282_v58 = vld [vmem:[%s10890_s19 + $0x464] ss:$8 sps:$4 sm:$0xff]   ;;  %v9285_v59 = vld [vmem:[%s10890_s19 + $0x774] ss:$8 sps:$4 sm:$0xff]  }
 0x298   : > { %2335 = vmatpush1.bf16.msra.mxu1 %v9231_v60  ;;  %v9288_v60 = vld [vmem:[%s10890_s19 + $0x474] ss:$8 sps:$4 sm:$0xff]  }
 0x299   : > { %4984 = vmatpush1.bf16.msra.mxu0 %v9234_v63  ;;  %2377 = vmatprep.subr.bf16.mxu1 %v9241_v0  ;;  %v8069_v63 = vcombine.high %v11219_v51, %v11221_v7  ;;  %v9283_v0 = vld [vmem:[%s10890_s19 + $0x770] ss:$8 sps:$4 sm:$0xff]  }
 0x29a   : > { %5524 = vmatprep.subr.bf16.mxu0 %v9246_v1  ;;  %v9286_v1 = vld [vmem:[%s10890_s19 + $0x470] ss:$8 sps:$4 sm:$0xff]  }
 0x29b   : > { %2337 = vmatmul.mubr.bf16.vlgmr.msra.gmra.mrb[0].mxu1 %v7348_v8  ;;  %v9294_v8 = vld [vmem:[%s10890_s19 + $0x484] ss:$8 sps:$4 sm:$0xff]  }
 0x29c   : > { %4986 = vmatmul.mubr.bf16.vlgmr.msra.gmra.mrb[0].mxu0 %v7926_v25  ;;  %2378 = vmatpush1.bf16.msra.mxu1 %v9239_v12  ;;  %v9289_v12 = vld [vmem:[%s10890_s19 + $0x780] ss:$8 sps:$4 sm:$0xff]   ;;  %v9297_v25 = vld [vmem:[%s10890_s19 + $0x794] ss:$8 sps:$4 sm:$0xff]  }
 0x29d   : > { %5525 = vmatpush1.bf16.msra.mxu0 %v9244_v29  ;;  %2379 = vmatprep.subr.bf16.mxu1 %v9249_v30  ;;  %v9300_v29 = vld [vmem:[%s10890_s19 + $0x494] ss:$8 sps:$4 sm:$0xff]   ;;  %v9298_v30 = vld [vmem:[%s10890_s19 + $0x490] ss:$8 sps:$4 sm:$0xff]  }
 0x29e   : > { %5526 = vmatprep.subr.bf16.mxu0 %v9252_v41  ;;  %2346 = vmatprep.mubr.bf16.mxu1 %v7353_v31  ;;  %v9304_v41 = vld [vmem:[%s10890_s19 + $0x7a4] ss:$8 sps:$4 sm:$0xff]   ;;  %v9302_v31 = vld [vmem:[%s10890_s19 + $0x7a0] ss:$8 sps:$4 sm:$0xff]  }
 0x29f   : > { %4995 = vmatprep.mubr.bf16.mxu0 %v7931_v15  ;;  %v9313_v15 = vld [vmem:[%s10890_s19 + $0x7b4] ss:$8 sps:$4 sm:$0xff]  }
 0x2a0   : > { %2380 = vmatpush1.bf16.msra.mxu1 %v9247_v21  ;;  %v9316_v21 = vld [vmem:[%s10890_s19 + $0x4b4] ss:$8 sps:$4 sm:$0xff]  }
 0x2a1   : > { %5527 = vmatpush1.bf16.msra.mxu0 %v9250_v17  ;;  %2381 = vmatprep.subr.bf16.mxu1 %v9255_v13  ;;  %v9311_v17 = vld [vmem:[%s10890_s19 + $0x7b0] ss:$8 sps:$4 sm:$0xff]  }
 0x2a2   : > { %5528 = vmatprep.subr.bf16.mxu0 %v9258_v10  ;;  %v9314_v13 = vld [vmem:[%s10890_s19 + $0x4b0] ss:$8 sps:$4 sm:$0xff]   ;;  %v9320_v10 = vld [vmem:[%s10890_s19 + $0x7c4] ss:$8 sps:$4 sm:$0xff]  }
 0x2a3   : > { %2347 = vmatmul.mubr.bf16.gmra.mrb[4].mxu1 %v7352_v54  ;;  %v9322_v54 = vld [vmem:[%s10890_s19 + $0x4c0] ss:$8 sps:$4 sm:$0xff]  }
 0x2a4   : > { %4996 = vmatmul.mubr.bf16.gmra.mrb[4].mxu0 %v7930_v55  ;;  %2382 = vmatpush1.bf16.msra.mxu1 %v9253_v5  ;;  %v9324_v5 = vld [vmem:[%s10890_s19 + $0x4c4] ss:$8 sps:$4 sm:$0xff]   ;;  %v9329_v55 = vld [vmem:[%s10890_s19 + $0x7d4] ss:$8 sps:$4 sm:$0xff]  }
 0x2a5   : > { %5529 = vmatpush1.bf16.msra.mxu0 %v9256_v35  ;;  %2383 = vmatprep.subr.bf16.mxu1 %v9261_v42  ;;  %v9332_v35 = vld [vmem:[%s10890_s19 + $0x4d4] ss:$8 sps:$4 sm:$0xff]   ;;  %v9327_v42 = vld [vmem:[%s10890_s19 + $0x7d0] ss:$8 sps:$4 sm:$0xff]  }
 0x2a6   : > { %5530 = vmatprep.subr.bf16.mxu0 %v9264_v38  ;;  %2356 = vmatprep.mubr.bf16.mxu1 %v7357_v46  ;;  %v7939_v46 = vcombine.high %v9949_v53, %v4414_v39  ;;  %v9330_v38 = vld [vmem:[%s10890_s19 + $0x4d0] ss:$8 sps:$4 sm:$0xff]  }
 0x2a7   : > { %5005 = vmatprep.mubr.bf16.mxu0 %v7935_v50  ;;  %v9274_v50 = vld [vmem:[%s10890_s19 + $0x450] ss:$8 sps:$4 sm:$0xff]  }
 0x2a8   : > { %2384 = vmatpush1.bf16.msra.mxu1 %v9259_v16  ;;  %v9336_v16 = vld [vmem:[%s10890_s19 + $0x7e4] ss:$8 sps:$4 sm:$0xff]  }
 0x2a9   : > { %5531 = vmatpush1.bf16.msra.mxu0 %v9262_v43  ;;  %2385 = vmatprep.subr.bf16.mxu1 %v9267_v6  ;;  %v9340_v43 = vld [vmem:[%s10890_s19 + $0x4e4] ss:$8 sps:$4 sm:$0xff]   ;;  %v9334_v6 = vld [vmem:[%s10890_s19 + $0x7e0] ss:$8 sps:$4 sm:$0xff]  }
 0x2aa   : > { %5532 = vmatprep.subr.bf16.mxu0 %v9270_v40  ;;  %v9338_v40 = vld [vmem:[%s10890_s19 + $0x4e0] ss:$8 sps:$4 sm:$0xff]  }
 0x2ab   : > { %2357 = vmatmul.mubr.bf16.gmra.mrb[8].mxu1 %v7356_v47  ;;  %v7938_v47 = vcombine.low %v9949_v53, %v4414_v39  ;;  %v9343_v39 = vld [vmem:[%s10890_s19 + $0x7f0] ss:$8 sps:$4 sm:$0xff]   ;;  %v8068_v53 = vcombine.low %v11219_v51, %v11221_v7  ;;  %v9370_v7 = vld [vmem:[%s10890_s19 + $0x524] ss:$8 sps:$4 sm:$0xff]  }
 0x2ac   : > { %5006 = vmatmul.mubr.bf16.gmra.mrb[8].mxu0 %v7934_v52  ;;  %2386 = vmatpush1.bf16.msra.mxu1 %v9265_v62  ;;  %v9280_v52 = vld [vmem:[%s10890_s19 + $0x460] ss:$8 sps:$4 sm:$0xff]   ;;  %v9345_v62 = vld [vmem:[%s10890_s19 + $0x7f4] ss:$8 sps:$4 sm:$0xff]   ;;  %v9359_v51 = vld [vmem:[%s10890_s19 + $0xc10] ss:$8 sps:$4 sm:$0xff]  }
 0x2ad   : > { %5533 = vmatpush1.bf16.msra.mxu0 %v9268_v33  ;;  %2387 = vmatprep.subr.bf16.mxu1 %v9273_v34  ;;  %v9346_v33 = vld [vmem:[%s10890_s19 + $0x4f0] ss:$8 sps:$4 sm:$0xff]   ;;  %v9353_v34 = vld [vmem:[%s10890_s19 + $0xc04] ss:$8 sps:$4 sm:$0xff]  }
 0x2ae   : > { %5534 = vmatprep.subr.bf16.mxu0 %v9276_v19  ;;  %2366 = vmatprep.mubr.bf16.mxu1 %v7361_v20  ;;  %v9358_v19 = vld [vmem:[%s10890_s19 + $0x504] ss:$8 sps:$4 sm:$0xff]   ;;  %v9356_v20 = vld [vmem:[%s10890_s19 + $0x500] ss:$8 sps:$4 sm:$0xff]  }
 0x2af   : > { %5015 = vmatprep.mubr.bf16.mxu0 %v7939_v46  ;;  %v11272_v46 = vld [vmem:[#allocation2 + $0x160] sm:$0xff] }
 0x2b0   : > { %2388 = vmatpush1.bf16.msra.mxu1 %v9271_v56  ;;  %v5049_v56 = vld [vmem:[#allocation2 + $0x170] sm:$0xff] }
 0x2b1   : > { %5535 = vmatpush1.bf16.msra.mxu0 %v9274_v50  ;;  %2389 = vmatprep.subr.bf16.mxu1 %v9279_v57  ;;  %v9361_v50 = vld [vmem:[%s10890_s19 + $0xc14] ss:$8 sps:$4 sm:$0xff]   ;;  %v8072_v23 = vcombine.low %v11272_v46, %v5049_v56 }
 0x2b2   : > { %5536 = vmatprep.subr.bf16.mxu0 %v9282_v58  ;;  %v9364_v57 = vld [vmem:[%s10890_s19 + $0x514] ss:$8 sps:$4 sm:$0xff]   ;;  %v8073_v58 = vcombine.high %v11272_v46, %v5049_v56  ;;  %v9432_v56 = vld [vmem:[%s10890_s19 + $0xcc4] ss:$8 sps:$4 sm:$0xff]  }
 0x2b3   : > { %2367 = vmatmul.mubr.bf16.gmra.mrb[12].mxu1 %v7360_v3  ;;  %v9362_v3 = vld [vmem:[%s10890_s19 + $0x510] ss:$8 sps:$4 sm:$0xff]  }
 0x2b4   : > { %5016 = vmatmul.mubr.bf16.gmra.mrb[12].mxu0 %v7938_v47  ;;  %2390 = vmatpush1.bf16.msra.mxu1 %v9277_v14  ;;  %v9367_v47 = vld [vmem:[%s10890_s19 + $0xc24] ss:$8 sps:$4 sm:$0xff]   ;;  %v9365_v14 = vld [vmem:[%s10890_s19 + $0xc20] ss:$8 sps:$4 sm:$0xff]  }
 0x2b5   : > { %5537 = vmatpush1.bf16.msra.mxu0 %v9280_v52  ;;  %2391 = vmatprep.subr.bf16.mxu1 %v9285_v59  ;;  %v9368_v52 = vld [vmem:[%s10890_s19 + $0x520] ss:$8 sps:$4 sm:$0xff]   ;;  %v9373_v59 = vld [vmem:[%s10890_s19 + $0xc34] ss:$8 sps:$4 sm:$0xff]  }
 0x2b6   : > { %5538 = vmatprep.subr.bf16.mxu0 %v9288_v60  ;;  %2409 = vmatprep.mubr.bf16.mxu1 %v7351_v28  ;;  %v9295_v28 = vld [vmem:[%s10890_s19 + $0x790] ss:$8 sps:$4 sm:$0xff]   ;;  %v9376_v60 = vld [vmem:[%s10890_s19 + $0x534] ss:$8 sps:$4 sm:$0xff]  }
 0x2b7   : > { %5556 = vmatprep.mubr.bf16.mxu0 %v8069_v63 }
 0x2b8   : > { %2392 = vmatpush1.bf16.msra.mxu1 %v9283_v0  ;;  %v9371_v0 = vld [vmem:[%s10890_s19 + $0xc30] ss:$8 sps:$4 sm:$0xff]  }
 0x2b9   : > { %5539 = vmatpush1.bf16.msra.mxu0 %v9286_v1  ;;  %2393 = vmatprep.subr.bf16.mxu1 %v9291_v2  ;;  %v9374_v1 = vld [vmem:[%s10890_s19 + $0x530] ss:$8 sps:$4 sm:$0xff]   ;;  %v9382_v2 = vld [vmem:[%s10890_s19 + $0x544] ss:$8 sps:$4 sm:$0xff]  }
 0x2ba   : > { %5540 = vmatprep.subr.bf16.mxu0 %v9294_v8  ;;  %v1838_v8 = vld [vmem:[#allocation2 + $0x88] sm:$0xff] }
 0x2bc   : > { %2394 = vmatpush1.bf16.msra.mxu1 %v9289_v12  ;;  %v9377_v12 = vld [vmem:[%s10890_s19 + $0xc40] ss:$8 sps:$4 sm:$0xff]  }
 0x2bd   : > { %5541 = vmatpush1.bf16.msra.mxu0 %v9292_v22  ;;  %2395 = vmatprep.subr.bf16.mxu1 %v9297_v25  ;;  %v9380_v22 = vld [vmem:[%s10890_s19 + $0x540] ss:$8 sps:$4 sm:$0xff]   ;;  %v9385_v25 = vld [vmem:[%s10890_s19 + $0xc54] ss:$8 sps:$4 sm:$0xff]  }
 0x2be   : > { %5542 = vmatprep.subr.bf16.mxu0 %v9300_v29  ;;  %v9388_v29 = vld [vmem:[%s10890_s19 + $0x554] ss:$8 sps:$4 sm:$0xff]  }
 0x2c0   : > { %2396 = vmatpush1.bf16.msra.mxu1 %v9295_v28  ;;  %v9950_v28 = vld [vmem:[#allocation2 + $0x78] sm:$0xff] }
 0x2c1   : > { %5543 = vmatpush1.bf16.msra.mxu0 %v9298_v30  ;;  %2397 = vmatprep.subr.bf16.mxu1 %v9304_v41  ;;  %v9383_v41 = vld [vmem:[%s10890_s19 + $0xc50] ss:$8 sps:$4 sm:$0xff]  }
 0x2c2   : > { %5544 = vmatprep.subr.bf16.mxu0 %v9308_v11  ;;  %v9386_v11 = vld [vmem:[%s10890_s19 + $0x550] ss:$8 sps:$4 sm:$0xff]  }
 0x2c4   : > { %2398 = vmatpush1.bf16.msra.mxu1 %v9302_v31  ;;  %v9391_v31 = vld [vmem:[%s10890_s19 + $0xc64] ss:$8 sps:$4 sm:$0xff]  }
 0x2c5   : > { %5545 = vmatpush1.bf16.msra.mxu0 %v9306_v9  ;;  %2399 = vmatprep.subr.bf16.mxu1 %v9313_v15  ;;  %v9394_v9 = vld [vmem:[%s10890_s19 + $0x564] ss:$8 sps:$4 sm:$0xff]   ;;  %v9389_v15 = vld [vmem:[%s10890_s19 + $0xc60] ss:$8 sps:$4 sm:$0xff]  }
 0x2c6   : > { %5546 = vmatprep.subr.bf16.mxu0 %v9316_v21  ;;  %v7362_v21 = vcombine.low %v9950_v28, %v1838_v8 }
 0x2c8   : > { %2400 = vmatpush1.bf16.msra.mxu1 %v9311_v17 }
 0x2c9   : > { %5547 = vmatpush1.bf16.msra.mxu0 %v9314_v13  ;;  %2401 = vmatprep.subr.bf16.mxu1 %v9320_v10  ;;  %v11314_v13 = vld [vmem:[#allocation2 + $0x148] sm:$0xff]  ;;  %v9400_v10 = vld [vmem:[%s10890_s19 + $0x574] ss:$8 sps:$4 sm:$0xff]  }
 0x2ca   : > { %5548 = vmatprep.subr.bf16.mxu0 %v9324_v5  ;;  %v9463_v5 = vld [vmem:[#allocation2 + $0x24] ss:$16 sps:$4 sm:$0xff]  }
 0x2cc   : > { %2402 = vmatpush1.bf16.msra.mxu1 %v9318_v27  ;;  %v8071_v27 = vcombine.high %v11314_v13, %v11316_v37 }
 0x2cd   : > { %5549 = vmatpush1.bf16.msra.mxu0 %v9322_v54  ;;  %2403 = vmatprep.subr.bf16.mxu1 %v9329_v55  ;;  %v9395_v54 = vld [vmem:[%s10890_s19 + $0xc70] ss:$8 sps:$4 sm:$0xff]  }
 0x2ce   : > { %5550 = vmatprep.subr.bf16.mxu0 %v9332_v35  ;;  %v9398_v55 = vld [vmem:[%s10890_s19 + $0x570] ss:$8 sps:$4 sm:$0xff]   ;;  %v9403_v35 = vld [vmem:[%s10890_s19 + $0xc84] ss:$8 sps:$4 sm:$0xff]  }
 0x2d0   : > { %2404 = vmatpush1.bf16.msra.mxu1 %v9327_v42  ;;  %v9406_v42 = vld [vmem:[%s10890_s19 + $0x584] ss:$8 sps:$4 sm:$0xff]  }
 0x2d1   : > { %5551 = vmatpush1.bf16.msra.mxu0 %v9330_v38  ;;  %2405 = vmatprep.subr.bf16.mxu1 %v9336_v16  ;;  %v9401_v38 = vld [vmem:[%s10890_s19 + $0xc80] ss:$8 sps:$4 sm:$0xff]  }
 0x2d2   : > { %5552 = vmatprep.subr.bf16.mxu0 %v9340_v43  ;;  %v9404_v16 = vld [vmem:[%s10890_s19 + $0x580] ss:$8 sps:$4 sm:$0xff]   ;;  %v9409_v43 = vld [vmem:[%s10890_s19 + $0xc94] ss:$8 sps:$4 sm:$0xff]  }
 0x2d4   : > { %2406 = vmatpush1.bf16.msra.mxu1 %v9334_v6  ;;  %v9412_v6 = vld [vmem:[%s10890_s19 + $0x594] ss:$8 sps:$4 sm:$0xff]  }
 0x2d5   : > { %5553 = vmatpush1.bf16.msra.mxu0 %v9338_v40  ;;  %2407 = vmatprep.subr.bf16.mxu1 %v9345_v62  ;;  %v9407_v40 = vld [vmem:[%s10890_s19 + $0xc90] ss:$8 sps:$4 sm:$0xff]  }
 0x2d6   : > { %5554 = vmatprep.subr.bf16.mxu0 %v9348_v44  ;;  %v9410_v62 = vld [vmem:[%s10890_s19 + $0x590] ss:$8 sps:$4 sm:$0xff]   ;;  %v9416_v44 = vld [vmem:[%s10890_s19 + $0xca4] ss:$8 sps:$4 sm:$0xff]  }
 0x2d8   : > { %2408 = vmatpush1.bf16.msra.mxu1 %v9343_v39  ;;  %v9420_v39 = vld [vmem:[%s10890_s19 + $0x5a4] ss:$8 sps:$4 sm:$0xff]  }
 0x2d9   : > { %5555 = vmatpush1.bf16.msra.mxu0 %v9346_v33  ;;  %2948 = vmatprep.subr.bf16.mxu1 %v9353_v34  ;;  %v9414_v33 = vld [vmem:[%s10890_s19 + $0xca0] ss:$8 sps:$4 sm:$0xff]  }
 0x2da   : > { %5597 = vmatprep.subr.bf16.mxu0 %v9358_v19  ;;  %v9418_v34 = vld [vmem:[%s10890_s19 + $0x5a0] ss:$8 sps:$4 sm:$0xff]   ;;  %v9425_v19 = vld [vmem:[%s10890_s19 + $0xcb4] ss:$8 sps:$4 sm:$0xff]  }
 0x2db   : > { %2410 = vmatmul.mubr.bf16.vlgmr.msra.gmra.mrb[0].mxu1 %v7350_v26  ;;  %v5053_v26 = vld [vmem:[#allocation2 + $0x190] sm:$0xff] }
 0x2dc   : > { %5557 = vmatmul.mubr.bf16.vlgmr.msra.gmra.mrb[0].mxu0 %v8068_v53  ;;  %2949 = vmatpush1.bf16.msra.mxu1 %v9351_v49  ;;  %v8077_v63 = vcombine.high %v5051_v32, %v5053_v26  ;;  %v8076_v36 = vcombine.low %v5051_v32, %v5053_v26  ;;  %v9428_v49 = vld [vmem:[%s10890_s19 + $0x5b4] ss:$8 sps:$4 sm:$0xff]   ;;  %v9426_v53 = vld [vmem:[%s10890_s19 + $0x5b0] ss:$8 sps:$4 sm:$0xff]   ;;  %v9452_v32 = vld [vmem:[%s10890_s19 + $0x5e4] ss:$8 sps:$4 sm:$0xff]  }
 0x2dd   : > { %5598 = vmatpush1.bf16.msra.mxu0 %v9356_v20  ;;  %2950 = vmatprep.subr.bf16.mxu1 %v9361_v50  ;;  %v9423_v20 = vld [vmem:[%s10890_s19 + $0xcb0] ss:$8 sps:$4 sm:$0xff]   ;;  %v9436_v50 = vld [vmem:[%s10890_s19 + $0x5c4] ss:$8 sps:$4 sm:$0xff]   ;;  %v9450_v26 = vld [vmem:[%s10890_s19 + $0x5e0] ss:$8 sps:$4 sm:$0xff]  }
 0x2de   : > { %5599 = vmatprep.subr.bf16.mxu0 %v9364_v57  ;;  %2419 = vmatprep.mubr.bf16.mxu1 %v7355_v18  ;;  %v9379_v18 = vld [vmem:[%s10890_s19 + $0xc44] ss:$8 sps:$4 sm:$0xff]   ;;  %v9430_v57 = vld [vmem:[%s10890_s19 + $0xcc0] ss:$8 sps:$4 sm:$0xff]  }
 0x2df   : > { %5566 = vmatprep.mubr.bf16.mxu0 %v8073_v58  ;;  %v9434_v58 = vld [vmem:[%s10890_s19 + $0x5c0] ss:$8 sps:$4 sm:$0xff]  }
 0x2e0   : > { %2951 = vmatpush1.bf16.msra.mxu1 %v9359_v51  ;;  %v9441_v51 = vld [vmem:[%s10890_s19 + $0xcd4] ss:$8 sps:$4 sm:$0xff]  }
 0x2e1   : > { %5600 = vmatpush1.bf16.msra.mxu0 %v9362_v3  ;;  %2952 = vmatprep.subr.bf16.mxu1 %v9367_v47  ;;  %v9444_v3 = vld [vmem:[%s10890_s19 + $0x5d4] ss:$8 sps:$4 sm:$0xff]   ;;  %v9439_v47 = vld [vmem:[%s10890_s19 + $0xcd0] ss:$8 sps:$4 sm:$0xff]  }
 0x2e2   : > { %5601 = vmatprep.subr.bf16.mxu0 %v9370_v7  ;;  %v9442_v7 = vld [vmem:[%s10890_s19 + $0x5d0] ss:$8 sps:$4 sm:$0xff]  }
 0x2e3   : > { %2420 = vmatmul.mubr.bf16.gmra.mrb[4].mxu1 %v7354_v61  ;;  %v5057_v61 = vld [vmem:[#allocation2 + $0x1b0] sm:$0xff] }
 0x2e4   : > { %5567 = vmatmul.mubr.bf16.gmra.mrb[4].mxu0 %v8072_v23  ;;  %2953 = vmatpush1.bf16.msra.mxu1 %v9365_v14  ;;  %v8081_v30 = vcombine.high %v5055_v24, %v5057_v61  ;;  %v8080_v17 = vcombine.low %v5055_v24, %v5057_v61  ;;  %v9448_v14 = vld [vmem:[%s10890_s19 + $0xce4] ss:$8 sps:$4 sm:$0xff]   ;;  %v9446_v23 = vld [vmem:[%s10890_s19 + $0xce0] ss:$8 sps:$4 sm:$0xff]  }
 0x2e5   : > { %5602 = vmatpush1.bf16.msra.mxu0 %v9368_v52  ;;  %2954 = vmatprep.subr.bf16.mxu1 %v9373_v59  ;;  %v9457_v52 = vld [vmem:[%s10890_s19 + $0xcf4] ss:$8 sps:$4 sm:$0xff]   ;;  %v11362_v24 = vld [vmem:[#allocation2 + $0x168] sm:$0xff] }
 0x2e6   : > { %5603 = vmatprep.subr.bf16.mxu0 %v9376_v60  ;;  %2429 = vmatprep.mubr.bf16.mxu1 %v7359_v4  ;;  %v7363_v4 = vcombine.high %v9950_v28, %v1838_v8  ;;  %v9460_v59 = vld [vmem:[%s10890_s19 + $0x5f4] ss:$8 sps:$4 sm:$0xff]   ;;  %v9455_v60 = vld [vmem:[%s10890_s19 + $0xcf0] ss:$8 sps:$4 sm:$0xff]   ;;  %v8070_v8 = vcombine.low %v11314_v13, %v11316_v37  ;;  %v9469_v61 = vld [vmem:[%s10890_s19 + $0xa00] ss:$8 sps:$4 sm:$0xff]  }
 0x2e7   : > { %5576 = vmatprep.mubr.bf16.mxu0 %v8077_v63  ;;  %v9458_v63 = vld [vmem:[%s10890_s19 + $0x5f0] ss:$8 sps:$4 sm:$0xff]   ;;  %v9486_v13 = vld [vmem:[%s10890_s19 + $0xd34] ss:$8 sps:$4 sm:$0xff]  }
 0x2e8   : > { %2955 = vmatpush1.bf16.msra.mxu1 %v9371_v0  ;;  %v9466_v0 = vld [vmem:[%s10890_s19 + $0xd04] ss:$8 sps:$4 sm:$0xff]   ;;  %v9472_v28 = vld [vmem:[%s10890_s19 + $0xd10] ss:$8 sps:$4 sm:$0xff]   ;;  %v9489_v37 = vld [vmem:[%s10890_s19 + $0xa34] ss:$8 sps:$4 sm:$0xff]  }
 0x2e9   : > { %5604 = vmatpush1.bf16.msra.mxu0 %v9374_v1  ;;  %2956 = vmatprep.subr.bf16.mxu1 %v9379_v18  ;;  %v9471_v1 = vld [vmem:[%s10890_s19 + $0xa04] ss:$8 sps:$4 sm:$0xff]   ;;  %v9461_v18 = vld [vmem:[#allocation2 + $0x20] ss:$16 sps:$4 sm:$0xff]  }
 0x2ea   : > { %5605 = vmatprep.subr.bf16.mxu0 %v9382_v2  ;;  %v9464_v2 = vld [vmem:[%s10890_s19 + $0xd00] ss:$8 sps:$4 sm:$0xff]  }
 0x2eb   : > { %2430 = vmatmul.mubr.bf16.gmra.mrb[8].mxu1 %v7358_v45  ;;  %v9397_v45 = vld [vmem:[%s10890_s19 + $0xc74] ss:$8 sps:$4 sm:$0xff]  }
 0x2ec   : > { %5577 = vmatmul.mubr.bf16.gmra.mrb[8].mxu0 %v8076_v36  ;;  %2957 = vmatpush1.bf16.msra.mxu1 %v9377_v12  ;;  %v11364_v36 = vld [vmem:[#allocation2 + $0x178] sm:$0xff] }
 0x2ed   : > { %5606 = vmatpush1.bf16.msra.mxu0 %v9380_v22  ;;  %2958 = vmatprep.subr.bf16.mxu1 %v9385_v25  ;;  %v9474_v12 = vld [vmem:[%s10890_s19 + $0xd14] ss:$8 sps:$4 sm:$0xff]  }
 0x2ee   : > { %5607 = vmatprep.subr.bf16.mxu0 %v9388_v29  ;;  %2439 = vmatprep.mubr.bf16.mxu1 %v7363_v4  ;;  %v9477_v22 = vld [vmem:[%s10890_s19 + $0xa14] ss:$8 sps:$4 sm:$0xff]   ;;  %v8075_v29 = vcombine.high %v11362_v24, %v11364_v36  ;;  %v9475_v4 = vld [vmem:[%s10890_s19 + $0xa10] ss:$8 sps:$4 sm:$0xff]  }
 0x2ef   : > { %5586 = vmatprep.mubr.bf16.mxu0 %v8081_v30  ;;  %v9526_v25 = vld [vmem:[#allocation2 + $0x44] ss:$16 sps:$4 sm:$0xff]  }
 0x2f0   : > { %2959 = vmatpush1.bf16.msra.mxu1 %v9383_v41  ;;  %v9480_v30 = vld [vmem:[%s10890_s19 + $0xd24] ss:$8 sps:$4 sm:$0xff]  }
 0x2f1   : > { %5608 = vmatpush1.bf16.msra.mxu0 %v9386_v11  ;;  %2960 = vmatprep.subr.bf16.mxu1 %v9391_v31  ;;  %v9483_v41 = vld [vmem:[%s10890_s19 + $0xa24] ss:$8 sps:$4 sm:$0xff]   ;;  %v9478_v11 = vld [vmem:[%s10890_s19 + $0xd20] ss:$8 sps:$4 sm:$0xff]  }
 0x2f2   : > { %5609 = vmatprep.subr.bf16.mxu0 %v9394_v9  ;;  %v9535_v31 = vld [vmem:[#allocation2 + $0x40] ss:$16 sps:$4 sm:$0xff]   ;;  %v8074_v9 = vcombine.low %v11362_v24, %v11364_v36 }
 0x2f3   : > { %2440 = vmatmul.mubr.bf16.gmra.mrb[12].mxu1 %v7362_v21  ;;  %v11380_v21 = vld [vmem:[#allocation2 + $0x198] sm:$0xff] }
 0x2f4   : > { %5587 = vmatmul.mubr.bf16.gmra.mrb[12].mxu0 %v8080_v17  ;;  %2961 = vmatpush1.bf16.msra.mxu1 %v9389_v15  ;;  %v11378_v15 = vld [vmem:[#allocation2 + $0x188] sm:$0xff] }
 0x2f5   : > { %5610 = vmatpush1.bf16.msra.mxu0 %v9392_v48  ;;  %2962 = vmatprep.subr.bf16.mxu1 %v9397_v45  ;;  %v9481_v17 = vld [vmem:[%s10890_s19 + $0xa20] ss:$8 sps:$4 sm:$0xff]   ;;  %v9543_v48 = vld [vmem:[#allocation2 + $0x64] ss:$16 sps:$4 sm:$0xff]   ;;  %v8079_v45 = vcombine.high %v11378_v15, %v11380_v21 }
 0x2f6   : > { %5611 = vmatprep.subr.bf16.mxu0 %v9400_v10  ;;  %2980 = vmatprep.mubr.bf16.mxu1 %v9463_v5  ;;  %v9484_v10 = vld [vmem:[%s10890_s19 + $0xd30] ss:$8 sps:$4 sm:$0xff]  }
 0x2f7   : > { %5629 = vmatprep.mubr.bf16.mxu0 %v8071_v27  ;;  %v9487_v5 = vld [vmem:[%s10890_s19 + $0xa30] ss:$8 sps:$4 sm:$0xff]   ;;  %v9492_v27 = vld [vmem:[%s10890_s19 + $0xd44] ss:$8 sps:$4 sm:$0xff]  }
 0x2f8   : > { %2963 = vmatpush1.bf16.msra.mxu1 %v9395_v54  ;;  %v9495_v54 = vld [vmem:[%s10890_s19 + $0xa44] ss:$8 sps:$4 sm:$0xff]  }
 0x2f9   : > { %5612 = vmatpush1.bf16.msra.mxu0 %v9398_v55  ;;  %2964 = vmatprep.subr.bf16.mxu1 %v9403_v35  ;;  %v9552_v55 = vld [vmem:[#allocation2 + $0x60] ss:$16 sps:$4 sm:$0xff]  }
 0x2fa   : > { %5613 = vmatprep.subr.bf16.mxu0 %v9406_v42  ;;  %v9490_v35 = vld [vmem:[%s10890_s19 + $0xd40] ss:$8 sps:$4 sm:$0xff]   ;;  %v2481_v42 = vld [vmem:[#allocation2 + $0x90] sm:$0xff] }
 0x2fc   : > { %2965 = vmatpush1.bf16.msra.mxu1 %v9401_v38  ;;  %v8078_v38 = vcombine.low %v11378_v15, %v11380_v21 }
 0x2fd   : > { %5614 = vmatpush1.bf16.msra.mxu0 %v9404_v16  ;;  %2966 = vmatprep.subr.bf16.mxu1 %v9409_v43  ;;  %v11394_v16 = vld [vmem:[#allocation2 + $0x1a8] sm:$0xff]  ;;  %v11396_v43 = vld [vmem:[#allocation2 + $0x1b8] sm:$0xff] }
 0x2fe   : > { %5615 = vmatprep.subr.bf16.mxu0 %v9412_v6  ;;  %v9493_v6 = vld [vmem:[%s10890_s19 + $0xa40] ss:$8 sps:$4 sm:$0xff]  }
 0x300   : > { %2967 = vmatpush1.bf16.msra.mxu1 %v9407_v40  ;;  %v9498_v40 = vld [vmem:[%s10890_s19 + $0xd54] ss:$8 sps:$4 sm:$0xff]  }
 0x301   : > { %5616 = vmatpush1.bf16.msra.mxu0 %v9410_v62  ;;  %2968 = vmatprep.subr.bf16.mxu1 %v9416_v44  ;;  %v9501_v62 = vld [vmem:[%s10890_s19 + $0xa54] ss:$8 sps:$4 sm:$0xff]   ;;  %v9951_v44 = vld [vmem:[#allocation2 + $0x80] sm:$0xff] }
 0x302   : > { %5617 = vmatprep.subr.bf16.mxu0 %v9420_v39  ;;  %v7505_v39 = vcombine.high %v9951_v44, %v2481_v42 }
 0x304   : > { %2969 = vmatpush1.bf16.msra.mxu1 %v9414_v33  ;;  %v8083_v33 = vcombine.high %v11394_v16, %v11396_v43 }
 0x305   : > { %5618 = vmatpush1.bf16.msra.mxu0 %v9418_v34  ;;  %2970 = vmatprep.subr.bf16.mxu1 %v9425_v19  ;;  %v9496_v34 = vld [vmem:[%s10890_s19 + $0xd50] ss:$8 sps:$4 sm:$0xff]  }
 0x306   : > { %5619 = vmatprep.subr.bf16.mxu0 %v9428_v49  ;;  %v9499_v19 = vld [vmem:[%s10890_s19 + $0xa50] ss:$8 sps:$4 sm:$0xff]   ;;  %v9504_v49 = vld [vmem:[%s10890_s19 + $0xd64] ss:$8 sps:$4 sm:$0xff]  }
 0x308   : > { %2971 = vmatpush1.bf16.msra.mxu1 %v9423_v20  ;;  %v9507_v20 = vld [vmem:[%s10890_s19 + $0xa64] ss:$8 sps:$4 sm:$0xff]  }
 0x309   : > { %5620 = vmatpush1.bf16.msra.mxu0 %v9426_v53  ;;  %2972 = vmatprep.subr.bf16.mxu1 %v9432_v56  ;;  %v9502_v53 = vld [vmem:[%s10890_s19 + $0xd60] ss:$8 sps:$4 sm:$0xff]   ;;  %v7504_v56 = vcombine.low %v9951_v44, %v2481_v42  ;;  %v9592_v44 = vld [vmem:[%s10890_s19 + $0xb14] ss:$8 sps:$4 sm:$0xff]  }
 0x30a   : > { %5621 = vmatprep.subr.bf16.mxu0 %v9436_v50  ;;  %v8082_v50 = vcombine.low %v11394_v16, %v11396_v43  ;;  %v9953_v42 = vld [vmem:[#allocation2 + $0x160] sm:$0xff] }
 0x30c   : > { %2973 = vmatpush1.bf16.msra.mxu1 %v9430_v57  ;;  %v9505_v57 = vld [vmem:[%s10890_s19 + $0xa60] ss:$8 sps:$4 sm:$0xff]  }
 0x30d   : > { %5622 = vmatpush1.bf16.msra.mxu0 %v9434_v58  ;;  %2974 = vmatprep.subr.bf16.mxu1 %v9441_v51  ;;  %v9510_v58 = vld [vmem:[%s10890_s19 + $0xd74] ss:$8 sps:$4 sm:$0xff]  }
 0x30e   : > { %5623 = vmatprep.subr.bf16.mxu0 %v9444_v3  ;;  %v9513_v51 = vld [vmem:[%s10890_s19 + $0xa74] ss:$8 sps:$4 sm:$0xff]  }
 0x30f   : > { %v9578_v3 = vld [vmem:[#allocation2 + $0x2c] ss:$16 sps:$4 sm:$0xff]  }
 0x310   : > { %2975 = vmatpush1.bf16.msra.mxu1 %v9439_v47  ;;  %v11413_v47 = vld [vmem:[#allocation2 + $0x150] sm:$0xff] }
 0x311   : > { %5624 = vmatpush1.bf16.msra.mxu0 %v9442_v7  ;;  %2976 = vmatprep.subr.bf16.mxu1 %v9448_v14  ;;  %v8213_v7 = vcombine.high %v11413_v47, %v11272_v46  ;;  %v9508_v14 = vld [vmem:[%s10890_s19 + $0xd70] ss:$8 sps:$4 sm:$0xff]   ;;  %v9514_v46 = vld [vmem:[%s10890_s19 + $0xd80] ss:$8 sps:$4 sm:$0xff]  }
 0x312   : > { %5625 = vmatprep.subr.bf16.mxu0 %v9452_v32  ;;  %v9511_v32 = vld [vmem:[%s10890_s19 + $0xa70] ss:$8 sps:$4 sm:$0xff]  }
 0x314   : > { %2977 = vmatpush1.bf16.msra.mxu1 %v9446_v23  ;;  %v9516_v23 = vld [vmem:[%s10890_s19 + $0xd84] ss:$8 sps:$4 sm:$0xff]  }
 0x315   : > { %5626 = vmatpush1.bf16.msra.mxu0 %v9450_v26  ;;  %2978 = vmatprep.subr.bf16.mxu1 %v9457_v52  ;;  %v9519_v26 = vld [vmem:[%s10890_s19 + $0xa84] ss:$8 sps:$4 sm:$0xff]   ;;  %v9517_v52 = vld [vmem:[%s10890_s19 + $0xa80] ss:$8 sps:$4 sm:$0xff]  }
 0x316   : > { %5627 = vmatprep.subr.bf16.mxu0 %v9460_v59  ;;  %v9522_v59 = vld [vmem:[%s10890_s19 + $0xd94] ss:$8 sps:$4 sm:$0xff]  }
 0x318   : > { %2979 = vmatpush1.bf16.msra.mxu1 %v9455_v60  ;;  %v9525_v60 = vld [vmem:[%s10890_s19 + $0xa94] ss:$8 sps:$4 sm:$0xff]  }
 0x319   : > { %5628 = vmatpush1.bf16.msra.mxu0 %v9458_v63  ;;  %3021 = vmatprep.subr.bf16.mxu1 %v9466_v0  ;;  %v9520_v63 = vld [vmem:[%s10890_s19 + $0xd90] ss:$8 sps:$4 sm:$0xff]  }
 0x31a   : > { %6168 = vmatprep.subr.bf16.mxu0 %v9471_v1  ;;  %v9523_v0 = vld [vmem:[%s10890_s19 + $0xa90] ss:$8 sps:$4 sm:$0xff]   ;;  %v9530_v1 = vld [vmem:[%s10890_s19 + $0xda4] ss:$8 sps:$4 sm:$0xff]  }
 0x31b   : > { %2981 = vmatmul.mubr.bf16.vlgmr.msra.gmra.mrb[0].mxu1 %v9461_v18  ;;  %v9534_v18 = vld [vmem:[%s10890_s19 + $0xaa4] ss:$8 sps:$4 sm:$0xff]  }
 0x31c   : > { %5630 = vmatmul.mubr.bf16.vlgmr.msra.gmra.mrb[0].mxu0 %v8070_v8  ;;  %3022 = vmatpush1.bf16.msra.mxu1 %v9464_v2  ;;  %v9528_v2 = vld [vmem:[%s10890_s19 + $0xda0] ss:$8 sps:$4 sm:$0xff]  }
 0x31d   : > { %6169 = vmatpush1.bf16.msra.mxu0 %v9469_v61  ;;  %3023 = vmatprep.subr.bf16.mxu1 %v9474_v12  ;;  %v9532_v8 = vld [vmem:[%s10890_s19 + $0xaa0] ss:$8 sps:$4 sm:$0xff]   ;;  %v9539_v61 = vld [vmem:[%s10890_s19 + $0xdb4] ss:$8 sps:$4 sm:$0xff]  }
 0x31e   : > { %6170 = vmatprep.subr.bf16.mxu0 %v9477_v22  ;;  %2990 = vmatprep.mubr.bf16.mxu1 %v9526_v25  ;;  %v9542_v12 = vld [vmem:[%s10890_s19 + $0xab4] ss:$8 sps:$4 sm:$0xff]   ;;  %v9537_v22 = vld [vmem:[%s10890_s19 + $0xdb0] ss:$8 sps:$4 sm:$0xff]  }
 0x31f   : > { %5639 = vmatprep.mubr.bf16.mxu0 %v8075_v29  ;;  %v9540_v25 = vld [vmem:[%s10890_s19 + $0xab0] ss:$8 sps:$4 sm:$0xff]   ;;  %v9547_v29 = vld [vmem:[%s10890_s19 + $0xdc4] ss:$8 sps:$4 sm:$0xff]  }
 0x320   : > { %3024 = vmatpush1.bf16.msra.mxu1 %v9472_v28  ;;  %v9551_v28 = vld [vmem:[%s10890_s19 + $0xac4] ss:$8 sps:$4 sm:$0xff]  }
 0x321   : > { %6171 = vmatpush1.bf16.msra.mxu0 %v9475_v4  ;;  %3025 = vmatprep.subr.bf16.mxu1 %v9480_v30  ;;  %v9545_v4 = vld [vmem:[%s10890_s19 + $0xdc0] ss:$8 sps:$4 sm:$0xff]  }
 0x322   : > { %6172 = vmatprep.subr.bf16.mxu0 %v9483_v41  ;;  %v9549_v30 = vld [vmem:[%s10890_s19 + $0xac0] ss:$8 sps:$4 sm:$0xff]   ;;  %v9556_v41 = vld [vmem:[%s10890_s19 + $0xdd4] ss:$8 sps:$4 sm:$0xff]  }
 0x323   : > { %2991 = vmatmul.mubr.bf16.gmra.mrb[4].mxu1 %v9535_v31  ;;  %v9554_v31 = vld [vmem:[%s10890_s19 + $0xdd0] ss:$8 sps:$4 sm:$0xff]  }
 0x324   : > { %5640 = vmatmul.mubr.bf16.gmra.mrb[4].mxu0 %v8074_v9  ;;  %3026 = vmatpush1.bf16.msra.mxu1 %v9478_v11  ;;  %v9559_v11 = vld [vmem:[%s10890_s19 + $0xad4] ss:$8 sps:$4 sm:$0xff]   ;;  %v9557_v9 = vld [vmem:[%s10890_s19 + $0xad0] ss:$8 sps:$4 sm:$0xff]  }
 0x325   : > { %6173 = vmatpush1.bf16.msra.mxu0 %v9481_v17  ;;  %3027 = vmatprep.subr.bf16.mxu1 %v9486_v13  ;;  %v9563_v17 = vld [vmem:[%s10890_s19 + $0xde4] ss:$8 sps:$4 sm:$0xff]  }
 0x326   : > { %6174 = vmatprep.subr.bf16.mxu0 %v9489_v37  ;;  %3000 = vmatprep.mubr.bf16.mxu1 %v9543_v48  ;;  %v9567_v13 = vld [vmem:[%s10890_s19 + $0xae4] ss:$8 sps:$4 sm:$0xff]   ;;  %v9561_v37 = vld [vmem:[%s10890_s19 + $0xde0] ss:$8 sps:$4 sm:$0xff]  }
 0x327   : > { %5649 = vmatprep.mubr.bf16.mxu0 %v8079_v45  ;;  %v9565_v48 = vld [vmem:[%s10890_s19 + $0xae0] ss:$8 sps:$4 sm:$0xff]   ;;  %v9572_v45 = vld [vmem:[%s10890_s19 + $0xdf4] ss:$8 sps:$4 sm:$0xff]  }
 0x328   : > { %3028 = vmatpush1.bf16.msra.mxu1 %v9484_v10  ;;  %v9575_v10 = vld [vmem:[%s10890_s19 + $0xaf4] ss:$8 sps:$4 sm:$0xff]  }
 0x329   : > { %6175 = vmatpush1.bf16.msra.mxu0 %v9487_v5  ;;  %3029 = vmatprep.subr.bf16.mxu1 %v9492_v27  ;;  %v9570_v5 = vld [vmem:[%s10890_s19 + $0xdf0] ss:$8 sps:$4 sm:$0xff]  }
 0x32a   : > { %6176 = vmatprep.subr.bf16.mxu0 %v9495_v54  ;;  %v9573_v27 = vld [vmem:[%s10890_s19 + $0xaf0] ss:$8 sps:$4 sm:$0xff]  }
 0x32b   : > { %3001 = vmatmul.mubr.bf16.gmra.mrb[8].mxu1 %v9552_v55  ;;  %v9576_v54 = vld [vmem:[#allocation2 + $0x28] ss:$16 sps:$4 sm:$0xff]   ;;  %v9581_v55 = vld [vmem:[%s10890_s19 + $0x204] ss:$8 sps:$4 sm:$0xff]  }
 0x32c   : > { %5650 = vmatmul.mubr.bf16.gmra.mrb[8].mxu0 %v8078_v38  ;;  %3030 = vmatpush1.bf16.msra.mxu1 %v9490_v35  ;;  %v9586_v35 = vld [vmem:[%s10890_s19 + $0xb04] ss:$8 sps:$4 sm:$0xff]   ;;  %v8212_v38 = vcombine.low %v11413_v47, %v9953_v42  ;;  %v9604_v47 = vld [vmem:[%s10890_s19 + $0xb34] ss:$8 sps:$4 sm:$0xff]  }
 0x32d   : > { %6177 = vmatpush1.bf16.msra.mxu0 %v9493_v6  ;;  %3031 = vmatprep.subr.bf16.mxu1 %v9498_v40  ;;  %v9579_v6 = vld [vmem:[%s10890_s19 + $0x200] ss:$8 sps:$4 sm:$0xff]   ;;  %v9634_v42 = vld [vmem:[%s10890_s19 + $0xb84] ss:$8 sps:$4 sm:$0xff]  }
 0x32e   : > { %6178 = vmatprep.subr.bf16.mxu0 %v9501_v62  ;;  %3010 = vmatprep.mubr.bf16.mxu1 %v7505_v39  ;;  %v9584_v40 = vld [vmem:[%s10890_s19 + $0xb00] ss:$8 sps:$4 sm:$0xff]   ;;  %v9589_v62 = vld [vmem:[%s10890_s19 + $0x214] ss:$8 sps:$4 sm:$0xff]   ;;  %v9587_v39 = vld [vmem:[%s10890_s19 + $0x210] ss:$8 sps:$4 sm:$0xff]  }
 0x32f   : > { %5659 = vmatprep.mubr.bf16.mxu0 %v8083_v33  ;;  %v9641_v33 = vld [vmem:[#allocation2 + $0x4c] ss:$16 sps:$4 sm:$0xff]  }
 0x330   : > { %3032 = vmatpush1.bf16.msra.mxu1 %v9496_v34  ;;  %v9954_v34 = vld [vmem:[#allocation2 + $0x170] sm:$0xff] }
 0x331   : > { %6179 = vmatpush1.bf16.msra.mxu0 %v9499_v19  ;;  %3033 = vmatprep.subr.bf16.mxu1 %v9504_v49  ;;  %v9955_v19 = vld [vmem:[#allocation2 + $0x180] sm:$0xff] }
 0x332   : > { %6180 = vmatprep.subr.bf16.mxu0 %v9507_v20  ;;  %v8217_v49 = vcombine.high %v9954_v34, %v9955_v19  ;;  %v9590_v20 = vld [vmem:[%s10890_s19 + $0xb10] ss:$8 sps:$4 sm:$0xff]  }
 0x333   : > { %3011 = vmatmul.mubr.bf16.gmra.mrb[12].mxu1 %v7504_v56  ;;  %v9598_v56 = vld [vmem:[%s10890_s19 + $0xb24] ss:$8 sps:$4 sm:$0xff]  }
 0x334   : > { %5660 = vmatmul.mubr.bf16.gmra.mrb[12].mxu0 %v8082_v50  ;;  %3034 = vmatpush1.bf16.msra.mxu1 %v9502_v53  ;;  %v9595_v53 = vld [vmem:[%s10890_s19 + $0x224] ss:$8 sps:$4 sm:$0xff]   ;;  %v9650_v50 = vld [vmem:[#allocation2 + $0x48] ss:$16 sps:$4 sm:$0xff]  }
 0x335   : > { %6181 = vmatpush1.bf16.msra.mxu0 %v9505_v57  ;;  %3035 = vmatprep.subr.bf16.mxu1 %v9510_v58  ;;  %v9593_v57 = vld [vmem:[%s10890_s19 + $0x220] ss:$8 sps:$4 sm:$0xff]   ;;  %v8216_v58 = vcombine.low %v9954_v34, %v9955_v19  ;;  %v9649_v34 = vld [vmem:[%s10890_s19 + $0xba4] ss:$8 sps:$4 sm:$0xff]  }
 0x336   : > { %6182 = vmatprep.subr.bf16.mxu0 %v9513_v51  ;;  %3053 = vmatprep.mubr.bf16.mxu1 %v9578_v3  ;;  %v9596_v51 = vld [vmem:[%s10890_s19 + $0xb20] ss:$8 sps:$4 sm:$0xff]   ;;  %v9601_v3 = vld [vmem:[%s10890_s19 + $0x234] ss:$8 sps:$4 sm:$0xff]  }
 0x337   : > { %6200 = vmatprep.mubr.bf16.mxu0 %v8213_v7  ;;  %v9658_v7 = vld [vmem:[#allocation2 + $0x6c] ss:$16 sps:$4 sm:$0xff]   ;;  %v9643_v19 = vld [vmem:[%s10890_s19 + $0x2a0] ss:$8 sps:$4 sm:$0xff]  }
 0x338   : > { %3036 = vmatpush1.bf16.msra.mxu1 %v9508_v14  ;;  %v9599_v14 = vld [vmem:[%s10890_s19 + $0x230] ss:$8 sps:$4 sm:$0xff]  }
 0x339   : > { %6183 = vmatpush1.bf16.msra.mxu0 %v9511_v32  ;;  %3037 = vmatprep.subr.bf16.mxu1 %v9516_v23  ;;  %v9602_v32 = vld [vmem:[%s10890_s19 + $0xb30] ss:$8 sps:$4 sm:$0xff]  }
 0x33a   : > { %6184 = vmatprep.subr.bf16.mxu0 %v9519_v26  ;;  %v9956_v23 = vld [vmem:[#allocation2 + $0x190] sm:$0xff]  ;;  %v9957_v26 = vld [vmem:[#allocation2 + $0x1a0] sm:$0xff] }
 0x33c   : > { %3038 = vmatpush1.bf16.msra.mxu1 %v9514_v46  ;;  %v8221_v46 = vcombine.high %v9956_v23, %v9957_v26 }
 0x33d   : > { %6185 = vmatpush1.bf16.msra.mxu0 %v9517_v52  ;;  %3039 = vmatprep.subr.bf16.mxu1 %v9522_v59  ;;  %v9607_v52 = vld [vmem:[%s10890_s19 + $0x244] ss:$8 sps:$4 sm:$0xff]  }
 0x33e   : > { %6186 = vmatprep.subr.bf16.mxu0 %v9525_v60  ;;  %v9610_v59 = vld [vmem:[%s10890_s19 + $0xb44] ss:$8 sps:$4 sm:$0xff]   ;;  %v9667_v60 = vld [vmem:[#allocation2 + $0x68] ss:$16 sps:$4 sm:$0xff]  }
 0x340   : > { %3040 = vmatpush1.bf16.msra.mxu1 %v9520_v63  ;;  %v2482_v63 = vld [vmem:[#allocation2 + $0x98] sm:$0xff] }
 0x341   : > { %6187 = vmatpush1.bf16.msra.mxu0 %v9523_v0  ;;  %3041 = vmatprep.subr.bf16.mxu1 %v9530_v1  ;;  %v11470_v0 = vld [vmem:[#allocation2 + $0x1c0] sm:$0xff]  ;;  %v8220_v1 = vcombine.low %v9956_v23, %v9957_v26 }
 0x342   : > { %6188 = vmatprep.subr.bf16.mxu0 %v9534_v18  ;;  %v9605_v18 = vld [vmem:[%s10890_s19 + $0x240] ss:$8 sps:$4 sm:$0xff]   ;;  %v9678_v23 = vld [vmem:[%s10890_s19 + $0x2e4] ss:$8 sps:$4 sm:$0xff]  }
 0x343   : > { %v9682_v26 = vld [vmem:[%s10890_s19 + $0xbe4] ss:$8 sps:$4 sm:$0xff]  }
 0x344   : > { %3042 = vmatpush1.bf16.msra.mxu1 %v9528_v2  ;;  %v9608_v2 = vld [vmem:[%s10890_s19 + $0xb40] ss:$8 sps:$4 sm:$0xff]  }
 0x345   : > { %6189 = vmatpush1.bf16.msra.mxu0 %v9532_v8  ;;  %3043 = vmatprep.subr.bf16.mxu1 %v9539_v61  ;;  %v9613_v8 = vld [vmem:[%s10890_s19 + $0x254] ss:$8 sps:$4 sm:$0xff]  }
 0x346   : > { %6190 = vmatprep.subr.bf16.mxu0 %v9542_v12  ;;  %v9616_v61 = vld [vmem:[%s10890_s19 + $0xb54] ss:$8 sps:$4 sm:$0xff]   ;;  %v9958_v12 = vld [vmem:[#allocation2 + $0x88] sm:$0xff] }
 0x348   : > { %3044 = vmatpush1.bf16.msra.mxu1 %v9537_v22  ;;  %v7507_v22 = vcombine.high %v9958_v12, %v2482_v63 }
 0x349   : > { %6191 = vmatpush1.bf16.msra.mxu0 %v9540_v25  ;;  %3045 = vmatprep.subr.bf16.mxu1 %v9547_v29  ;;  %v9959_v25 = vld [vmem:[#allocation2 + $0x1b0] sm:$0xff] }
 0x34a   : > { %6192 = vmatprep.subr.bf16.mxu0 %v9551_v28  ;;  %v8225_v29 = vcombine.high %v9959_v25, %v11470_v0  ;;  %v9611_v28 = vld [vmem:[%s10890_s19 + $0x250] ss:$8 sps:$4 sm:$0xff]  }
 0x34c   : > { %3046 = vmatpush1.bf16.msra.mxu1 %v9545_v4  ;;  %v9614_v4 = vld [vmem:[%s10890_s19 + $0xb50] ss:$8 sps:$4 sm:$0xff]  }
 0x34d   : > { %6193 = vmatpush1.bf16.msra.mxu0 %v9549_v30  ;;  %3047 = vmatprep.subr.bf16.mxu1 %v9556_v41  ;;  %v9619_v30 = vld [vmem:[%s10890_s19 + $0x264] ss:$8 sps:$4 sm:$0xff]  }
 0x34e   : > { %6194 = vmatprep.subr.bf16.mxu0 %v9559_v11  ;;  %v9622_v41 = vld [vmem:[%s10890_s19 + $0xb64] ss:$8 sps:$4 sm:$0xff]   ;;  %v7506_v11 = vcombine.low %v9958_v12, %v2482_v63  ;;  %v9685_v63 = vld [vmem:[%s10890_s19 + $0x2f0] ss:$8 sps:$4 sm:$0xff]  }
 0x34f   : > { %v11536_v12 = vld [vmem:[#allocation2 + $0xc0] sm:$0xff] }
 0x350   : > { %3048 = vmatpush1.bf16.msra.mxu1 %v9554_v31  ;;  %v8224_v31 = vcombine.low %v9959_v25, %v11470_v0  ;;  %v9693_v25 = vld [vmem:[%s10890_s19 + $0x300] ss:$8 sps:$4 sm:$0xff]  }
 0x351   : > { %6195 = vmatpush1.bf16.msra.mxu0 %v9557_v9  ;;  %3049 = vmatprep.subr.bf16.mxu1 %v9563_v17  ;;  %v11482_v9 = vld [vmem:[#allocation2 + $0xa0] sm:$0xff]  ;;  %v11484_v17 = vld [vmem:[#allocation2 + $0xb0] sm:$0xff] }
 0x352   : > { %6196 = vmatprep.subr.bf16.mxu0 %v9567_v13  ;;  %v9617_v13 = vld [vmem:[%s10890_s19 + $0x260] ss:$8 sps:$4 sm:$0xff]  }
 0x354   : > { %3050 = vmatpush1.bf16.msra.mxu1 %v9561_v37  ;;  %v9620_v37 = vld [vmem:[%s10890_s19 + $0xb60] ss:$8 sps:$4 sm:$0xff]  }
 0x355   : > { %6197 = vmatpush1.bf16.msra.mxu0 %v9565_v48  ;;  %3051 = vmatprep.subr.bf16.mxu1 %v9572_v45  ;;  %v9625_v48 = vld [vmem:[%s10890_s19 + $0x274] ss:$8 sps:$4 sm:$0xff]  }
 0x356   : > { %6198 = vmatprep.subr.bf16.mxu0 %v9575_v10  ;;  %v9628_v45 = vld [vmem:[%s10890_s19 + $0xb74] ss:$8 sps:$4 sm:$0xff]   ;;  %v7637_v10 = vcombine.high %v11482_v9, %v11484_v17 }
 0x358   : > { %3052 = vmatpush1.bf16.msra.mxu1 %v9570_v5  ;;  %v11492_v5 = vld [vmem:[#allocation2 + $0x158] sm:$0xff] }
 0x359   : > { %6199 = vmatpush1.bf16.msra.mxu0 %v9573_v27  ;;  %3592 = vmatprep.subr.bf16.mxu1 %v9581_v55  ;;  %v8215_v27 = vcombine.high %v11492_v5, %v11362_v24  ;;  %v9626_v55 = vld [vmem:[%s10890_s19 + $0xb70] ss:$8 sps:$4 sm:$0xff]  }
 0x35a   : > { %6241 = vmatprep.subr.bf16.mxu0 %v9586_v35  ;;  %v9631_v35 = vld [vmem:[%s10890_s19 + $0x284] ss:$8 sps:$4 sm:$0xff]  }
 0x35b   : > { %3054 = vmatmul.mubr.bf16.vlgmr.msra.gmra.mrb[0].mxu1 %v9576_v54  ;;  %v9623_v54 = vld [vmem:[%s10890_s19 + $0x270] ss:$8 sps:$4 sm:$0xff]  }
 0x35c   : > { %6201 = vmatmul.mubr.bf16.vlgmr.msra.gmra.mrb[0].mxu0 %v8212_v38  ;;  %3593 = vmatpush1.bf16.msra.mxu1 %v9579_v6  ;;  %v9629_v38 = vld [vmem:[%s10890_s19 + $0x280] ss:$8 sps:$4 sm:$0xff]  }
 0x35d   : > { %6242 = vmatpush1.bf16.msra.mxu0 %v9584_v40  ;;  %3594 = vmatprep.subr.bf16.mxu1 %v9589_v62  ;;  %v9632_v6 = vld [vmem:[%s10890_s19 + $0xb80] ss:$8 sps:$4 sm:$0xff]   ;;  %v9637_v40 = vld [vmem:[%s10890_s19 + $0x294] ss:$8 sps:$4 sm:$0xff]  }
 0x35e   : > { %6243 = vmatprep.subr.bf16.mxu0 %v9592_v44  ;;  %3063 = vmatprep.mubr.bf16.mxu1 %v9641_v33  ;;  %v9640_v62 = vld [vmem:[%s10890_s19 + $0xb94] ss:$8 sps:$4 sm:$0xff]   ;;  %v9635_v44 = vld [vmem:[%s10890_s19 + $0x290] ss:$8 sps:$4 sm:$0xff]   ;;  %v9645_v33 = vld [vmem:[%s10890_s19 + $0x2a4] ss:$8 sps:$4 sm:$0xff]  }
 0x35f   : > { %6210 = vmatprep.mubr.bf16.mxu0 %v8217_v49  ;;  %v9647_v49 = vld [vmem:[%s10890_s19 + $0xba0] ss:$8 sps:$4 sm:$0xff]  }
 0x360   : > { %3595 = vmatpush1.bf16.msra.mxu1 %v9587_v39  ;;  %v9638_v39 = vld [vmem:[%s10890_s19 + $0xb90] ss:$8 sps:$4 sm:$0xff]  }
 0x361   : > { %6244 = vmatpush1.bf16.msra.mxu0 %v9590_v20  ;;  %3596 = vmatprep.subr.bf16.mxu1 %v9595_v53  ;;  %v9654_v20 = vld [vmem:[%s10890_s19 + $0x2b4] ss:$8 sps:$4 sm:$0xff]  }
 0x362   : > { %6245 = vmatprep.subr.bf16.mxu0 %v9598_v56  ;;  %v9657_v53 = vld [vmem:[%s10890_s19 + $0xbb4] ss:$8 sps:$4 sm:$0xff]   ;;  %v9652_v56 = vld [vmem:[%s10890_s19 + $0x2b0] ss:$8 sps:$4 sm:$0xff]  }
 0x363   : > { %3064 = vmatmul.mubr.bf16.gmra.mrb[4].mxu1 %v9650_v50  ;;  %v9655_v50 = vld [vmem:[%s10890_s19 + $0xbb0] ss:$8 sps:$4 sm:$0xff]  }
 0x364   : > { %6211 = vmatmul.mubr.bf16.gmra.mrb[4].mxu0 %v8216_v58  ;;  %3597 = vmatpush1.bf16.msra.mxu1 %v9593_v57  ;;  %v9662_v57 = vld [vmem:[%s10890_s19 + $0x2c4] ss:$8 sps:$4 sm:$0xff]  }
 0x365   : > { %6246 = vmatpush1.bf16.msra.mxu0 %v9596_v51  ;;  %3598 = vmatprep.subr.bf16.mxu1 %v9601_v3  ;;  %v9666_v58 = vld [vmem:[%s10890_s19 + $0xbc4] ss:$8 sps:$4 sm:$0xff]   ;;  %v9660_v51 = vld [vmem:[%s10890_s19 + $0x2c0] ss:$8 sps:$4 sm:$0xff]  }
 0x366   : > { %6247 = vmatprep.subr.bf16.mxu0 %v9604_v47  ;;  %3073 = vmatprep.mubr.bf16.mxu1 %v9658_v7  ;;  %v9664_v3 = vld [vmem:[%s10890_s19 + $0xbc0] ss:$8 sps:$4 sm:$0xff]   ;;  %v9671_v47 = vld [vmem:[%s10890_s19 + $0x2d4] ss:$8 sps:$4 sm:$0xff]  }
 0x367   : > { %6220 = vmatprep.mubr.bf16.mxu0 %v8221_v46  ;;  %v9674_v7 = vld [vmem:[%s10890_s19 + $0xbd4] ss:$8 sps:$4 sm:$0xff]   ;;  %v9676_v46 = vld [vmem:[%s10890_s19 + $0x2e0] ss:$8 sps:$4 sm:$0xff]  }
 0x368   : > { %3599 = vmatpush1.bf16.msra.mxu1 %v9599_v14  ;;  %v9669_v14 = vld [vmem:[%s10890_s19 + $0x2d0] ss:$8 sps:$4 sm:$0xff]  }
 0x369   : > { %6248 = vmatpush1.bf16.msra.mxu0 %v9602_v32  ;;  %3600 = vmatprep.subr.bf16.mxu1 %v9607_v52  ;;  %v9672_v32 = vld [vmem:[%s10890_s19 + $0xbd0] ss:$8 sps:$4 sm:$0xff]   ;;  %v9680_v52 = vld [vmem:[%s10890_s19 + $0xbe0] ss:$8 sps:$4 sm:$0xff]  }
 0x36a   : > { %6249 = vmatprep.subr.bf16.mxu0 %v9610_v59  ;;  %v9687_v59 = vld [vmem:[%s10890_s19 + $0x2f4] ss:$8 sps:$4 sm:$0xff]  }
 0x36b   : > { %3074 = vmatmul.mubr.bf16.gmra.mrb[8].mxu1 %v9667_v60  ;;  %v9690_v60 = vld [vmem:[%s10890_s19 + $0xbf4] ss:$8 sps:$4 sm:$0xff]  }
 0x36c   : > { %6221 = vmatmul.mubr.bf16.gmra.mrb[8].mxu0 %v8220_v1  ;;  %3601 = vmatpush1.bf16.msra.mxu1 %v9605_v18  ;;  %v9688_v1 = vld [vmem:[%s10890_s19 + $0xbf0] ss:$8 sps:$4 sm:$0xff]   ;;  %v9695_v18 = vld [vmem:[%s10890_s19 + $0x304] ss:$8 sps:$4 sm:$0xff]  }
 0x36d   : > { %6250 = vmatpush1.bf16.msra.mxu0 %v9608_v2  ;;  %3602 = vmatprep.subr.bf16.mxu1 %v9613_v8  ;;  %v9700_v2 = vld [vmem:[%s10890_s19 + $0x1004] ss:$8 sps:$4 sm:$0xff]   ;;  %v7636_v8 = vcombine.low %v11482_v9, %v11484_v17 }
 0x36e   : > { %6251 = vmatprep.subr.bf16.mxu0 %v9616_v61  ;;  %3083 = vmatprep.mubr.bf16.mxu1 %v7507_v22  ;;  %v8214_v61 = vcombine.low %v11492_v5, %v11362_v24  ;;  %v11538_v22 = vld [vmem:[#allocation2 + $0xd0] sm:$0xff]  ;;  %v8219_v24 = vcombine.high %v11364_v36, %v11378_v15  ;;  %v9712_v9 = vld [vmem:[%s10890_s19 + $0x1024] ss:$8 sps:$4 sm:$0xff]   ;;  %v9710_v5 = vld [vmem:[%s10890_s19 + $0x1020] ss:$8 sps:$4 sm:$0xff]  }
 0x36f   : > { %6230 = vmatprep.mubr.bf16.mxu0 %v8225_v29  ;;  %v9698_v29 = vld [vmem:[%s10890_s19 + $0x1000] ss:$8 sps:$4 sm:$0xff]  }
 0x370   : > { %3603 = vmatpush1.bf16.msra.mxu1 %v9611_v28  ;;  %v9703_v28 = vld [vmem:[%s10890_s19 + $0x314] ss:$8 sps:$4 sm:$0xff]  }
 0x371   : > { %6252 = vmatpush1.bf16.msra.mxu0 %v9614_v4  ;;  %3604 = vmatprep.subr.bf16.mxu1 %v9619_v30  ;;  %v9706_v4 = vld [vmem:[%s10890_s19 + $0x1014] ss:$8 sps:$4 sm:$0xff]   ;;  %v7641_v30 = vcombine.high %v11536_v12, %v11538_v22 }
 0x372   : > { %6253 = vmatprep.subr.bf16.mxu0 %v9622_v41  ;;  %v9701_v41 = vld [vmem:[%s10890_s19 + $0x310] ss:$8 sps:$4 sm:$0xff]  }
 0x373   : > { %3084 = vmatmul.mubr.bf16.gmra.mrb[12].mxu1 %v7506_v11  ;;  %v9704_v11 = vld [vmem:[%s10890_s19 + $0x1010] ss:$8 sps:$4 sm:$0xff]  }
 0x374   : > { %6231 = vmatmul.mubr.bf16.gmra.mrb[12].mxu0 %v8224_v31  ;;  %3605 = vmatpush1.bf16.msra.mxu1 %v9617_v13  ;;  %v9709_v31 = vld [vmem:[%s10890_s19 + $0x324] ss:$8 sps:$4 sm:$0xff]   ;;  %v7640_v13 = vcombine.low %v11536_v12, %v11538_v22 }
 0x375   : > { %6254 = vmatpush1.bf16.msra.mxu0 %v9620_v37  ;;  %3606 = vmatprep.subr.bf16.mxu1 %v9625_v48  ;;  %v8218_v37 = vcombine.low %v11364_v36, %v11378_v15  ;;  %v11556_v48 = vld [vmem:[#allocation2 + $0xe0] sm:$0xff]  ;;  %v8223_v36 = vcombine.high %v11380_v21, %v11394_v16  ;;  %v9713_v15 = vld [vmem:[%s10890_s19 + $0x330] ss:$8 sps:$4 sm:$0xff]  }
 0x376   : > { %6255 = vmatprep.subr.bf16.mxu0 %v9628_v45  ;;  %3624 = vmatprep.mubr.bf16.mxu1 %v7637_v10  ;;  %v11558_v45 = vld [vmem:[#allocation2 + $0xf0] sm:$0xff]  ;;  %v9707_v10 = vld [vmem:[%s10890_s19 + $0x320] ss:$8 sps:$4 sm:$0xff]  }
 0x377   : > { %6273 = vmatprep.mubr.bf16.mxu0 %v8215_v27  ;;  %v9715_v27 = vld [vmem:[%s10890_s19 + $0x334] ss:$8 sps:$4 sm:$0xff]  }
 0x378   : > { %3607 = vmatpush1.bf16.msra.mxu1 %v9623_v54  ;;  %v9718_v54 = vld [vmem:[%s10890_s19 + $0x1034] ss:$8 sps:$4 sm:$0xff]  }
 0x379   : > { %6256 = vmatpush1.bf16.msra.mxu0 %v9626_v55  ;;  %3608 = vmatprep.subr.bf16.mxu1 %v9631_v35  ;;  %v7645_v55 = vcombine.high %v11556_v48, %v11558_v45  ;;  %v9716_v35 = vld [vmem:[%s10890_s19 + $0x1030] ss:$8 sps:$4 sm:$0xff]  }
 0x37a   : > { %6257 = vmatprep.subr.bf16.mxu0 %v9634_v42  ;;  %v9721_v42 = vld [vmem:[%s10890_s19 + $0x344] ss:$8 sps:$4 sm:$0xff]  }
 0x37c   : > { %3609 = vmatpush1.bf16.msra.mxu1 %v9629_v38  ;;  %v9724_v38 = vld [vmem:[%s10890_s19 + $0x1044] ss:$8 sps:$4 sm:$0xff]  }
 0x37d   : > { %6258 = vmatpush1.bf16.msra.mxu0 %v9632_v6  ;;  %3610 = vmatprep.subr.bf16.mxu1 %v9637_v40  ;;  %v7644_v6 = vcombine.low %v11556_v48, %v11558_v45  ;;  %v8222_v40 = vcombine.low %v11380_v21, %v11394_v16 }
 0x37e   : > { %6259 = vmatprep.subr.bf16.mxu0 %v9640_v62  ;;  %v11576_v62 = vld [vmem:[#allocation2 + $0x100] sm:$0xff] }
 0x380   : > { %3611 = vmatpush1.bf16.msra.mxu1 %v9635_v44  ;;  %v11578_v44 = vld [vmem:[#allocation2 + $0x110] sm:$0xff] }
 0x381   : > { %6260 = vmatpush1.bf16.msra.mxu0 %v9638_v39  ;;  %3612 = vmatprep.subr.bf16.mxu1 %v9645_v33  ;;  %v11580_v39 = vld [vmem:[#allocation2 + $0x1c8] sm:$0xff]  ;;  %v7649_v21 = vcombine.high %v11576_v62, %v11578_v44 }
 0x382   : > { %6261 = vmatprep.subr.bf16.mxu0 %v9649_v34  ;;  %v9719_v33 = vld [vmem:[%s10890_s19 + $0x340] ss:$8 sps:$4 sm:$0xff]   ;;  %v8227_v16 = vcombine.high %v11396_v43, %v11580_v39 }
 0x383   : > { %v9722_v34 = vld [vmem:[%s10890_s19 + $0x1040] ss:$8 sps:$4 sm:$0xff]  }
 0x384   : > { %3613 = vmatpush1.bf16.msra.mxu1 %v9643_v19  ;;  %v9727_v19 = vld [vmem:[%s10890_s19 + $0x354] ss:$8 sps:$4 sm:$0xff]  }
 0x385   : > { %6262 = vmatpush1.bf16.msra.mxu0 %v9647_v49  ;;  %3614 = vmatprep.subr.bf16.mxu1 %v9654_v20  ;;  %v9730_v49 = vld [vmem:[%s10890_s19 + $0x1054] ss:$8 sps:$4 sm:$0xff]   ;;  %v9725_v20 = vld [vmem:[%s10890_s19 + $0x350] ss:$8 sps:$4 sm:$0xff]  }
 0x386   : > { %6263 = vmatprep.subr.bf16.mxu0 %v9657_v53  ;;  %v9728_v53 = vld [vmem:[%s10890_s19 + $0x1050] ss:$8 sps:$4 sm:$0xff]  }
 0x388   : > { %3615 = vmatpush1.bf16.msra.mxu1 %v9652_v56  ;;  %v9733_v56 = vld [vmem:[%s10890_s19 + $0x364] ss:$8 sps:$4 sm:$0xff]  }
 0x389   : > { %6264 = vmatpush1.bf16.msra.mxu0 %v9655_v50  ;;  %3616 = vmatprep.subr.bf16.mxu1 %v9662_v57  ;;  %v9736_v50 = vld [vmem:[%s10890_s19 + $0x1064] ss:$8 sps:$4 sm:$0xff]   ;;  %v7648_v57 = vcombine.low %v11576_v62, %v11578_v44 }
 0x38a   : > { %6265 = vmatprep.subr.bf16.mxu0 %v9666_v58  ;;  %v8226_v58 = vcombine.low %v11396_v43, %v11580_v39  ;;  %v9737_v43 = vld [vmem:[%s10890_s19 + $0x370] ss:$8 sps:$4 sm:$0xff]  }
 0x38c   : > { %3617 = vmatpush1.bf16.msra.mxu1 %v9660_v51  ;;  %v9731_v51 = vld [vmem:[%s10890_s19 + $0x360] ss:$8 sps:$4 sm:$0xff]  }
 0x38d   : > { %6266 = vmatpush1.bf16.msra.mxu0 %v9664_v3  ;;  %3618 = vmatprep.subr.bf16.mxu1 %v9671_v47  ;;  %v9734_v3 = vld [vmem:[%s10890_s19 + $0x1060] ss:$8 sps:$4 sm:$0xff]   ;;  %v9739_v47 = vld [vmem:[%s10890_s19 + $0x374] ss:$8 sps:$4 sm:$0xff]  }
 0x38e   : > { %6267 = vmatprep.subr.bf16.mxu0 %v9674_v7  ;;  %v9742_v7 = vld [vmem:[%s10890_s19 + $0x1074] ss:$8 sps:$4 sm:$0xff]  }
 0x390   : > { %3619 = vmatpush1.bf16.msra.mxu1 %v9669_v14  ;;  %v9805_v14 = vld [vmem:[#allocation2 + $0xac] ss:$16 sps:$4 sm:$0xff]  }
 0x391   : > { %6268 = vmatpush1.bf16.msra.mxu0 %v9672_v32  ;;  %3620 = vmatprep.subr.bf16.mxu1 %v9678_v23  ;;  %v9811_v32 = vld [vmem:[#allocation2 + $0x164] ss:$16 sps:$4 sm:$0xff]   ;;  %v9740_v23 = vld [vmem:[%s10890_s19 + $0x1070] ss:$8 sps:$4 sm:$0xff]  }
 0x392   : > { %6269 = vmatprep.subr.bf16.mxu0 %v9682_v26  ;;  %v9745_v26 = vld [vmem:[%s10890_s19 + $0x384] ss:$8 sps:$4 sm:$0xff]  }
 0x394   : > { %3621 = vmatpush1.bf16.msra.mxu1 %v9676_v46  ;;  %v9748_v46 = vld [vmem:[%s10890_s19 + $0x1084] ss:$8 sps:$4 sm:$0xff]  }
 0x395   : > { %6270 = vmatpush1.bf16.msra.mxu0 %v9680_v52  ;;  %3622 = vmatprep.subr.bf16.mxu1 %v9687_v59  ;;  %v9743_v52 = vld [vmem:[%s10890_s19 + $0x380] ss:$8 sps:$4 sm:$0xff]  }
 0x396   : > { %6271 = vmatprep.subr.bf16.mxu0 %v9690_v60  ;;  %v9746_v59 = vld [vmem:[%s10890_s19 + $0x1080] ss:$8 sps:$4 sm:$0xff]   ;;  %v9751_v60 = vld [vmem:[%s10890_s19 + $0x394] ss:$8 sps:$4 sm:$0xff]  }
 0x398   : > { %3623 = vmatpush1.bf16.msra.mxu1 %v9685_v63  ;;  %v9754_v63 = vld [vmem:[%s10890_s19 + $0x1094] ss:$8 sps:$4 sm:$0xff]  }
 0x399   : > { %6272 = vmatpush1.bf16.msra.mxu0 %v9688_v1  ;;  %3665 = vmatprep.subr.bf16.mxu1 %v9695_v18  ;;  %v9749_v1 = vld [vmem:[%s10890_s19 + $0x390] ss:$8 sps:$4 sm:$0xff]  }
 0x39a   : > { %6812 = vmatprep.subr.bf16.mxu0 %v9700_v2  ;;  %v9752_v18 = vld [vmem:[%s10890_s19 + $0x1090] ss:$8 sps:$4 sm:$0xff]   ;;  %v9758_v2 = vld [vmem:[%s10890_s19 + $0x3a4] ss:$8 sps:$4 sm:$0xff]  }
 0x39b   : > { %3625 = vmatmul.mubr.bf16.vlgmr.msra.gmra.mrb[0].mxu1 %v7636_v8  ;;  %v9762_v8 = vld [vmem:[%s10890_s19 + $0x10a4] ss:$8 sps:$4 sm:$0xff]  }
 0x39c   : > { %6274 = vmatmul.mubr.bf16.vlgmr.msra.gmra.mrb[0].mxu0 %v8214_v61  ;;  %3666 = vmatpush1.bf16.msra.mxu1 %v9693_v25  ;;  %v9756_v61 = vld [vmem:[%s10890_s19 + $0x3a0] ss:$8 sps:$4 sm:$0xff]  }
 0x39d   : > { %6813 = vmatpush1.bf16.msra.mxu0 %v9698_v29  ;;  %3667 = vmatprep.subr.bf16.mxu1 %v9703_v28  ;;  %v9760_v25 = vld [vmem:[%s10890_s19 + $0x10a0] ss:$8 sps:$4 sm:$0xff]   ;;  %v9767_v29 = vld [vmem:[%s10890_s19 + $0x3b4] ss:$8 sps:$4 sm:$0xff]  }
 0x39e   : > { %6814 = vmatprep.subr.bf16.mxu0 %v9706_v4  ;;  %3634 = vmatprep.mubr.bf16.mxu1 %v7641_v30  ;;  %v9770_v28 = vld [vmem:[%s10890_s19 + $0x10b4] ss:$8 sps:$4 sm:$0xff]   ;;  %v9765_v4 = vld [vmem:[%s10890_s19 + $0x3b0] ss:$8 sps:$4 sm:$0xff]  }
 0x39f   : > { %6283 = vmatprep.mubr.bf16.mxu0 %v8219_v24  ;;  %v9768_v30 = vld [vmem:[%s10890_s19 + $0x10b0] ss:$8 sps:$4 sm:$0xff]   ;;  %v9774_v24 = vld [vmem:[%s10890_s19 + $0x3c4] ss:$8 sps:$4 sm:$0xff]  }
 0x3a0   : > { %3668 = vmatpush1.bf16.msra.mxu1 %v9701_v41  ;;  %v9778_v41 = vld [vmem:[%s10890_s19 + $0x10c4] ss:$8 sps:$4 sm:$0xff]  }
 0x3a1   : > { %6815 = vmatpush1.bf16.msra.mxu0 %v9704_v11  ;;  %3669 = vmatprep.subr.bf16.mxu1 %v9709_v31  ;;  %v9772_v11 = vld [vmem:[%s10890_s19 + $0x3c0] ss:$8 sps:$4 sm:$0xff]  }
 0x3a2   : > { %6816 = vmatprep.subr.bf16.mxu0 %v9712_v9  ;;  %v9776_v31 = vld [vmem:[%s10890_s19 + $0x10c0] ss:$8 sps:$4 sm:$0xff]   ;;  %v9783_v9 = vld [vmem:[%s10890_s19 + $0x3d4] ss:$8 sps:$4 sm:$0xff]  }
 0x3a3   : > { %3635 = vmatmul.mubr.bf16.gmra.mrb[4].mxu1 %v7640_v13  ;;  %v9786_v13 = vld [vmem:[%s10890_s19 + $0x10d4] ss:$8 sps:$4 sm:$0xff]  }
 0x3a4   : > { %6284 = vmatmul.mubr.bf16.gmra.mrb[4].mxu0 %v8218_v37  ;;  %3670 = vmatpush1.bf16.msra.mxu1 %v9707_v10  ;;  %v9781_v37 = vld [vmem:[%s10890_s19 + $0x3d0] ss:$8 sps:$4 sm:$0xff]  }
 0x3a5   : > { %6817 = vmatpush1.bf16.msra.mxu0 %v9710_v5  ;;  %3671 = vmatprep.subr.bf16.mxu1 %v9715_v27  ;;  %v9784_v10 = vld [vmem:[%s10890_s19 + $0x10d0] ss:$8 sps:$4 sm:$0xff]   ;;  %v9790_v5 = vld [vmem:[%s10890_s19 + $0x3e4] ss:$8 sps:$4 sm:$0xff]  }
 0x3a6   : > { %6818 = vmatprep.subr.bf16.mxu0 %v9718_v54  ;;  %3644 = vmatprep.mubr.bf16.mxu1 %v7645_v55  ;;  %v9794_v27 = vld [vmem:[%s10890_s19 + $0x10e4] ss:$8 sps:$4 sm:$0xff]   ;;  %v9788_v54 = vld [vmem:[%s10890_s19 + $0x3e0] ss:$8 sps:$4 sm:$0xff]  }
 0x3a7   : > { %6293 = vmatprep.mubr.bf16.mxu0 %v8223_v36  ;;  %v9792_v55 = vld [vmem:[%s10890_s19 + $0x10e0] ss:$8 sps:$4 sm:$0xff]   ;;  %v9799_v36 = vld [vmem:[%s10890_s19 + $0x3f4] ss:$8 sps:$4 sm:$0xff]  }
 0x3a8   : > { %3672 = vmatpush1.bf16.msra.mxu1 %v9713_v15  ;;  %v9802_v15 = vld [vmem:[%s10890_s19 + $0x10f4] ss:$8 sps:$4 sm:$0xff]  }
 0x3a9   : > { %6819 = vmatpush1.bf16.msra.mxu0 %v9716_v35  ;;  %3673 = vmatprep.subr.bf16.mxu1 %v9721_v42  ;;  %v9797_v35 = vld [vmem:[%s10890_s19 + $0x3f0] ss:$8 sps:$4 sm:$0xff]  }
 0x3aa   : > { %6820 = vmatprep.subr.bf16.mxu0 %v9724_v38  ;;  %v9800_v42 = vld [vmem:[%s10890_s19 + $0x10f0] ss:$8 sps:$4 sm:$0xff]   ;;  %v9808_v38 = vld [vmem:[%s10890_s19 + $0x804] ss:$8 sps:$4 sm:$0xff]  }
 0x3ab   : > { %3645 = vmatmul.mubr.bf16.gmra.mrb[8].mxu1 %v7644_v6  ;;  %v9814_v6 = vld [vmem:[%s10890_s19 + $0x1104] ss:$8 sps:$4 sm:$0xff]  }
 0x3ac   : > { %6294 = vmatmul.mubr.bf16.gmra.mrb[8].mxu0 %v8222_v40  ;;  %3674 = vmatpush1.bf16.msra.mxu1 %v9719_v33  ;;  %v9803_v40 = vld [vmem:[#allocation2 + $0xa8] ss:$16 sps:$4 sm:$0xff]   ;;  %v9809_v33 = vld [vmem:[#allocation2 + $0x160] ss:$16 sps:$4 sm:$0xff]  }
 0x3ad   : > { %6821 = vmatpush1.bf16.msra.mxu0 %v9722_v34  ;;  %3675 = vmatprep.subr.bf16.mxu1 %v9727_v19  ;;  %v9806_v34 = vld [vmem:[%s10890_s19 + $0x800] ss:$8 sps:$4 sm:$0xff]  }
 0x3ae   : > { %6822 = vmatprep.subr.bf16.mxu0 %v9730_v49  ;;  %3654 = vmatprep.mubr.bf16.mxu1 %v7649_v21  ;;  %v9812_v19 = vld [vmem:[%s10890_s19 + $0x1100] ss:$8 sps:$4 sm:$0xff]   ;;  %v9817_v49 = vld [vmem:[%s10890_s19 + $0x814] ss:$8 sps:$4 sm:$0xff]  }
 0x3af   : > { %6303 = vmatprep.mubr.bf16.mxu0 %v8227_v16  ;;  %v9820_v21 = vld [vmem:[%s10890_s19 + $0x1114] ss:$8 sps:$4 sm:$0xff]  }
 0x3b0   : > { %3676 = vmatpush1.bf16.msra.mxu1 %v9725_v20  ;;  %v9869_v16 = vld [vmem:[#allocation2 + $0xcc] ss:$16 sps:$4 sm:$0xff]   ;;  %v9871_v20 = vld [vmem:[#allocation2 + $0x184] ss:$16 sps:$4 sm:$0xff]  }
 0x3b1   : > { %6823 = vmatpush1.bf16.msra.mxu0 %v9728_v53  ;;  %3677 = vmatprep.subr.bf16.mxu1 %v9733_v56  ;;  %v9815_v53 = vld [vmem:[%s10890_s19 + $0x810] ss:$8 sps:$4 sm:$0xff]  }
 0x3b2   : > { %6824 = vmatprep.subr.bf16.mxu0 %v9736_v50  ;;  %v9818_v56 = vld [vmem:[%s10890_s19 + $0x1110] ss:$8 sps:$4 sm:$0xff]   ;;  %v9823_v50 = vld [vmem:[%s10890_s19 + $0x824] ss:$8 sps:$4 sm:$0xff]  }
 0x3b3   : > { %3655 = vmatmul.mubr.bf16.gmra.mrb[12].mxu1 %v7648_v57  ;;  %v9826_v57 = vld [vmem:[%s10890_s19 + $0x1124] ss:$8 sps:$4 sm:$0xff]  }
 0x3b4   : > { %6304 = vmatmul.mubr.bf16.gmra.mrb[12].mxu0 %v8226_v58  ;;  %3678 = vmatpush1.bf16.msra.mxu1 %v9731_v51  ;;  %v9873_v58 = vld [vmem:[#allocation2 + $0xc8] ss:$16 sps:$4 sm:$0xff]   ;;  %v9877_v51 = vld [vmem:[#allocation2 + $0x180] ss:$16 sps:$4 sm:$0xff]  }
 0x3b5   : > { %6825 = vmatpush1.bf16.msra.mxu0 %v9734_v3  ;;  %3679 = vmatprep.subr.bf16.mxu1 %v9739_v47  ;;  %v9821_v3 = vld [vmem:[%s10890_s19 + $0x820] ss:$8 sps:$4 sm:$0xff]  }
 0x3b6   : > { %6826 = vmatprep.subr.bf16.mxu0 %v9742_v7  ;;  %3697 = vmatprep.mubr.bf16.mxu1 %v9805_v14  ;;  %v9824_v47 = vld [vmem:[%s10890_s19 + $0x1120] ss:$8 sps:$4 sm:$0xff]   ;;  %v9829_v7 = vld [vmem:[%s10890_s19 + $0x834] ss:$8 sps:$4 sm:$0xff]  }
 0x3b7   : > { %6844 = vmatprep.mubr.bf16.mxu0 %v9811_v32  ;;  %v9832_v14 = vld [vmem:[%s10890_s19 + $0x1134] ss:$8 sps:$4 sm:$0xff]  }
 0x3b8   : > { %3680 = vmatpush1.bf16.msra.mxu1 %v9737_v43  ;;  %v9887_v32 = vld [vmem:[#allocation2 + $0xec] ss:$16 sps:$4 sm:$0xff]   ;;  %v9889_v43 = vld [vmem:[#allocation2 + $0x1a4] ss:$16 sps:$4 sm:$0xff]  }
 0x3b9   : > { %6827 = vmatpush1.bf16.msra.mxu0 %v9740_v23  ;;  %3681 = vmatprep.subr.bf16.mxu1 %v9745_v26  ;;  %v9827_v23 = vld [vmem:[%s10890_s19 + $0x830] ss:$8 sps:$4 sm:$0xff]  }
 0x3ba   : > { %6828 = vmatprep.subr.bf16.mxu0 %v9748_v46  ;;  %v9830_v26 = vld [vmem:[%s10890_s19 + $0x1130] ss:$8 sps:$4 sm:$0xff]   ;;  %v9835_v46 = vld [vmem:[%s10890_s19 + $0x844] ss:$8 sps:$4 sm:$0xff]  }
 0x3bc   : > { %3682 = vmatpush1.bf16.msra.mxu1 %v9743_v52  ;;  %v9838_v52 = vld [vmem:[%s10890_s19 + $0x1144] ss:$8 sps:$4 sm:$0xff]  }
 0x3bd   : > { %6829 = vmatpush1.bf16.msra.mxu0 %v9746_v59  ;;  %3683 = vmatprep.subr.bf16.mxu1 %v9751_v60  ;;  %v9891_v59 = vld [vmem:[#allocation2 + $0xe8] ss:$16 sps:$4 sm:$0xff]   ;;  %v9895_v60 = vld [vmem:[#allocation2 + $0x1a0] ss:$16 sps:$4 sm:$0xff]  }
 0x3be   : > { %6830 = vmatprep.subr.bf16.mxu0 %v9754_v63  ;;  %v6345_v63 = vld [vmem:[#allocation2 + $0x1d0] sm:$0xff] }
 0x3c0   : > { %3684 = vmatpush1.bf16.msra.mxu1 %v9749_v1  ;;  %v9833_v1 = vld [vmem:[%s10890_s19 + $0x840] ss:$8 sps:$4 sm:$0xff]  }
 0x3c1   : > { %6831 = vmatpush1.bf16.msra.mxu0 %v9752_v18  ;;  %3685 = vmatprep.subr.bf16.mxu1 %v9758_v2  ;;  %v9836_v18 = vld [vmem:[%s10890_s19 + $0x1140] ss:$8 sps:$4 sm:$0xff]   ;;  %v9841_v2 = vld [vmem:[%s10890_s19 + $0x854] ss:$8 sps:$4 sm:$0xff]  }
 0x3c2   : > { %6832 = vmatprep.subr.bf16.mxu0 %v9762_v8  ;;  %v9844_v8 = vld [vmem:[%s10890_s19 + $0x1154] ss:$8 sps:$4 sm:$0xff]  }
 0x3c4   : > { %3686 = vmatpush1.bf16.msra.mxu1 %v9756_v61  ;;  %v9905_v61 = vld [vmem:[#allocation2 + $0x10c] ss:$16 sps:$4 sm:$0xff]  }
 0x3c5   : > { %6833 = vmatpush1.bf16.msra.mxu0 %v9760_v25  ;;  %3687 = vmatprep.subr.bf16.mxu1 %v9767_v29  ;;  %v8369_v25 = vcombine.high %v11470_v0, %v6345_v63  ;;  %v9839_v29 = vld [vmem:[%s10890_s19 + $0x850] ss:$8 sps:$4 sm:$0xff]  }
 0x3c6   : > { %6834 = vmatprep.subr.bf16.mxu0 %v9770_v28  ;;  %v9842_v28 = vld [vmem:[%s10890_s19 + $0x1150] ss:$8 sps:$4 sm:$0xff]  }
 0x3c8   : > { %3688 = vmatpush1.bf16.msra.mxu1 %v9765_v4  ;;  %v9847_v4 = vld [vmem:[%s10890_s19 + $0x864] ss:$8 sps:$4 sm:$0xff]  }
 0x3c9   : > { %6835 = vmatpush1.bf16.msra.mxu0 %v9768_v30  ;;  %3689 = vmatprep.subr.bf16.mxu1 %v9774_v24  ;;  %v9850_v30 = vld [vmem:[%s10890_s19 + $0x1164] ss:$8 sps:$4 sm:$0xff]   ;;  %v9908_v24 = vld [vmem:[#allocation2 + $0x108] ss:$16 sps:$4 sm:$0xff]  }
 0x3ca   : > { %6836 = vmatprep.subr.bf16.mxu0 %v9778_v41  ;;  %v8368_v41 = vcombine.low %v11470_v0, %v6345_v63  ;;  %v9851_v0 = vld [vmem:[%s10890_s19 + $0x870] ss:$8 sps:$4 sm:$0xff]   ;;  %v9928_v63 = vld [vmem:[#allocation2 + $0x18c] ss:$16 sps:$4 sm:$0xff]  }
 0x3cc   : > { %3690 = vmatpush1.bf16.msra.mxu1 %v9772_v11  ;;  %v9845_v11 = vld [vmem:[%s10890_s19 + $0x860] ss:$8 sps:$4 sm:$0xff]  }
 0x3cd   : > { %6837 = vmatpush1.bf16.msra.mxu0 %v9776_v31  ;;  %3691 = vmatprep.subr.bf16.mxu1 %v9783_v9  ;;  %v9848_v31 = vld [vmem:[%s10890_s19 + $0x1160] ss:$8 sps:$4 sm:$0xff]   ;;  %v9853_v9 = vld [vmem:[%s10890_s19 + $0x874] ss:$8 sps:$4 sm:$0xff]  }
 0x3ce   : > { %6838 = vmatprep.subr.bf16.mxu0 %v9786_v13  ;;  %v9856_v13 = vld [vmem:[%s10890_s19 + $0x1174] ss:$8 sps:$4 sm:$0xff]  }
 0x3d0   : > { %3692 = vmatpush1.bf16.msra.mxu1 %v9781_v37  ;;  %v7781_v37 = vcombine.high %v11484_v17, %v11536_v12 }
 0x3d1   : > { %6839 = vmatpush1.bf16.msra.mxu0 %v9784_v10  ;;  %3693 = vmatprep.subr.bf16.mxu1 %v9790_v5  ;;  %v9926_v10 = vld [vmem:[#allocation2 + $0x16c] ss:$16 sps:$4 sm:$0xff]   ;;  %v9854_v5 = vld [vmem:[%s10890_s19 + $0x1170] ss:$8 sps:$4 sm:$0xff]  }
 0x3d2   : > { %6840 = vmatprep.subr.bf16.mxu0 %v9794_v27  ;;  %v9859_v27 = vld [vmem:[%s10890_s19 + $0x884] ss:$8 sps:$4 sm:$0xff]  }
 0x3d4   : > { %3694 = vmatpush1.bf16.msra.mxu1 %v9788_v54  ;;  %v9862_v54 = vld [vmem:[%s10890_s19 + $0x1184] ss:$8 sps:$4 sm:$0xff]  }
 0x3d5   : > { %6841 = vmatpush1.bf16.msra.mxu0 %v9792_v55  ;;  %3695 = vmatprep.subr.bf16.mxu1 %v9799_v36  ;;  %v9857_v55 = vld [vmem:[%s10890_s19 + $0x880] ss:$8 sps:$4 sm:$0xff]  }
 0x3d6   : > { %6842 = vmatprep.subr.bf16.mxu0 %v9802_v15  ;;  %v9860_v36 = vld [vmem:[%s10890_s19 + $0x1180] ss:$8 sps:$4 sm:$0xff]   ;;  %v9865_v15 = vld [vmem:[%s10890_s19 + $0x894] ss:$8 sps:$4 sm:$0xff]  }
 0x3d8   : > { %3696 = vmatpush1.bf16.msra.mxu1 %v9797_v35  ;;  %v9868_v35 = vld [vmem:[%s10890_s19 + $0x1194] ss:$8 sps:$4 sm:$0xff]  }
 0x3d9   : > { %6843 = vmatpush1.bf16.msra.mxu0 %v9800_v42  ;;  %4236 = vmatprep.subr.bf16.mxu1 %v9808_v38  ;;  %v9863_v42 = vld [vmem:[%s10890_s19 + $0x890] ss:$8 sps:$4 sm:$0xff]  }
 0x3da   : > { %6885 = vmatprep.subr.bf16.mxu0 %v9814_v6  ;;  %v9866_v38 = vld [vmem:[%s10890_s19 + $0x1190] ss:$8 sps:$4 sm:$0xff]   ;;  %v9876_v6 = vld [vmem:[%s10890_s19 + $0x8a4] ss:$8 sps:$4 sm:$0xff]  }
 0x3db   : > { %3698 = vmatmul.mubr.bf16.vlgmr.msra.gmra.mrb[0].mxu1 %v9803_v40  ;;  %v9880_v40 = vld [vmem:[%s10890_s19 + $0x11a4] ss:$8 sps:$4 sm:$0xff]  }
 0x3dc   : > { %6845 = vmatmul.mubr.bf16.vlgmr.msra.gmra.mrb[0].mxu0 %v9809_v33  ;;  %4237 = vmatpush1.bf16.msra.mxu1 %v9806_v34  ;;  %v9874_v33 = vld [vmem:[%s10890_s19 + $0x8a0] ss:$8 sps:$4 sm:$0xff]  }
 0x3dd   : > { %6886 = vmatpush1.bf16.msra.mxu0 %v9812_v19  ;;  %4238 = vmatprep.subr.bf16.mxu1 %v9817_v49  ;;  %v9878_v34 = vld [vmem:[%s10890_s19 + $0x11a0] ss:$8 sps:$4 sm:$0xff]   ;;  %v9883_v19 = vld [vmem:[%s10890_s19 + $0x8b4] ss:$8 sps:$4 sm:$0xff]  }
 0x3de   : > { %6887 = vmatprep.subr.bf16.mxu0 %v9820_v21  ;;  %3707 = vmatprep.mubr.bf16.mxu1 %v9869_v16  ;;  %v9886_v49 = vld [vmem:[%s10890_s19 + $0x11b4] ss:$8 sps:$4 sm:$0xff]   ;;  %v9881_v21 = vld [vmem:[%s10890_s19 + $0x8b0] ss:$8 sps:$4 sm:$0xff]  }
 0x3df   : > { %6854 = vmatprep.mubr.bf16.mxu0 %v9871_v20  ;;  %v9884_v16 = vld [vmem:[%s10890_s19 + $0x11b0] ss:$8 sps:$4 sm:$0xff]   ;;  %v9894_v20 = vld [vmem:[%s10890_s19 + $0x8c4] ss:$8 sps:$4 sm:$0xff]  }
 0x3e0   : > { %4239 = vmatpush1.bf16.msra.mxu1 %v9815_v53  ;;  %v9898_v53 = vld [vmem:[%s10890_s19 + $0x11c4] ss:$8 sps:$4 sm:$0xff]  }
 0x3e1   : > { %6888 = vmatpush1.bf16.msra.mxu0 %v9818_v56  ;;  %4240 = vmatprep.subr.bf16.mxu1 %v9823_v50  ;;  %v9892_v56 = vld [vmem:[%s10890_s19 + $0x8c0] ss:$8 sps:$4 sm:$0xff]  }
 0x3e2   : > { %6889 = vmatprep.subr.bf16.mxu0 %v9826_v57  ;;  %v9896_v50 = vld [vmem:[%s10890_s19 + $0x11c0] ss:$8 sps:$4 sm:$0xff]   ;;  %v9901_v57 = vld [vmem:[%s10890_s19 + $0x8d4] ss:$8 sps:$4 sm:$0xff]  }
 0x3e3   : > { %3708 = vmatmul.mubr.bf16.gmra.mrb[4].mxu1 %v9873_v58  ;;  %v9904_v58 = vld [vmem:[%s10890_s19 + $0x11d4] ss:$8 sps:$4 sm:$0xff]  }
 0x3e4   : > { %6855 = vmatmul.mubr.bf16.gmra.mrb[4].mxu0 %v9877_v51  ;;  %4241 = vmatpush1.bf16.msra.mxu1 %v9821_v3  ;;  %v9899_v51 = vld [vmem:[%s10890_s19 + $0x8d0] ss:$8 sps:$4 sm:$0xff]  }
 0x3e5   : > { %6890 = vmatpush1.bf16.msra.mxu0 %v9824_v47  ;;  %4242 = vmatprep.subr.bf16.mxu1 %v9829_v7  ;;  %v9902_v3 = vld [vmem:[%s10890_s19 + $0x11d0] ss:$8 sps:$4 sm:$0xff]   ;;  %v9911_v47 = vld [vmem:[%s10890_s19 + $0x8e4] ss:$8 sps:$4 sm:$0xff]  }
 0x3e6   : > { %6891 = vmatprep.subr.bf16.mxu0 %v9832_v14  ;;  %3717 = vmatprep.mubr.bf16.mxu1 %v9887_v32  ;;  %v9915_v7 = vld [vmem:[%s10890_s19 + $0x11e4] ss:$8 sps:$4 sm:$0xff]   ;;  %v9909_v14 = vld [vmem:[%s10890_s19 + $0x8e0] ss:$8 sps:$4 sm:$0xff]  }
 0x3e7   : > { %6864 = vmatprep.mubr.bf16.mxu0 %v9889_v43  ;;  %v9913_v32 = vld [vmem:[%s10890_s19 + $0x11e0] ss:$8 sps:$4 sm:$0xff]   ;;  %v9918_v43 = vld [vmem:[%s10890_s19 + $0x8f4] ss:$8 sps:$4 sm:$0xff]  }
 0x3e8   : > { %4243 = vmatpush1.bf16.msra.mxu1 %v9827_v23  ;;  %v9921_v23 = vld [vmem:[%s10890_s19 + $0x11f4] ss:$8 sps:$4 sm:$0xff]  }
 0x3e9   : > { %6892 = vmatpush1.bf16.msra.mxu0 %v9830_v26  ;;  %4244 = vmatprep.subr.bf16.mxu1 %v9835_v46  ;;  %v9916_v26 = vld [vmem:[%s10890_s19 + $0x8f0] ss:$8 sps:$4 sm:$0xff]  }
 0x3ea   : > { %6893 = vmatprep.subr.bf16.mxu0 %v9838_v52  ;;  %v9919_v46 = vld [vmem:[%s10890_s19 + $0x11f0] ss:$8 sps:$4 sm:$0xff]   ;;  %v7780_v52 = vcombine.low %v11484_v17, %v11536_v12  ;;  %v3769_v17 = vld [vmem:[#allocation2 + $0x120] sm:$0xff]  ;;  %s10103_s19 = scalar_lea.vmem %s11763_s25, 2048 }
 0x3eb   : > { %3718 = vmatmul.mubr.bf16.gmra.mrb[8].mxu1 %v9891_v59  ;;  %v9924_v59 = vld [vmem:[#allocation2 + $0x168] ss:$16 sps:$4 sm:$0xff]   ;;  %p10104_p1 = scmp.ne.s32.totalorder %s11763_s25, %s10103_s19 }
 0x3ec   : > { %6865 = vmatmul.mubr.bf16.gmra.mrb[8].mxu0 %v9895_v60  ;;  %4245 = vmatpush1.bf16.msra.mxu1 %v9833_v1  ;;  %v7785_v60 = vcombine.high %v11538_v22, %v11556_v48  ;;  %v7784_v1 = vcombine.low %v11538_v22, %v11556_v48  ;;  %v6346_v12 = vld [vmem:[#allocation2 + $0x1d8] sm:$0xff]  ;;  %v7792_v48 = vcombine.low %v11578_v44, %v3769_v17 }
 0x3ed   : > { %6894 = vmatpush1.bf16.msra.mxu0 %v9836_v18  ;;  %4246 = vmatprep.subr.bf16.mxu1 %v9841_v2  ;;  %v9931_v18 = vld [vmem:[#allocation2 + $0x188] ss:$16 sps:$4 sm:$0xff]   ;;  %v7789_v2 = vcombine.high %v11558_v45, %v11576_v62  ;;  %v8371_v22 = vcombine.high %v11580_v39, %v6346_v12  ;;  %p10105_p6 = pnand %p10104_p1, %p11898_p4 }
 0x3ee   : > { %6895 = vmatprep.subr.bf16.mxu0 %v9844_v8  ;;  %3727 = vmatprep.mubr.bf16.mxu1 %v9905_v61  ;;  %v9933_v8 = vld [vmem:[#allocation2 + $0x1ac] ss:$16 sps:$4 sm:$0xff]   ;;  %v7788_v61 = vcombine.low %v11558_v45, %v11576_v62  ;;  %v1165_v62 = vld [vmem:[%s1164_s29] sm:$0x3]  ;;  %s10107_s29 = sshll.u32 %s10249_s30, 4  ;;  %s10108_s29 = int_to_ptr.vmem [resolvable:$false] %s10107_s29 }
 0x3ef   : > { %6874 = vmatprep.mubr.bf16.mxu0 %v8369_v25  ;;  %v9936_v25 = vld [vmem:[#allocation2 + $0x1a8] ss:$16 sps:$4 sm:$0xff]   ;;  %p10106_p13 = pneg %p10105_p6  ;;  %s10109_s14 = scalar_lea.vmem %s10108_s29, 4096 }
 0x3f0   : > { %4247 = vmatpush1.bf16.msra.mxu1 %v9839_v29  ;;  %v7793_v29 = vcombine.high %v11578_v44, %v3769_v17  ;;  %p10110_p10 = scmp.lt.s32.totalorder %s11763_s25, %s10108_s29  ;;  %p10111_p11 = scmp.lt.s32.totalorder %s10109_s14, %s10103_s19 }
 0x3f1   : > { %6896 = vmatpush1.bf16.msra.mxu0 %v9842_v28  ;;  %4248 = vmatprep.subr.bf16.mxu1 %v9847_v4  ;;  %v8370_v28 = vcombine.low %v11580_v39, %v6346_v12  ;;  %v1167_v4 = vlaneseq }
 0x3f2   : > { %6897 = vmatprep.subr.bf16.mxu0 %v9850_v30  ;;  %p10112_p5 = por %p10111_p11, %p10110_p10 }
 0x3f3   : > { %3728 = vmatmul.mubr.bf16.gmra.mrb[12].mxu1 %v9908_v24  ;;  %v1168_v30 = vshrl.u32 %v1167_v4, 7 }
 0x3f4   : > { %6875 = vmatmul.mubr.bf16.gmra.mrb[12].mxu0 %v8368_v41  ;;  %4249 = vmatpush1.bf16.msra.mxu1 %v9845_v11  ;;  %p10113_p8 = pnand %p10112_p5, %p10106_p13 }
 0x3f5   : > { %6898 = vmatpush1.bf16.msra.mxu0 %v9848_v31  ;;  %4250 = vmatprep.subr.bf16.mxu1 %v9853_v9  ;;  %v1169_v45 = vsub.s32 0, %v1168_v30  ;;  %v1173_v24 = vsub.s32 1, %v1168_v30 }
 0x3f6   : > { %6899 = vmatprep.subr.bf16.mxu0 %v9856_v13  ;;  %4268 = vmatprep.mubr.bf16.mxu1 %v7781_v37 }
 0x3f7   : > { %6917 = vmatprep.mubr.bf16.mxu0 %v9926_v10  ;;  %v11721_v41 = vrot.slane %v1165_v62, %v1169_v45  ;;  %v11723_v11 = vrot.slane %v1165_v62, %v1173_v24 }
 0x3f8   : > { %4251 = vmatpush1.bf16.msra.mxu1 %v9851_v0 }
 0x3f9   : > { %6900 = vmatpush1.bf16.msra.mxu0 %v9854_v5  ;;  %4252 = vmatprep.subr.bf16.mxu1 %v9859_v27 }
 0x3fa   : > { %6901 = vmatprep.subr.bf16.mxu0 %v9862_v54 }
 0x3fc   : > { %4253 = vmatpush1.bf16.msra.mxu1 %v9857_v55 }
 0x3fd   : > { %6902 = vmatpush1.bf16.msra.mxu0 %v9860_v36  ;;  %4254 = vmatprep.subr.bf16.mxu1 %v9865_v15 }
 0x3fe   : > { %6903 = vmatprep.subr.bf16.mxu0 %v9868_v35 }
 0x400   : > { %4255 = vmatpush1.bf16.msra.mxu1 %v9863_v42 }
 0x401   : > { %6904 = vmatpush1.bf16.msra.mxu0 %v9866_v38  ;;  %4256 = vmatprep.subr.bf16.mxu1 %v9876_v6 }
 0x402   : > { %6905 = vmatprep.subr.bf16.mxu0 %v9880_v40 }
 0x404   : > { %4257 = vmatpush1.bf16.msra.mxu1 %v9874_v33 }
 0x405   : > { %6906 = vmatpush1.bf16.msra.mxu0 %v9878_v34  ;;  %4258 = vmatprep.subr.bf16.mxu1 %v9883_v19 }
 0x406   : > { %6907 = vmatprep.subr.bf16.mxu0 %v9886_v49 }
 0x408   : > { %4259 = vmatpush1.bf16.msra.mxu1 %v9881_v21 }
 0x409   : > { %6908 = vmatpush1.bf16.msra.mxu0 %v9884_v16  ;;  %4260 = vmatprep.subr.bf16.mxu1 %v9894_v20 }
 0x40a   : > { %6909 = vmatprep.subr.bf16.mxu0 %v9898_v53 }
 0x40c   : > { %4261 = vmatpush1.bf16.msra.mxu1 %v9892_v56 }
 0x40d   : > { %6910 = vmatpush1.bf16.msra.mxu0 %v9896_v50  ;;  %4262 = vmatprep.subr.bf16.mxu1 %v9901_v57 }
 0x40e   : > { %6911 = vmatprep.subr.bf16.mxu0 %v9904_v58 }
 0x410   : > { %4263 = vmatpush1.bf16.msra.mxu1 %v9899_v51 }
 0x411   : > { %6912 = vmatpush1.bf16.msra.mxu0 %v9902_v3  ;;  %4264 = vmatprep.subr.bf16.mxu1 %v9911_v47 }
 0x412   : > { %6913 = vmatprep.subr.bf16.mxu0 %v9915_v7 }
 0x414   : > { %4265 = vmatpush1.bf16.msra.mxu1 %v9909_v14 }
 0x415   : > { %6914 = vmatpush1.bf16.msra.mxu0 %v9913_v32  ;;  %4266 = vmatprep.subr.bf16.mxu1 %v9918_v43 }
 0x416   : > { %6915 = vmatprep.subr.bf16.mxu0 %v9921_v23 }
 0x418   : > { %4267 = vmatpush1.bf16.msra.mxu1 %v9916_v26 }
 0x419   : > { %6916 = vmatpush1.bf16.msra.mxu0 %v9919_v46 }
 0x41b   : > { %4269 = vmatmul.mubr.bf16.vlgmr.msra.gmra.mrb[0].mxu1 %v7780_v52 }
 0x41c   : > { %6918 = vmatmul.mubr.bf16.vlgmr.msra.gmra.mrb[0].mxu0 %v9924_v59  ;;  %4278 = vmatprep.mubr.bf16.mxu1 %v7785_v60 }
 0x41d   : > { %6927 = vmatprep.mubr.bf16.mxu0 %v9928_v63 }
 0x423   : > { %4279 = vmatmul.mubr.bf16.gmra.mrb[4].mxu1 %v7784_v1 }
 0x424   : > { %6928 = vmatmul.mubr.bf16.gmra.mrb[4].mxu0 %v9931_v18  ;;  %4288 = vmatprep.mubr.bf16.mxu1 %v7789_v2 }
 0x425   : > { %6937 = vmatprep.mubr.bf16.mxu0 %v9933_v8 }
 0x42b   : > { %4289 = vmatmul.mubr.bf16.gmra.mrb[8].mxu1 %v7788_v61 }
 0x42c   : > { %6938 = vmatmul.mubr.bf16.gmra.mrb[8].mxu0 %v9936_v25  ;;  %4298 = vmatprep.mubr.bf16.mxu1 %v7793_v29 }
 0x42d   : > { %6947 = vmatprep.mubr.bf16.mxu0 %v8371_v22 }
 0x433   : > { %4299 = vmatmul.mubr.bf16.gmra.mrb[12].mxu1 %v7792_v48 }
 0x434   : > { %6948 = vmatmul.mubr.bf16.gmra.mrb[12].mxu0 %v8370_v28 }
 0x4ee   : > { %v4270_v31 = vpop.f32.mrb[0].mxu1 }
 0x4ef   : > { %v6919_v9 = vpop.f32.mrb[0].mxu0  ;;  %v8459_v44 = vadd.f32 %v4270_v31, %v11721_v41  ;;  %v4272_v39 = vpop.f32.mrb[1].mxu1 }
 0x4f0   : > { %v6921_v13 = vpop.f32.mrb[1].mxu0  ;;  %v8461_v37 = vadd.f32 %v4272_v39, %v11723_v11  ;;  %v4274_v10 = vpop.f32.mrb[2].mxu1 }
 0x4f1   : > { %v6923_v0 = vpop.f32.mrb[2].mxu0  ;;  %v8460_v5 = vadd.f32 %v8459_v44, %v6919_v9  ;;  %v8463_v27 = vadd.f32 %v4274_v10, %v11721_v41  ;;  %v4276_v54 = vpop.f32.mrb[3].mxu1 }
 0x4f2   : > { %v6925_v55 = vpop.f32.mrb[3].mxu0  ;;  %v8462_v36 = vadd.f32 %v8461_v37, %v6921_v13  ;;  %v8465_v15 = vadd.f32 %v4276_v54, %v11723_v11 }
 0x4f3   : > { %v6974_v35 = vmax.f32 %v8460_v5, 0.0  ;;  %v8464_v42 = vadd.f32 %v8463_v27, %v6923_v0 }
 0x4f4   : > { %v6975_v38 = vmax.f32 %v8462_v36, 0.0  ;;  %v8466_v6 = vadd.f32 %v8465_v15, %v6925_v55 }
 0x4f5   : > { %6990 = vst [vmem:[%s10552_s13] sm:$0xff] %v6974_v35  ;;  %v6976_v40 = vmax.f32 %v8464_v42, 0.0 }
 0x4f6   : > { %6991 = vst [vmem:[%s10552_s13 + $0x8] sm:$0xff] %v6975_v38  ;;  %v6977_v33 = vmax.f32 %v8466_v6, 0.0  ;;  %v4280_v34 = vpop.f32.mrb[4].mxu1 }
 0x4f7   : > { %v6929_v19 = vpop.f32.mrb[4].mxu0  ;;  %6992 = vst [vmem:[%s10552_s13 + $0x10] sm:$0xff] %v6976_v40  ;;  %v8467_v49 = vadd.f32 %v4280_v34, %v11721_v41  ;;  %v4282_v21 = vpop.f32.mrb[5].mxu1 }
 0x4f8   : > { %v6931_v16 = vpop.f32.mrb[5].mxu0  ;;  %6993 = vst [vmem:[%s10552_s13 + $0x18] sm:$0xff] %v6977_v33  ;;  %v8469_v20 = vadd.f32 %v4282_v21, %v11723_v11  ;;  %v4284_v53 = vpop.f32.mrb[6].mxu1 }
 0x4f9   : > { %v6933_v56 = vpop.f32.mrb[6].mxu0  ;;  %v8468_v50 = vadd.f32 %v8467_v49, %v6929_v19  ;;  %v8471_v57 = vadd.f32 %v4284_v53, %v11721_v41  ;;  %v4286_v58 = vpop.f32.mrb[7].mxu1 }
 0x4fa   : > { %v6935_v51 = vpop.f32.mrb[7].mxu0  ;;  %v8470_v3 = vadd.f32 %v8469_v20, %v6931_v16  ;;  %v8473_v47 = vadd.f32 %v4286_v58, %v11723_v11 }
 0x4fb   : > { %v6978_v7 = vmax.f32 %v8468_v50, 0.0  ;;  %v8472_v14 = vadd.f32 %v8471_v57, %v6933_v56 }
 0x4fc   : > { %v6979_v32 = vmax.f32 %v8470_v3, 0.0  ;;  %v8474_v43 = vadd.f32 %v8473_v47, %v6935_v51 }
 0x4fd   : > { %6994 = vst [vmem:[%s10552_s13 + $0x20] sm:$0xff] %v6978_v7  ;;  %v6980_v23 = vmax.f32 %v8472_v14, 0.0 }
 0x4fe   : > { %6995 = vst [vmem:[%s10552_s13 + $0x28] sm:$0xff] %v6979_v32  ;;  %v6981_v26 = vmax.f32 %v8474_v43, 0.0  ;;  %v4290_v46 = vpop.f32.mrb[8].mxu1 }
 0x4ff   : > { %v6939_v52 = vpop.f32.mrb[8].mxu0  ;;  %6996 = vst [vmem:[%s10552_s13 + $0x30] sm:$0xff] %v6980_v23  ;;  %v8475_v59 = vadd.f32 %v4290_v46, %v11721_v41  ;;  %v4292_v60 = vpop.f32.mrb[9].mxu1 }
 0x500   : > { %v6941_v63 = vpop.f32.mrb[9].mxu0  ;;  %6997 = vst [vmem:[%s10552_s13 + $0x38] sm:$0xff] %v6981_v26  ;;  %v8477_v1 = vadd.f32 %v4292_v60, %v11723_v11  ;;  %v4294_v18 = vpop.f32.mrb[10].mxu1 }
 0x501   : > { %v6943_v2 = vpop.f32.mrb[10].mxu0  ;;  %v8476_v8 = vadd.f32 %v8475_v59, %v6939_v52  ;;  %v8479_v17 = vadd.f32 %v4294_v18, %v11721_v41  ;;  %v4296_v12 = vpop.f32.mrb[11].mxu1 }
 0x502   : > { %v6945_v61 = vpop.f32.mrb[11].mxu0  ;;  %v8478_v25 = vadd.f32 %v8477_v1, %v6941_v63  ;;  %v8481_v29 = vadd.f32 %v4296_v12, %v11723_v11 }
 0x503   : > { %v6982_v22 = vmax.f32 %v8476_v8, 0.0  ;;  %v8480_v48 = vadd.f32 %v8479_v17, %v6943_v2 }
 0x504   : > { %v6983_v28 = vmax.f32 %v8478_v25, 0.0  ;;  %v8482_v4 = vadd.f32 %v8481_v29, %v6945_v61 }
 0x505   : > { %6998 = vst [vmem:[%s10552_s13 + $0x40] sm:$0xff] %v6982_v22  ;;  %v6984_v30 = vmax.f32 %v8480_v48, 0.0 }
 0x506   : > { %6999 = vst [vmem:[%s10552_s13 + $0x48] sm:$0xff] %v6983_v28  ;;  %v6985_v45 = vmax.f32 %v8482_v4, 0.0  ;;  %v4300_v62 = vpop.f32.mrb[12].mxu1 }
 0x507   : > { %v6949_v24 = vpop.f32.mrb[12].mxu0  ;;  %7000 = vst [vmem:[%s10552_s13 + $0x50] sm:$0xff] %v6984_v30  ;;  %v8483_v31 = vadd.f32 %v4300_v62, %v11721_v41  ;;  %v4302_v9 = vpop.f32.mrb[13].mxu1 }
 0x508   : > { %v6951_v44 = vpop.f32.mrb[13].mxu0  ;;  %7001 = vst [vmem:[%s10552_s13 + $0x58] sm:$0xff] %v6985_v45  ;;  %v8485_v39 = vadd.f32 %v4302_v9, %v11723_v11  ;;  %v4304_v13 = vpop.f32.mrb[14].mxu1 }
 0x509   : > { %v6953_v37 = vpop.f32.mrb[14].mxu0  ;;  %v8484_v10 = vadd.f32 %v8483_v31, %v6949_v24  ;;  %v8487_v0 = vadd.f32 %v4304_v13, %v11721_v41  ;;  %v4306_v5 = vpop.f32.mrb[15].mxu1 }
 0x50a   : > { %v6955_v27 = vpop.f32.mrb[15].mxu0  ;;  %v8486_v54 = vadd.f32 %v8485_v39, %v6951_v44  ;;  %v8489_v55 = vadd.f32 %v4306_v5, %v11723_v11 }
 0x50b   : > { %v6986_v36 = vmax.f32 %v8484_v10, 0.0  ;;  %v8488_v15 = vadd.f32 %v8487_v0, %v6953_v37 }
 0x50c   : > { %v6987_v35 = vmax.f32 %v8486_v54, 0.0  ;;  %v8490_v42 = vadd.f32 %v8489_v55, %v6955_v27 }
 0x50d   : > { %7002 = vst [vmem:[%s10552_s13 + $0x60] sm:$0xff] %v6986_v36  ;;  %v6988_v41 = vmax.f32 %v8488_v15, 0.0 }
 0x50e   : > { %7003 = vst [vmem:[%s10552_s13 + $0x68] sm:$0xff] %v6987_v35  ;;  %v6989_v11 = vmax.f32 %v8490_v42, 0.0 }
 0x50f   : > { %7004 = vst [vmem:[%s10552_s13 + $0x70] sm:$0xff] %v6988_v41 }
 0x510   : > { %7005 = vst [vmem:[%s10552_s13 + $0x78] sm:$0xff] %v6989_v11 }
 0x511   : > { %10116 = shalt.err (!%p10113_p8)
}
 0x512   : > { %s10117_s11 = scalar_lea.hbm %s11760_s6, 2048  ;;  %s10121_s21 = scalar_lea.hbm %s11897_s7, 12288 }
 0x513   : > { %p10118_p12 = scmp.ne.s32.totalorder %s11760_s6, %s10117_s11  ;;  %p10122_p9 = scmp.lt.u32.totalorder %s11760_s6, %s11897_s7 }
 0x514   : > { %p10123_p0 = scmp.lt.u32.totalorder %s10121_s21, %s10117_s11  ;;  %p10125_p1 = scmp.lt.u32.totalorder %s10117_s11, %s11760_s6 }
 0x515   : > { %p10119_p2 = pnand %p10118_p12, %p11898_p4 }
 0x516   : > { %p10124_p3 = por %p10123_p0, %p10122_p9 }
 0x517   : > { %p10120_p7 = pneg %p10119_p2 }
 0x518   : > { %p10126_p6 = por %p10125_p1, %p10124_p3 }
 0x51a   : > { %p10127_p13 = pnand %p10126_p6, %p10120_p7 }
 0x51c   : > { %10130 = shalt.err (!%p10127_p13)
}
 0x51d   : > { %s10250_s10 = smov 256   ;;  %s10251_s16 = smov 768  }
 0x51e   : > { %s10252_s19 = smov 16  }
 0x51f   : > { %8766 = dma.vmem_to_hbm [thread:$0]  (%p11898_p4), %s11763_s25, 2048, %s11760_s6, %s11770_s1, %s10250_s10, %s10251_s16, %s10252_s19  }
 0x520 PF: > { %s11899_s30 = sld [smem:[#allocation17_spill]]  ;;  %s11900_s29 = sld [smem:[#allocation22_spill]] }
 0x521   : > { %p8798_p10 = scmp.ge.s32.totalorder %s10233_s28, 2 }
 0x526   : > { %s7037_s14 = sand.u32 1, %s11899_s30   ;;  %p11901_p11 = scmp.ne.s32.totalorder %s11900_s29, 0 }
 0x527   : > { %s7038_s11 = scalar_lea.sflag [#allocation5], %s7037_s14 }
 0x528   : > { %p8786_p5 = pnand %p8798_p10, %p11901_p11 }
 0x52a   : > { %10188 = dma.done.wait (!%p8786_p5), %s7038_s11, 2048  }
 0x52b   : > { %10190 = vsyncadd (!%p8786_p5), %s7038_s11, 4294965248  ;;  %s23_s28 = sadd.s32 1, %s10233_s28   ;;  %s11902_s18 = sld [smem:[#allocation18_spill]] }
 0x52c   : > { %p20_p8 = scmp.ge.s32.totalorder %s23_s28, 8   ;;  %s11903_s19 = smov %s10201_s20 }
 0x52d   : > { %s11904_s20 = smov %s10487_s9  ;;  %s11905_s21 = smov %s10209_s22 }
 0x52e   : > { %s11906_s22 = smov %s10213_s23  ;;  %s11907_s23 = smov %s10484_s17 }
 0x52f   : > { %s11908_s24 = smov %s10225_s26  ;;  %s11909_s25 = smov %s10229_s27 }
 0x530   : > { %s11910_s26 = smov %s11913_s12  ;;  %s11911_s27 = smov %s11917_s15 }
 0x531   :  { %22 = sbr.rel (!%p20_p8) target bundleno = 14 (0xe), region = 128 }
 0x538   :  { %7043 = vsyncpa [#allocation4], 1 }
 0x539   :  { %7045 = vsyncpa [#allocation4 + $0x1], 1 }
 0x53a   :  { %7046 = vsyncpa [#allocation7], 1 }
 0x53b   :  { %7047 = vsyncpa [#allocation10], 1 }
 0x53c   :  { %7048 = vsyncpa [#allocation5], 1 }
 0x53d   :  { %7050 = vsyncpa [#allocation5 + $0x1], 1 }

</bundles_post_ra>
